<compile_context>
chip_gen: v6e
topology: v6e:2x2x1
jax: 0.10.0
libtpu: 0.0.40
codegen_flags: <defaults>
</compile_context>

<pallas_src>
import jax
import jax.numpy as jnp
from jax.experimental import pallas as pl
from jax.experimental.pallas import tpu as pltpu

LATENT_DIM = 64            # stand-in for args.latent_dim
HIDDEN = (128, 256, 512, 1024)
OUT_DIM = 28 * 28          # 784
OUT_PAD = 896              # 7 * 128 lane-aligned output slab
BN_EPS = 1e-5
NEG_SLOPE = 0.2
MAX_BATCH_TILE = 512       # 512-1024 amortizes per-step overhead on v6e/v7x;
                           # 512 also suits v5e (smaller steps there anyway).


def _round_up(x, m):
    return ((x + m - 1) // m) * m


def _cdiv(a, b):
    return -(-a // b)


def _leaky_relu(x):
    return jnp.where(x > 0, x, NEG_SLOPE * x)


def _batch_tiling(batch):
    """Pick (batch_tile, padded_batch).

    Prefers an even number (>= 2) of grid steps so the "parallel" batch axis
    can be sharded evenly across both v7x TensorCores, while keeping tiles as
    large as possible (<= MAX_BATCH_TILE rows) to amortize the ~0.35 us fixed
    per-grid-step overhead.
    """
    b8 = _round_up(batch, 8)
    if b8 <= 8:                           # one tiny tile; splitting only pads
        return b8, b8
    nsteps = max(2, _cdiv(b8, MAX_BATCH_TILE))
    if nsteps % 2:
        nsteps += 1                       # even step count -> equal work per TC
    tile = _round_up(_cdiv(b8, nsteps), 8)
    return tile, nsteps * tile


# ----------------------------------------------------------------------------
# Kernel: one batch tile per grid step; weights stay VMEM-resident
# (constant block index => fetched once across the whole grid).
# ----------------------------------------------------------------------------
def generator_kernel(z_ref,
                     w1_ref, b1_ref,
                     w2_ref, b2_ref,
                     w3_ref, b3_ref,
                     w4_ref, b4_ref,
                     w5_ref, b5_ref,
                     out_ref):
    def linear(x, w_ref, b_ref):
        # bf16 operands, f32 MXU accumulation, f32 bias add.
        return jnp.dot(x.astype(jnp.bfloat16), w_ref[...],
                       preferred_element_type=jnp.float32) + b_ref[...]

    h = _leaky_relu(linear(z_ref[...], w1_ref, b1_ref))
    h = _leaky_relu(linear(h, w2_ref, b2_ref))   # BN folded into w2/b2
    h = _leaky_relu(linear(h, w3_ref, b3_ref))   # BN folded into w3/b3
    h = _leaky_relu(linear(h, w4_ref, b4_ref))   # BN folded into w4/b4
    out_ref[...] = jnp.tanh(linear(h, w5_ref, b5_ref)).astype(out_ref.dtype)


# ----------------------------------------------------------------------------
# Parameter init (PyTorch-style) and preparation (fold / pad / cast).
# ----------------------------------------------------------------------------
def init_params(key, latent_dim=LATENT_DIM):
    """Deterministic PyTorch-style init: U(-1/sqrt(fan_in), 1/sqrt(fan_in))."""
    dims = (latent_dim,) + HIDDEN + (OUT_DIM,)
    params = {}
    keys = jax.random.split(key, 2 * (len(dims) - 1))
    for i in range(len(dims) - 1):
        fan_in, fan_out = dims[i], dims[i + 1]
        bound = 1.0 / jnp.sqrt(fan_in)
        # Stored as [in, out] (transpose of torch's [out, in]).
        params[f"w{i+1}"] = jax.random.uniform(
            keys[2 * i], (fan_in, fan_out), jnp.float32, -bound, bound)
        params[f"b{i+1}"] = jax.random.uniform(
            keys[2 * i + 1], (1, fan_out), jnp.float32, -bound, bound)
    # BatchNorm1d after linears 2, 3, 4 — default gamma=1, beta=0,
    # running_mean=0, running_var=1.
    for i, c in zip((2, 3, 4), HIDDEN[1:]):
        params[f"g{i}"] = jnp.ones((1, c), jnp.float32)
        params[f"be{i}"] = jnp.zeros((1, c), jnp.float32)
        params[f"m{i}"] = jnp.zeros((1, c), jnp.float32)
        params[f"v{i}"] = jnp.ones((1, c), jnp.float32)
    return params


def prepare_params(raw):
    """Fold eval-mode BN into the Linears, pad the output layer to the
    lane-aligned 896-wide slab, cast weights to bf16 (biases stay f32)."""
    p = {"w1": raw["w1"].astype(jnp.bfloat16), "b1": raw["b1"]}   # no latent pad
    # Layers 2-4: exact eval-mode BatchNorm folding.
    for i in (2, 3, 4):
        scale = raw[f"g{i}"] * jax.lax.rsqrt(raw[f"v{i}"] + BN_EPS)       # [1, C]
        w = raw[f"w{i}"] * scale                                          # [in, C]
        b = (raw[f"b{i}"] - raw[f"m{i}"]) * scale + raw[f"be{i}"]
        p[f"w{i}"], p[f"b{i}"] = w.astype(jnp.bfloat16), b
    # Layer 5: pad output features 784 -> 896 with zero columns (tanh(0)=0).
    w5 = jnp.zeros((HIDDEN[-1], OUT_PAD), jnp.float32).at[:, :OUT_DIM].set(raw["w5"])
    b5 = jnp.zeros((1, OUT_PAD), jnp.float32).at[:, :OUT_DIM].set(raw["b5"])
    p["w5"], p["b5"] = w5.astype(jnp.bfloat16), b5
    return p


# ----------------------------------------------------------------------------
# Wrapper: batch-tiled grid, resident weights, lane-dense bf16 padded output.
# ----------------------------------------------------------------------------
@jax.jit
def generator_forward(z, prep):
    B, L = z.shape
    TB, B_pad = _batch_tiling(B)

    z_bf = z.astype(jnp.bfloat16)
    if B_pad != B:
        z_bf = jnp.pad(z_bf, ((0, B_pad - B), (0, 0)))

    flat = (z_bf,
            prep["w1"], prep["b1"], prep["w2"], prep["b2"],
            prep["w3"], prep["b3"], prep["w4"], prep["b4"],
            prep["w5"], prep["b5"])

    # Weights/biases: one full-array block, constant block index -> fetched
    # once and VMEM-resident across all batch tiles.
    param_specs = [pl.BlockSpec(a.shape, lambda i: (0, 0)) for a in flat[1:]]
    in_specs = [pl.BlockSpec((TB, L), lambda i: (i, 0))] + param_specs
    out_spec = pl.BlockSpec((TB, OUT_PAD), lambda i: (i, 0))

    # Advisory roofline for XLA's scheduler around the custom call.
    flops = 2 * B_pad * (L * HIDDEN[0] + HIDDEN[0] * HIDDEN[1]
                         + HIDDEN[1] * HIDDEN[2] + HIDDEN[2] * HIDDEN[3]
                         + HIDDEN[3] * OUT_PAD)
    param_bytes = sum(int(a.size) * a.dtype.itemsize for a in flat[1:])
    bytes_accessed = param_bytes + B_pad * (L + OUT_PAD) * 2    # bf16 in/out streams

    out_padded = pl.pallas_call(
        generator_kernel,
        out_shape=jax.ShapeDtypeStruct((B_pad, OUT_PAD), jnp.bfloat16),
        grid=(B_pad // TB,),
        in_specs=in_specs,
        out_specs=out_spec,
        compiler_params=pltpu.CompilerParams(
            dimension_semantics=("parallel",)),
        cost_estimate=pl.CostEstimate(
            flops=flops,
            transcendentals=B_pad * OUT_PAD,
            bytes_accessed=bytes_accessed),
    )(*flat)

    # Padded columns/rows are exactly zero; bf16 halves the cost of this
    # un-pad slice vs the previous f32 slab. Downstream may also consume the
    # padded slab directly if preferred.
    return out_padded[:B, :OUT_DIM]


# ----------------------------------------------------------------------------
# References.
# ----------------------------------------------------------------------------
def reference_prepared(z, prep):
    """Mirror of the kernel math (folded params, bf16 dots, f32 accumulation,
    bf16 output)."""
    h = z.astype(jnp.bfloat16)
    for i in (1, 2, 3, 4):
        h = jnp.dot(h.astype(jnp.bfloat16), prep[f"w{i}"],
                    preferred_element_type=jnp.float32) + prep[f"b{i}"]
        h = _leaky_relu(h)
    h = jnp.dot(h.astype(jnp.bfloat16), prep["w5"],
                preferred_element_type=jnp.float32) + prep["b5"]
    return jnp.tanh(h).astype(jnp.bfloat16)[:, :OUT_DIM]


def reference_f32(z, raw):
    """Original-semantics eval-mode forward, pure f32."""
    h = _leaky_relu(z @ raw["w1"] + raw["b1"])
    for i in (2, 3, 4):
        h = h @ raw[f"w{i}"] + raw[f"b{i}"]
        inv_std = jax.lax.rsqrt(raw[f"v{i}"] + BN_EPS)
        h = (h - raw[f"m{i}"]) * inv_std * raw[f"g{i}"] + raw[f"be{i}"]
        h = _leaky_relu(h)
    return jnp.tanh(h @ raw["w5"] + raw["b5"])


if __name__ == "__main__":
    key = jax.random.PRNGKey(0)
    pkey, zkey = jax.random.split(key)

    raw_params = init_params(pkey)
    prep_params = prepare_params(raw_params)

    batch = 8
    z = jax.random.normal(zkey, (batch, LATENT_DIM), jnp.float32)

    out = generator_forward(z, prep_params)
    out = jax.block_until_ready(out)
    assert out.shape == (batch, OUT_DIM)
    assert out.dtype == jnp.bfloat16

    out_f32 = out.astype(jnp.float32)

    # Tight check against a reference that mirrors the kernel math exactly.
    ref_mirror = reference_prepared(z, prep_params).astype(jnp.float32)
    err_mirror = float(jnp.max(jnp.abs(out_f32 - ref_mirror)))
    assert err_mirror <= 2e-2, err_mirror

    # Looser sanity check against the original f32 eval-mode semantics
    # (difference comes only from the bf16 weight cast + bf16 output).
    ref_full = reference_f32(z, raw_params)
    err_f32 = float(jnp.max(jnp.abs(out_f32 - ref_full)))
    assert err_f32 <= 4e-2, err_f32

    print("KERNEL_OK")
</pallas_src>

<mosaic_0001>
module attributes {stable_mosaic.version = 11 : i64} {
  func.func @generator_kernel(%arg0: i32, %arg1: memref<8x64xbf16, #tpu.memory_space<vmem>>, %arg2: memref<64x128xbf16, #tpu.memory_space<vmem>>, %arg3: memref<1x128xf32, #tpu.memory_space<vmem>>, %arg4: memref<128x256xbf16, #tpu.memory_space<vmem>>, %arg5: memref<1x256xf32, #tpu.memory_space<vmem>>, %arg6: memref<256x512xbf16, #tpu.memory_space<vmem>>, %arg7: memref<1x512xf32, #tpu.memory_space<vmem>>, %arg8: memref<512x1024xbf16, #tpu.memory_space<vmem>>, %arg9: memref<1x1024xf32, #tpu.memory_space<vmem>>, %arg10: memref<1024x896xbf16, #tpu.memory_space<vmem>>, %arg11: memref<1x896xf32, #tpu.memory_space<vmem>>, %arg12: memref<8x896xbf16, #tpu.memory_space<vmem>>) attributes {dimension_semantics = [#tpu.dimension_semantics<parallel>], iteration_bounds = array<i64: 1>, scalar_prefetch = 0 : i64, scratch_operands = 0 : i64, tpu.core_type = #tpu.core_type<tc>, window_params = [{transform_indices = @transform_0, window_bounds = array<i64: 8, 64>}, {pipeline_mode = #tpu.pipeline_mode<synchronous>, transform_indices = @transform_1, window_bounds = array<i64: 64, 128>}, {pipeline_mode = #tpu.pipeline_mode<synchronous>, transform_indices = @transform_2, window_bounds = array<i64: 1, 128>}, {pipeline_mode = #tpu.pipeline_mode<synchronous>, transform_indices = @transform_3, window_bounds = array<i64: 128, 256>}, {pipeline_mode = #tpu.pipeline_mode<synchronous>, transform_indices = @transform_4, window_bounds = array<i64: 1, 256>}, {pipeline_mode = #tpu.pipeline_mode<synchronous>, transform_indices = @transform_5, window_bounds = array<i64: 256, 512>}, {pipeline_mode = #tpu.pipeline_mode<synchronous>, transform_indices = @transform_6, window_bounds = array<i64: 1, 512>}, {pipeline_mode = #tpu.pipeline_mode<synchronous>, transform_indices = @transform_7, window_bounds = array<i64: 512, 1024>}, {pipeline_mode = #tpu.pipeline_mode<synchronous>, transform_indices = @transform_8, window_bounds = array<i64: 1, 1024>}, {pipeline_mode = #tpu.pipeline_mode<synchronous>, transform_indices = @transform_9, window_bounds = array<i64: 1024, 896>}, {pipeline_mode = #tpu.pipeline_mode<synchronous>, transform_indices = @transform_10, window_bounds = array<i64: 1, 896>}, {transform_indices = @transform_11, window_bounds = array<i64: 8, 896>}]} {
    %c0 = arith.constant 0 : index
    %c0_0 = arith.constant 0 : index
    %0 = vector.load %arg1[%c0, %c0_0] : memref<8x64xbf16, #tpu.memory_space<vmem>>, vector<8x64xbf16>
    %c0_1 = arith.constant 0 : index
    %c0_2 = arith.constant 0 : index
    %1 = vector.load %arg2[%c0_1, %c0_2] : memref<64x128xbf16, #tpu.memory_space<vmem>>, vector<64x128xbf16>
    %cst = arith.constant dense<0.000000e+00> : vector<8x128xf32>
    %2 = tpu.matmul %0, %1, %cst {dimension_numbers = #tpu.dot_dimension_numbers<[1], [0], [0], [1], [0, 0, 1, 1], [], []>} : vector<8x64xbf16>, vector<64x128xbf16>, vector<8x128xf32> -> vector<8x128xf32>
    %c0_3 = arith.constant 0 : index
    %c0_4 = arith.constant 0 : index
    %3 = vector.load %arg3[%c0_3, %c0_4] : memref<1x128xf32, #tpu.memory_space<vmem>>, vector<1x128xf32>
    %4 = vector.broadcast %3 : vector<1x128xf32> to vector<8x128xf32>
    %5 = arith.addf %2, %4 : vector<8x128xf32>
    %cst_5 = arith.constant 0.000000e+00 : f32
    %6 = vector.broadcast %cst_5 : f32 to vector<8x128xf32>
    %7 = arith.cmpf ogt, %5, %6 : vector<8x128xf32>
    %cst_6 = arith.constant 2.000000e-01 : f32
    %8 = vector.broadcast %cst_6 : f32 to vector<8x128xf32>
    %9 = arith.mulf %8, %5 : vector<8x128xf32>
    %10 = arith.select %7, %5, %9 : vector<8x128xi1>, vector<8x128xf32>
    %11 = arith.truncf %10 : vector<8x128xf32> to vector<8x128xbf16>
    %c0_7 = arith.constant 0 : index
    %c0_8 = arith.constant 0 : index
    %12 = vector.load %arg4[%c0_7, %c0_8] : memref<128x256xbf16, #tpu.memory_space<vmem>>, vector<128x256xbf16>
    %cst_9 = arith.constant dense<0.000000e+00> : vector<8x256xf32>
    %13 = tpu.matmul %11, %12, %cst_9 {dimension_numbers = #tpu.dot_dimension_numbers<[1], [0], [0], [1], [0, 0, 1, 1], [], []>} : vector<8x128xbf16>, vector<128x256xbf16>, vector<8x256xf32> -> vector<8x256xf32>
    %c0_10 = arith.constant 0 : index
    %c0_11 = arith.constant 0 : index
    %14 = vector.load %arg5[%c0_10, %c0_11] : memref<1x256xf32, #tpu.memory_space<vmem>>, vector<1x256xf32>
    %15 = vector.broadcast %14 : vector<1x256xf32> to vector<8x256xf32>
    %16 = arith.addf %13, %15 : vector<8x256xf32>
    %cst_12 = arith.constant 0.000000e+00 : f32
    %17 = vector.broadcast %cst_12 : f32 to vector<8x256xf32>
    %18 = arith.cmpf ogt, %16, %17 : vector<8x256xf32>
    %cst_13 = arith.constant 2.000000e-01 : f32
    %19 = vector.broadcast %cst_13 : f32 to vector<8x256xf32>
    %20 = arith.mulf %19, %16 : vector<8x256xf32>
    %21 = arith.select %18, %16, %20 : vector<8x256xi1>, vector<8x256xf32>
    %22 = arith.truncf %21 : vector<8x256xf32> to vector<8x256xbf16>
    %c0_14 = arith.constant 0 : index
    %c0_15 = arith.constant 0 : index
    %23 = vector.load %arg6[%c0_14, %c0_15] : memref<256x512xbf16, #tpu.memory_space<vmem>>, vector<256x512xbf16>
    %cst_16 = arith.constant dense<0.000000e+00> : vector<8x512xf32>
    %24 = tpu.matmul %22, %23, %cst_16 {dimension_numbers = #tpu.dot_dimension_numbers<[1], [0], [0], [1], [0, 0, 1, 1], [], []>} : vector<8x256xbf16>, vector<256x512xbf16>, vector<8x512xf32> -> vector<8x512xf32>
    %c0_17 = arith.constant 0 : index
    %c0_18 = arith.constant 0 : index
    %25 = vector.load %arg7[%c0_17, %c0_18] : memref<1x512xf32, #tpu.memory_space<vmem>>, vector<1x512xf32>
    %26 = vector.broadcast %25 : vector<1x512xf32> to vector<8x512xf32>
    %27 = arith.addf %24, %26 : vector<8x512xf32>
    %cst_19 = arith.constant 0.000000e+00 : f32
    %28 = vector.broadcast %cst_19 : f32 to vector<8x512xf32>
    %29 = arith.cmpf ogt, %27, %28 : vector<8x512xf32>
    %cst_20 = arith.constant 2.000000e-01 : f32
    %30 = vector.broadcast %cst_20 : f32 to vector<8x512xf32>
    %31 = arith.mulf %30, %27 : vector<8x512xf32>
    %32 = arith.select %29, %27, %31 : vector<8x512xi1>, vector<8x512xf32>
    %33 = arith.truncf %32 : vector<8x512xf32> to vector<8x512xbf16>
    %c0_21 = arith.constant 0 : index
    %c0_22 = arith.constant 0 : index
    %34 = vector.load %arg8[%c0_21, %c0_22] : memref<512x1024xbf16, #tpu.memory_space<vmem>>, vector<512x1024xbf16>
    %cst_23 = arith.constant dense<0.000000e+00> : vector<8x1024xf32>
    %35 = tpu.matmul %33, %34, %cst_23 {dimension_numbers = #tpu.dot_dimension_numbers<[1], [0], [0], [1], [0, 0, 1, 1], [], []>} : vector<8x512xbf16>, vector<512x1024xbf16>, vector<8x1024xf32> -> vector<8x1024xf32>
    %c0_24 = arith.constant 0 : index
    %c0_25 = arith.constant 0 : index
    %36 = vector.load %arg9[%c0_24, %c0_25] : memref<1x1024xf32, #tpu.memory_space<vmem>>, vector<1x1024xf32>
    %37 = vector.broadcast %36 : vector<1x1024xf32> to vector<8x1024xf32>
    %38 = arith.addf %35, %37 : vector<8x1024xf32>
    %cst_26 = arith.constant 0.000000e+00 : f32
    %39 = vector.broadcast %cst_26 : f32 to vector<8x1024xf32>
    %40 = arith.cmpf ogt, %38, %39 : vector<8x1024xf32>
    %cst_27 = arith.constant 2.000000e-01 : f32
    %41 = vector.broadcast %cst_27 : f32 to vector<8x1024xf32>
    %42 = arith.mulf %41, %38 : vector<8x1024xf32>
    %43 = arith.select %40, %38, %42 : vector<8x1024xi1>, vector<8x1024xf32>
    %44 = arith.truncf %43 : vector<8x1024xf32> to vector<8x1024xbf16>
    %c0_28 = arith.constant 0 : index
    %c0_29 = arith.constant 0 : index
    %45 = vector.load %arg10[%c0_28, %c0_29] : memref<1024x896xbf16, #tpu.memory_space<vmem>>, vector<1024x896xbf16>
    %cst_30 = arith.constant dense<0.000000e+00> : vector<8x896xf32>
    %46 = tpu.matmul %44, %45, %cst_30 {dimension_numbers = #tpu.dot_dimension_numbers<[1], [0], [0], [1], [0, 0, 1, 1], [], []>} : vector<8x1024xbf16>, vector<1024x896xbf16>, vector<8x896xf32> -> vector<8x896xf32>
    %c0_31 = arith.constant 0 : index
    %c0_32 = arith.constant 0 : index
    %47 = vector.load %arg11[%c0_31, %c0_32] : memref<1x896xf32, #tpu.memory_space<vmem>>, vector<1x896xf32>
    %48 = vector.broadcast %47 : vector<1x896xf32> to vector<8x896xf32>
    %49 = arith.addf %46, %48 : vector<8x896xf32>
    %50 = math.tanh %49 : vector<8x896xf32>
    %51 = arith.truncf %50 : vector<8x896xf32> to vector<8x896xbf16>
    %c0_33 = arith.constant 0 : index
    %c0_34 = arith.constant 0 : index
    %52 = vector.load %arg12[%c0_33, %c0_34] : memref<8x896xbf16, #tpu.memory_space<vmem>>, vector<8x896xbf16>
    tpu.vector_store %arg12[%c0_33, %c0_34], %51 {strides = array<i32>} : memref<8x896xbf16, #tpu.memory_space<vmem>>, vector<8x896xbf16>,
    return
  }
  func.func @transform_0(%arg0: i32) -> (i32, i32) {
    %c0_i32 = arith.constant 0 : i32
    %c0_i32_0 = arith.constant 0 : i32
    return %arg0, %c0_i32 : i32, i32
  }
  func.func @transform_1(%arg0: i32) -> (i32, i32) {
    %c0_i32 = arith.constant 0 : i32
    %c0_i32_0 = arith.constant 0 : i32
    %c0_i32_1 = arith.constant 0 : i32
    return %c0_i32, %c0_i32_0 : i32, i32
  }
  func.func @transform_2(%arg0: i32) -> (i32, i32) {
    %c0_i32 = arith.constant 0 : i32
    %c0_i32_0 = arith.constant 0 : i32
    %c0_i32_1 = arith.constant 0 : i32
    return %c0_i32, %c0_i32_0 : i32, i32
  }
  func.func @transform_3(%arg0: i32) -> (i32, i32) {
    %c0_i32 = arith.constant 0 : i32
    %c0_i32_0 = arith.constant 0 : i32
    %c0_i32_1 = arith.constant 0 : i32
    return %c0_i32, %c0_i32_0 : i32, i32
  }
  func.func @transform_4(%arg0: i32) -> (i32, i32) {
    %c0_i32 = arith.constant 0 : i32
    %c0_i32_0 = arith.constant 0 : i32
    %c0_i32_1 = arith.constant 0 : i32
    return %c0_i32, %c0_i32_0 : i32, i32
  }
  func.func @transform_5(%arg0: i32) -> (i32, i32) {
    %c0_i32 = arith.constant 0 : i32
    %c0_i32_0 = arith.constant 0 : i32
    %c0_i32_1 = arith.constant 0 : i32
    return %c0_i32, %c0_i32_0 : i32, i32
  }
  func.func @transform_6(%arg0: i32) -> (i32, i32) {
    %c0_i32 = arith.constant 0 : i32
    %c0_i32_0 = arith.constant 0 : i32
    %c0_i32_1 = arith.constant 0 : i32
    return %c0_i32, %c0_i32_0 : i32, i32
  }
  func.func @transform_7(%arg0: i32) -> (i32, i32) {
    %c0_i32 = arith.constant 0 : i32
    %c0_i32_0 = arith.constant 0 : i32
    %c0_i32_1 = arith.constant 0 : i32
    return %c0_i32, %c0_i32_0 : i32, i32
  }
  func.func @transform_8(%arg0: i32) -> (i32, i32) {
    %c0_i32 = arith.constant 0 : i32
    %c0_i32_0 = arith.constant 0 : i32
    %c0_i32_1 = arith.constant 0 : i32
    return %c0_i32, %c0_i32_0 : i32, i32
  }
  func.func @transform_9(%arg0: i32) -> (i32, i32) {
    %c0_i32 = arith.constant 0 : i32
    %c0_i32_0 = arith.constant 0 : i32
    %c0_i32_1 = arith.constant 0 : i32
    return %c0_i32, %c0_i32_0 : i32, i32
  }
  func.func @transform_10(%arg0: i32) -> (i32, i32) {
    %c0_i32 = arith.constant 0 : i32
    %c0_i32_0 = arith.constant 0 : i32
    %c0_i32_1 = arith.constant 0 : i32
    return %c0_i32, %c0_i32_0 : i32, i32
  }
  func.func @transform_11(%arg0: i32) -> (i32, i32) {
    %c0_i32 = arith.constant 0 : i32
    %c0_i32_0 = arith.constant 0 : i32
    return %arg0, %c0_i32 : i32, i32
  }
}

</mosaic_0001>

<bundles_post_ra>
// kernel: generator_forward.1
= control target key start
LH: loop header
LB: loop body
LE: loop exit
PB: predicated region body
PF: predicated region fallthrough
CT: control target
= control target key end

     0   :  { %16 = vsyncpa [#allocation3], 0  ;;  %s8648_s0 = inlined_call_operand.vmem [shape: bf16[8,64], index: 0, kind: input, shape index: {}]   ;;  %s8649_s1 = inlined_call_operand.hbm [shape: bf16[64,128], index: 1, kind: input, shape index: {}]   ;;  %s8650_s2 = inlined_call_operand.hbm [shape: f32[1,128], index: 2, kind: input, shape index: {}]   ;;  %s8651_s3 = inlined_call_operand.hbm [shape: bf16[128,256], index: 3, kind: input, shape index: {}]   ;;  %s8652_s4 = inlined_call_operand.hbm [shape: f32[1,256], index: 4, kind: input, shape index: {}]   ;;  %s8653_s5 = inlined_call_operand.hbm [shape: bf16[256,512], index: 5, kind: input, shape index: {}]   ;;  %s8654_s6 = inlined_call_operand.hbm [shape: f32[1,512], index: 6, kind: input, shape index: {}]   ;;  %s8655_s7 = inlined_call_operand.hbm [shape: bf16[512,1024], index: 7, kind: input, shape index: {}]   ;;  %s8656_s8 = inlined_call_operand.hbm [shape: f32[1,1024], index: 8, kind: input, shape index: {}]   ;;  %s8657_s9 = inlined_call_operand.hbm [shape: bf16[1024,896], index: 9, kind: input, shape index: {}]   ;;  %s8658_s10 = inlined_call_operand.hbm [shape: f32[1,896], index: 10, kind: input, shape index: {}]   ;;  %s8659_s11 = inlined_call_operand.hbm [shape: bf16[8,896], index: 11, kind: output, shape index: {}]  }
   0x1   :  { %17 = vsyncpa [#allocation6], 0 }
   0x2   :  { %18 = vsyncpa [#allocation9], 0 }
   0x3   :  { %19 = vsyncpa [#allocation12], 0 }
   0x4   :  { %20 = vsyncpa [#allocation15], 0 }
   0x5   :  { %21 = vsyncpa [#allocation18], 0 }
   0x6   :  { %22 = vsyncpa [#allocation4], 0  ;;  %s8358_s17 = smov [#allocation5]   ;;  %s8359_s19 = smov [#allocation8]  }
   0x7   :  { %s43_s18 = sshll.u32 %s8358_s17, 4  ;;  %s65_s20 = sshll.u32 %s8359_s19, 4  ;;  %s44_s18 = int_to_ptr.vmem [resolvable:$true] %s43_s18  ;;  %s66_s20 = int_to_ptr.vmem [resolvable:$true] %s65_s20 }
   0x8   :  { %s8132_s21 = scalar_lea.vmem %s44_s18, 16  ;;  %s8136_s22 = scalar_lea.vmem %s44_s18, 32 }
   0x9   :  { %p8133_p0 = scmp.ne.s32.totalorder %s44_s18, %s8132_s21  ;;  %p8137_p1 = scmp.lt.s32.totalorder %s44_s18, %s44_s18 }
   0xa   :  { %p8138_p2 = scmp.lt.s32.totalorder %s8136_s22, %s8132_s21 }
   0xc   :  { %p8139_p3 = por %p8138_p2, %p8137_p1 }
   0xe   :  { %p8140_p4 = pnand %p8139_p3, %p8133_p0 }
  0x10   :  { %8143 = shalt.err (!%p8140_p4)
}
  0x11   :  { %46 = dma.hbm_to_vmem [thread:$0]  %s8650_s2, 16, %s44_s18, [#allocation6]  }
  0x12   :  { %s8152_s25 = scalar_lea.vmem %s66_s20, 32  ;;  %p8157_p6 = scmp.lt.s32.totalorder %s66_s20, %s66_s20 }
  0x13   :  { %p8153_p5 = scmp.ne.s32.totalorder %s66_s20, %s8152_s25  ;;  %p8158_p7 = scmp.lt.s32.totalorder %s8152_s25, %s8152_s25 }
  0x15   :  { %p8159_p8 = por %p8158_p7, %p8157_p6 }
  0x17   :  { %p8160_p9 = pnand %p8159_p8, %p8153_p5 }
  0x19   :  { %8163 = shalt.err (!%p8160_p9)
}
  0x1a   :  { %68 = dma.hbm_to_vmem [thread:$0]  %s8652_s4, 32, %s66_s20, [#allocation9]  }
  0x1b   :  { %s8360_s28 = smov [#allocation11]   ;;  %s8361_s30 = smov [#allocation14]  }
  0x1c   :  { %s87_s29 = sshll.u32 %s8360_s28, 4  ;;  %s109_s12 = sshll.u32 %s8361_s30, 4  ;;  %s88_s29 = int_to_ptr.vmem [resolvable:$true] %s87_s29  ;;  %s110_s12 = int_to_ptr.vmem [resolvable:$true] %s109_s12 }
  0x1d   :  { %s8172_s13 = scalar_lea.vmem %s88_s29, 64  ;;  %p8177_p11 = scmp.lt.s32.totalorder %s88_s29, %s88_s29 }
  0x1e   :  { %p8173_p10 = scmp.ne.s32.totalorder %s88_s29, %s8172_s13  ;;  %p8178_p12 = scmp.lt.s32.totalorder %s8172_s13, %s8172_s13 }
  0x20   :  { %p8179_p13 = por %p8178_p12, %p8177_p11 }
  0x22   :  { %p8180_p0 = pnand %p8179_p13, %p8173_p10 }
  0x24   :  { %8183 = shalt.err (!%p8180_p0)
}
  0x25   :  { %90 = dma.hbm_to_vmem [thread:$0]  %s8654_s6, 64, %s88_s29, [#allocation12]  }
  0x26   :  { %s8192_s15 = scalar_lea.vmem %s110_s12, 128  ;;  %p8197_p2 = scmp.lt.s32.totalorder %s110_s12, %s110_s12 }
  0x27   :  { %p8193_p1 = scmp.ne.s32.totalorder %s110_s12, %s8192_s15  ;;  %p8198_p3 = scmp.lt.s32.totalorder %s8192_s15, %s8192_s15 }
  0x29   :  { %p8199_p4 = por %p8198_p3, %p8197_p2 }
  0x2b   :  { %p8200_p5 = pnand %p8199_p4, %p8193_p1 }
  0x2d   :  { %8203 = shalt.err (!%p8200_p5)
}
  0x2e   :  { %112 = dma.hbm_to_vmem [thread:$0]  %s8656_s8, 128, %s110_s12, [#allocation15]  }
  0x2f   :  { %s8362_s17 = smov [#allocation2]  }
  0x30   :  { %s30_s18 = sshll.u32 %s8362_s17, 4  ;;  %s31_s18 = int_to_ptr.vmem [resolvable:$true] %s30_s18 }
  0x31   :  { %s8212_s19 = scalar_lea.vmem %s31_s18, 512  ;;  %p8217_p7 = scmp.lt.s32.totalorder %s31_s18, %s31_s18 }
  0x32   :  { %p8213_p6 = scmp.ne.s32.totalorder %s31_s18, %s8212_s19  ;;  %p8218_p8 = scmp.lt.s32.totalorder %s8212_s19, %s8212_s19 }
  0x34   :  { %p8219_p9 = por %p8218_p8, %p8217_p7 }
  0x36   :  { %p8220_p10 = pnand %p8219_p9, %p8213_p6 }
  0x38   :  { %8223 = shalt.err (!%p8220_p10)
}
  0x39   :  { %s8363_s6 = smov 64   ;;  %s8364_s20 = smov 4  }
  0x3a   :  { %36 = dma.hbm_to_vmem [thread:$0]  %s8649_s1, 512, %s31_s18, [#allocation3], %s8363_s6, %s8363_s6, %s8364_s20  }
  0x3b   :  { %s8365_s23 = smov [#allocation7]  }
  0x3c   :  { %s52_s24 = sshll.u32 %s8365_s23, 4  ;;  %s53_s24 = int_to_ptr.vmem [resolvable:$true] %s52_s24 }
  0x3d   :  { %s8232_s8 = scalar_lea.vmem %s53_s24, 2048  ;;  %p8237_p12 = scmp.lt.s32.totalorder %s53_s24, %s53_s24 }
  0x3e   :  { %p8233_p11 = scmp.ne.s32.totalorder %s53_s24, %s8232_s8  ;;  %p8238_p13 = scmp.lt.s32.totalorder %s8232_s8, %s8232_s8 }
  0x40   :  { %p8239_p0 = por %p8238_p13, %p8237_p12 }
  0x42   :  { %p8240_p1 = pnand %p8239_p0, %p8233_p11 }
  0x44   :  { %8243 = shalt.err (!%p8240_p1)
}
  0x45   :  { %s8366_s25 = smov 128   ;;  %s8367_s26 = smov 8  }
  0x46   :  { %58 = dma.hbm_to_vmem [thread:$0]  %s8651_s3, 2048, %s53_s24, [#allocation6], %s8366_s25, %s8366_s25, %s8367_s26  }
  0x47   :  { %s8368_s29 = smov [#allocation10]  }
  0x48   :  { %s74_s30 = sshll.u32 %s8368_s29, 4  ;;  %s75_s30 = int_to_ptr.vmem [resolvable:$true] %s74_s30 }
  0x49   :  { %s8252_s1 = scalar_lea.vmem %s75_s30, 8192  ;;  %p8257_p3 = scmp.lt.s32.totalorder %s75_s30, %s75_s30 }
  0x4a   :  { %p8253_p2 = scmp.ne.s32.totalorder %s75_s30, %s8252_s1  ;;  %p8258_p4 = scmp.lt.s32.totalorder %s8252_s1, %s8252_s1 }
  0x4c   :  { %p8259_p5 = por %p8258_p4, %p8257_p3 }
  0x4e   :  { %p8260_p6 = pnand %p8259_p5, %p8253_p2 }
  0x50   :  { %8263 = shalt.err (!%p8260_p6)
}
  0x51   :  { %s8369_s12 = smov 256   ;;  %s8370_s13 = smov 16  }
  0x52   :  { %80 = dma.hbm_to_vmem [thread:$0]  %s8653_s5, 8192, %s75_s30, [#allocation9], %s8369_s12, %s8369_s12, %s8370_s13  }
  0x53   :  { %s8371_s15 = smov [#allocation13]  }
  0x54   :  { %s96_s4 = sshll.u32 %s8371_s15, 4  ;;  %s97_s4 = int_to_ptr.vmem [resolvable:$true] %s96_s4 }
  0x55   :  { %s8272_s3 = scalar_lea.vmem %s97_s4, 32768  ;;  %p8277_p8 = scmp.lt.s32.totalorder %s97_s4, %s97_s4 }
  0x56   :  { %p8273_p7 = scmp.ne.s32.totalorder %s97_s4, %s8272_s3  ;;  %p8278_p9 = scmp.lt.s32.totalorder %s8272_s3, %s8272_s3 }
  0x58   :  { %p8279_p10 = por %p8278_p9, %p8277_p8 }
  0x5a   :  { %p8280_p11 = pnand %p8279_p10, %p8273_p7 }
  0x5c   :  { %8283 = shalt.err (!%p8280_p11)
}
  0x5d   :  { %s8372_s16 = smov 512   ;;  %s8373_s17 = smov 32  }
  0x5e   :  { %102 = dma.hbm_to_vmem [thread:$0]  %s8655_s7, 32768, %s97_s4, [#allocation12], %s8372_s16, %s8372_s16, %s8373_s17  }
  0x5f   :  { %s8374_s6 = smov [#allocation16]  }
  0x60   :  { %s118_s20 = sshll.u32 %s8374_s6, 4  ;;  %s119_s20 = int_to_ptr.vmem [resolvable:$true] %s118_s20 }
  0x61   :  { %s8292_s5 = scalar_lea.vmem %s119_s20, 57344  ;;  %p8297_p13 = scmp.lt.s32.totalorder %s119_s20, %s119_s20 }
  0x62   :  { %p8293_p12 = scmp.ne.s32.totalorder %s119_s20, %s8292_s5  ;;  %p8298_p0 = scmp.lt.s32.totalorder %s8292_s5, %s8292_s5 }
  0x64   :  { %p8299_p1 = por %p8298_p0, %p8297_p13 }
  0x66   :  { %p8300_p2 = pnand %p8299_p1, %p8293_p12 }
  0x68   :  { %8303 = shalt.err (!%p8300_p2)
}
  0x69   :  { %s8375_s21 = smov 448   ;;  %s8376_s22 = smov 28  }
  0x6a   :  { %124 = dma.hbm_to_vmem [thread:$0]  %s8657_s9, 57344, %s119_s20, [#allocation15], %s8375_s21, %s8375_s21, %s8376_s22  }
  0x6b   :  { %s8377_s8 = smov [#allocation17]  }
  0x6c   :  { %s131_s25 = sshll.u32 %s8377_s8, 4  ;;  %s132_s25 = int_to_ptr.vmem [resolvable:$true] %s131_s25 }
  0x6d   :  { %s8312_s7 = scalar_lea.vmem %s132_s25, 112  ;;  %s8316_s26 = scalar_lea.vmem %s132_s25, 128 }
  0x6e   :  { %p8313_p3 = scmp.ne.s32.totalorder %s132_s25, %s8312_s7  ;;  %p8317_p4 = scmp.lt.s32.totalorder %s132_s25, %s132_s25 }
  0x6f   :  { %p8318_p5 = scmp.lt.s32.totalorder %s8316_s26, %s8312_s7 }
  0x71   :  { %p8319_p6 = por %p8318_p5, %p8317_p4 }
  0x73   :  { %p8320_p7 = pnand %p8319_p6, %p8313_p3 }
  0x75   :  { %8323 = shalt.err (!%p8320_p7)
}
  0x76   :  { %134 = dma.hbm_to_vmem [thread:$0]  %s8658_s10, 112, %s132_s25, [#allocation18]  }
  0x77   :  { %8344 = dma.done.wait [#allocation3], 512  }
  0x78   :  { %8345 = vsyncadd [#allocation3], 4294966784 }
  0x79   :  { %8346 = dma.done.wait [#allocation6], 2064  }
  0x7a   :  { %8347 = vsyncadd [#allocation6], 4294965232 }
  0x7b   :  { %8348 = dma.done.wait [#allocation9], 8224  }
  0x7c   :  { %8349 = vsyncadd [#allocation9], 4294959072 }
  0x7d   :  { %8350 = dma.done.wait [#allocation12], 32832  }
  0x7e   :  { %8351 = vsyncadd [#allocation12], 4294934464 }
  0x7f   :  { %8352 = dma.done.wait [#allocation15], 57472  }
  0x80   :  { %8353 = vsyncadd [#allocation15], 4294909824 }
  0x81   :  { %8354 = dma.done.wait [#allocation18], 112  }
  0x82   :  { %8355 = vsyncadd [#allocation18], 4294967184  ;;  %v8378_v0 = vmov 0.0   ;;  %vm8379_vm0 = vmmov 0   ;;  %v7345_v1 = vld [vmem:[#allocation2 + $0x18] sm:$0xff]   ;;  %v7346_v2 = vld [vmem:[#allocation2 + $0x10] sm:$0xff]  }
  0x83   :  { %7309 = vmatprep.subr.bf16.mxu0 %v8378_v0  ;;  %7317 = vmatprep.mubr.msk.bf16.mxu0 %vm8379_vm0, %v8378_v0  ;;  %v7349_v3 = vld [vmem:[#allocation7 + $0x74] ss:$8 sps:$4 sm:$0xff]   ;;  %v7351_v4 = vld [vmem:[#allocation7 + $0x70] ss:$8 sps:$4 sm:$0xff]   ;;  %v7347_v5 = vld [vmem:[#allocation2 + $0x8] sm:$0xff]   ;;  %vm206_vm1 = vcmask 523264  }
  0x84   :  { %7310 = vmatpush3.bf16.msra.mxu0 %v7345_v1  ;;  %v7352_v6 = vld [vmem:[#allocation7 + $0x64] ss:$8 sps:$4 sm:$0xff]   ;;  %362 = vmatprep.subr.bf16.mxu1 %v7349_v3  ;;  %v7354_v7 = vld [vmem:[#allocation7 + $0x60] ss:$8 sps:$4 sm:$0xff]   ;;  %v7355_v8 = vld [vmem:[#allocation7 + $0x54] ss:$8 sps:$4 sm:$0xff]  }
  0x85   :  { %7311 = vmatprep.subr.bf16.mxu0 %v8378_v0  ;;  %363 = vmatpush1.bf16.msra.mxu1 %v7351_v4  ;;  %v7348_v9 = vld [vmem:[#allocation2] sm:$0xff]   ;;  %v7357_v11 = vld [vmem:[#allocation7 + $0x50] ss:$8 sps:$4 sm:$0xff]   ;;  %v8380_v22 = vmov 0  }
  0x86   :  { %364 = vmatprep.subr.bf16.mxu1 %v7352_v6  ;;  %v166_v10 = vld [vmem:[%s8648_s0] sm:$0xf]  ;;  %v7358_v12 = vld [vmem:[#allocation7 + $0x44] ss:$8 sps:$4 sm:$0xff]   ;;  %v7363_v15 = vld [vmem:[#allocation7 + $0x30] ss:$8 sps:$4 sm:$0xff]   ;;  %394 = vmatprep.mubr.bf16.mxu1 %v8380_v22 }
  0x87   :  { %v7360_v13 = vld [vmem:[#allocation7 + $0x40] ss:$8 sps:$4 sm:$0xff]   ;;  %v7361_v14 = vld [vmem:[#allocation7 + $0x34] ss:$8 sps:$4 sm:$0xff]   ;;  %v7364_v16 = vld [vmem:[#allocation7 + $0x24] ss:$8 sps:$4 sm:$0xff]  }
  0x88   :  { %7312 = vmatpush3.bf16.msra.mxu0 %v7346_v2  ;;  %v7366_v17 = vld [vmem:[#allocation7 + $0x20] ss:$8 sps:$4 sm:$0xff]   ;;  %v7367_v18 = vld [vmem:[#allocation7 + $0x14] ss:$8 sps:$4 sm:$0xff]   ;;  %v7369_v19 = vld [vmem:[#allocation7 + $0x10] ss:$8 sps:$4 sm:$0xff]  }
  0x89   :  { %7313 = vmatprep.subr.bf16.mxu0 %v8378_v0  ;;  %365 = vmatpush1.bf16.msra.mxu1 %v7354_v7  ;;  %v7370_v20 = vld [vmem:[#allocation7 + $0x4] ss:$8 sps:$4 sm:$0xff]   ;;  %v7372_v21 = vld [vmem:[#allocation7] ss:$8 sps:$4 sm:$0xff]   ;;  %v6418_v52 = vld [vmem:[#allocation5] ss:$0 sm:$0xff] }
  0x8a   :  { %366 = vmatprep.subr.bf16.mxu1 %v7355_v8  ;;  %v7373_v23 = vld [vmem:[#allocation10 + $0xe0] ss:$16 sps:$4 sm:$0xff]   ;;  %v7375_v24 = vld [vmem:[#allocation10 + $0xe4] ss:$16 sps:$4 sm:$0xff]   ;;  %v7378_v25 = vld [vmem:[#allocation10 + $0xec] ss:$16 sps:$4 sm:$0xff]  }
  0x8b   :  { %v7381_v26 = vld [vmem:[#allocation10 + $0xc4] ss:$16 sps:$4 sm:$0xff]   ;;  %v7379_v27 = vld [vmem:[#allocation10 + $0xc0] ss:$16 sps:$4 sm:$0xff]   ;;  %v7376_v57 = vld [vmem:[#allocation10 + $0xe8] ss:$16 sps:$4 sm:$0xff]  }
  0x8c   :  { %7314 = vmatpush3.bf16.msra.mxu0 %v7347_v5  ;;  %v7387_v28 = vld [vmem:[#allocation10 + $0xa4] ss:$16 sps:$4 sm:$0xff]   ;;  %v7385_v29 = vld [vmem:[#allocation10 + $0xa0] ss:$16 sps:$4 sm:$0xff]   ;;  %v7384_v59 = vld [vmem:[#allocation10 + $0xcc] ss:$16 sps:$4 sm:$0xff]  }
  0x8d   :  { %7315 = vmatprep.subr.bf16.mxu0 %v8378_v0  ;;  %367 = vmatpush1.bf16.msra.mxu1 %v7357_v11  ;;  %v7393_v30 = vld [vmem:[#allocation10 + $0x84] ss:$16 sps:$4 sm:$0xff]   ;;  %v7391_v31 = vld [vmem:[#allocation10 + $0x80] ss:$16 sps:$4 sm:$0xff]   ;;  %v7382_v63 = vld [vmem:[#allocation10 + $0xc8] ss:$16 sps:$4 sm:$0xff]  }
  0x8e   :  { %368 = vmatprep.subr.bf16.mxu1 %v7358_v12  ;;  %v7399_v32 = vld [vmem:[#allocation10 + $0x64] ss:$16 sps:$4 sm:$0xff]   ;;  %v7397_v33 = vld [vmem:[#allocation10 + $0x60] ss:$16 sps:$4 sm:$0xff]   ;;  %v7390_v0 = vld [vmem:[#allocation10 + $0xac] ss:$16 sps:$4 sm:$0xff]  }
  0x8f   :  { %v7405_v34 = vld [vmem:[#allocation10 + $0x44] ss:$16 sps:$4 sm:$0xff]   ;;  %v7403_v35 = vld [vmem:[#allocation10 + $0x40] ss:$16 sps:$4 sm:$0xff]   ;;  %v7388_v1 = vld [vmem:[#allocation10 + $0xa8] ss:$16 sps:$4 sm:$0xff]  }
  0x90   :  { %7316 = vmatpush3.bf16.msra.mxu0 %v7348_v9  ;;  %v7411_v36 = vld [vmem:[#allocation10 + $0x24] ss:$16 sps:$4 sm:$0xff]   ;;  %v7409_v37 = vld [vmem:[#allocation10 + $0x20] ss:$16 sps:$4 sm:$0xff]   ;;  %v7396_v2 = vld [vmem:[#allocation10 + $0x8c] ss:$16 sps:$4 sm:$0xff]  }
  0x91   :  { %369 = vmatpush1.bf16.msra.mxu1 %v7360_v13  ;;  %817 = vmatprep.subr.bf16.mxu0 %v7375_v24  ;;  %v7417_v38 = vld [vmem:[#allocation10 + $0x4] ss:$16 sps:$4 sm:$0xff]   ;;  %v7415_v39 = vld [vmem:[#allocation10] ss:$16 sps:$4 sm:$0xff]   ;;  %v7394_v3 = vld [vmem:[#allocation10 + $0x88] ss:$16 sps:$4 sm:$0xff]  }
  0x92   :  { %370 = vmatprep.subr.bf16.mxu1 %v7361_v14  ;;  %v7423_v40 = vld [vmem:[#allocation10 + $0x1e4] ss:$16 sps:$4 sm:$0xff]   ;;  %v7421_v41 = vld [vmem:[#allocation10 + $0x1e0] ss:$16 sps:$4 sm:$0xff]   ;;  %v7402_v4 = vld [vmem:[#allocation10 + $0x6c] ss:$16 sps:$4 sm:$0xff]  }
  0x93   :  { %7318 = vmatmul.mubr.msk.bf16.vlgmr.msra.gmra.mxu0 %vm206_vm1, %v166_v10  ;;  %v7429_v42 = vld [vmem:[#allocation10 + $0x1c4] ss:$16 sps:$4 sm:$0xff]   ;;  %v7427_v43 = vld [vmem:[#allocation10 + $0x1c0] ss:$16 sps:$4 sm:$0xff]   ;;  %v7400_v5 = vld [vmem:[#allocation10 + $0x68] ss:$16 sps:$4 sm:$0xff]  }
  0x94   :  { %818 = vmatpush1.bf16.msra.mxu0 %v7373_v23  ;;  %v7435_v44 = vld [vmem:[#allocation10 + $0x1a4] ss:$16 sps:$4 sm:$0xff]   ;;  %v7433_v45 = vld [vmem:[#allocation10 + $0x1a0] ss:$16 sps:$4 sm:$0xff]   ;;  %v7408_v6 = vld [vmem:[#allocation10 + $0x4c] ss:$16 sps:$4 sm:$0xff]  }
  0x95   :  { %371 = vmatpush1.bf16.msra.mxu1 %v7363_v15  ;;  %819 = vmatprep.subr.bf16.mxu0 %v7381_v26  ;;  %v7441_v46 = vld [vmem:[#allocation10 + $0x184] ss:$16 sps:$4 sm:$0xff]   ;;  %v7439_v47 = vld [vmem:[#allocation10 + $0x180] ss:$16 sps:$4 sm:$0xff]   ;;  %v7406_v7 = vld [vmem:[#allocation10 + $0x48] ss:$16 sps:$4 sm:$0xff]  }
  0x96   :  { %372 = vmatprep.subr.bf16.mxu1 %v7364_v16  ;;  %v7447_v48 = vld [vmem:[#allocation10 + $0x164] ss:$16 sps:$4 sm:$0xff]   ;;  %v7445_v49 = vld [vmem:[#allocation10 + $0x160] ss:$16 sps:$4 sm:$0xff]   ;;  %v7414_v8 = vld [vmem:[#allocation10 + $0x2c] ss:$16 sps:$4 sm:$0xff]  }
  0x97   :  { %v7453_v50 = vld [vmem:[#allocation10 + $0x144] ss:$16 sps:$4 sm:$0xff]   ;;  %v7451_v51 = vld [vmem:[#allocation10 + $0x140] ss:$16 sps:$4 sm:$0xff]   ;;  %v7412_v9 = vld [vmem:[#allocation10 + $0x28] ss:$16 sps:$4 sm:$0xff]  }
  0x98   :  { %820 = vmatpush1.bf16.msra.mxu0 %v7379_v27  ;;  %v7420_v10 = vld [vmem:[#allocation10 + $0xc] ss:$16 sps:$4 sm:$0xff]   ;;  %v7418_v11 = vld [vmem:[#allocation10 + $0x8] ss:$16 sps:$4 sm:$0xff]   ;;  %v7459_v24 = vld [vmem:[#allocation10 + $0x124] ss:$16 sps:$4 sm:$0xff]  }
  0x99   :  { %373 = vmatpush1.bf16.msra.mxu1 %v7366_v17  ;;  %821 = vmatprep.subr.bf16.mxu0 %v7387_v28  ;;  %v7426_v12 = vld [vmem:[#allocation10 + $0x1ec] ss:$16 sps:$4 sm:$0xff]   ;;  %v7424_v13 = vld [vmem:[#allocation10 + $0x1e8] ss:$16 sps:$4 sm:$0xff]   ;;  %v7457_v26 = vld [vmem:[#allocation10 + $0x120] ss:$16 sps:$4 sm:$0xff]  }
  0x9a   :  { %374 = vmatprep.subr.bf16.mxu1 %v7367_v18  ;;  %v7432_v14 = vld [vmem:[#allocation10 + $0x1cc] ss:$16 sps:$4 sm:$0xff]   ;;  %v7430_v15 = vld [vmem:[#allocation10 + $0x1c8] ss:$16 sps:$4 sm:$0xff]   ;;  %v7465_v28 = vld [vmem:[#allocation10 + $0x104] ss:$16 sps:$4 sm:$0xff]  }
  0x9b   :  { %v7438_v16 = vld [vmem:[#allocation10 + $0x1ac] ss:$16 sps:$4 sm:$0xff]   ;;  %v7436_v17 = vld [vmem:[#allocation10 + $0x1a8] ss:$16 sps:$4 sm:$0xff]   ;;  %s8381_s0 = smov [#allocation19]  }
  0x9c   :  { %822 = vmatpush1.bf16.msra.mxu0 %v7385_v29  ;;  %v7444_v18 = vld [vmem:[#allocation10 + $0x18c] ss:$16 sps:$4 sm:$0xff]   ;;  %v7454_v23 = vld [vmem:[#allocation10 + $0x148] ss:$16 sps:$4 sm:$0xff]   ;;  %s6404_s29 = sshll.u32 %s8381_s0, 4  ;;  %s6405_s29 = int_to_ptr.vmem [resolvable:$true] %s6404_s29 }
  0x9d   :  { %375 = vmatpush1.bf16.msra.mxu1 %v7369_v19  ;;  %823 = vmatprep.subr.bf16.mxu0 %v7393_v30  ;;  %v7442_v19 = vld [vmem:[#allocation10 + $0x188] ss:$16 sps:$4 sm:$0xff]   ;;  %v7456_v22 = vld [vmem:[#allocation10 + $0x14c] ss:$16 sps:$4 sm:$0xff]   ;;  %v7463_v30 = vld [vmem:[#allocation10 + $0x100] ss:$16 sps:$4 sm:$0xff]   ;;  %p8329_p9 = scmp.lt.s32.totalorder %s6405_s29, %s6405_s29 }
  0x9e   :  { %376 = vmatprep.subr.bf16.mxu1 %v7370_v20  ;;  %v7450_v20 = vld [vmem:[#allocation10 + $0x16c] ss:$16 sps:$4 sm:$0xff]   ;;  %v7460_v27 = vld [vmem:[#allocation10 + $0x128] ss:$16 sps:$4 sm:$0xff]   ;;  %s8324_s30 = scalar_lea.vmem %s6405_s29, 448 }
  0x9f   :  { %v7468_v29 = vld [vmem:[#allocation10 + $0x10c] ss:$16 sps:$4 sm:$0xff]   ;;  %p8325_p8 = scmp.ne.s32.totalorder %s6405_s29, %s8324_s30  ;;  %p8330_p10 = scmp.lt.s32.totalorder %s8324_s30, %s8324_s30 }
  0xa0   :  { %824 = vmatpush1.bf16.msra.mxu0 %v7391_v31  ;;  %v7466_v31 = vld [vmem:[#allocation10 + $0x108] ss:$16 sps:$4 sm:$0xff]  }
  0xa1   :  { %377 = vmatpush1.bf16.msra.mxu1 %v7372_v21  ;;  %825 = vmatprep.subr.bf16.mxu0 %v7399_v32  ;;  %v7448_v21 = vld [vmem:[#allocation10 + $0x168] ss:$16 sps:$4 sm:$0xff]   ;;  %p8331_p11 = por %p8330_p10, %p8329_p9 }
  0xa2   :  { %858 = vmatprep.subr.bf16.mxu1 %v7378_v25  ;;  %v7462_v25 = vld [vmem:[#allocation10 + $0x12c] ss:$16 sps:$4 sm:$0xff]   ;;  %v971_v32 = vld [vmem:[#allocation13 + $0x1c0] sm:$0xff] }
  0xa3   :  { %p8332_p12 = pnand %p8331_p11, %p8325_p8 }
  0xa4   :  { %826 = vmatpush1.bf16.msra.mxu0 %v7397_v33  ;;  %v975_v33 = vld [vmem:[#allocation13 + $0x1e0] sm:$0xff] }
  0xa5   :  { %827 = vmatprep.subr.bf16.mxu0 %v7405_v34  ;;  %v1099_v34 = vld [vmem:[#allocation13 + $0x5c0] sm:$0xff] }
  0xa8   :  { %828 = vmatpush1.bf16.msra.mxu0 %v7403_v35  ;;  %v6560_v35 = vcombine.low %v971_v32, %v975_v33 }
  0xa9   :  { %829 = vmatprep.subr.bf16.mxu0 %v7411_v36  ;;  %v6561_v36 = vcombine.high %v971_v32, %v975_v33  ;;  %v923_v33 = vld [vmem:[#allocation13 + $0x40] sm:$0xff] }
  0xac   :  { %830 = vmatpush1.bf16.msra.mxu0 %v7409_v37  ;;  %v1103_v37 = vld [vmem:[#allocation13 + $0x5e0] sm:$0xff] }
  0xad   :  { %831 = vmatprep.subr.bf16.mxu0 %v7417_v38  ;;  %v6688_v38 = vcombine.low %v1099_v34, %v1103_v37 }
  0xb0   :  { %832 = vmatpush1.bf16.msra.mxu0 %v7415_v39  ;;  %v6689_v39 = vcombine.high %v1099_v34, %v1103_v37  ;;  %v927_v34 = vld [vmem:[#allocation13 + $0x60] sm:$0xff] }
  0xb1   :  { %833 = vmatprep.subr.bf16.mxu0 %v7423_v40  ;;  %v272_v40 = vlaneseq }
  0xb4   :  { %834 = vmatpush2.bf16.msra.mxu0 %v7421_v41  ;;  %v8475_v41 = vshrl.u32 %v272_v40, 7 }
  0xb5   :  { %835 = vmatprep.subr.bf16.mxu0 %v7429_v42 }
  0xb6   :  { %v8478_v42 = vsub.s32 0, %v8475_v41 }
  0xb8   :  { %836 = vmatpush2.bf16.msra.mxu0 %v7427_v43  ;;  %v270_v43 = vld [vmem:[#allocation8] sm:$0x3] }
  0xb9   :  { %837 = vmatprep.subr.bf16.mxu0 %v7435_v44  ;;  %v8481_v44 = vsub.s32 1, %v8475_v41 }
  0xbc   :  { %838 = vmatpush2.bf16.msra.mxu0 %v7433_v45  ;;  %v275_v45 = vrot.slane %v270_v43, %v8478_v42 }
  0xbd   :  { %839 = vmatprep.subr.bf16.mxu0 %v7441_v46  ;;  %v279_v46 = vrot.slane %v270_v43, %v8481_v44  ;;  %v915_v43 = vld [vmem:[#allocation13] sm:$0xff] }
  0xc0   :  { %840 = vmatpush2.bf16.msra.mxu0 %v7439_v47 }
  0xc1   :  { %841 = vmatprep.subr.bf16.mxu0 %v7447_v48 }
  0xc4   :  { %842 = vmatpush2.bf16.msra.mxu0 %v7445_v49 }
  0xc5   :  { %843 = vmatprep.subr.bf16.mxu0 %v7453_v50 }
  0xc8   :  { %844 = vmatpush2.bf16.msra.mxu0 %v7451_v51 }
  0xc9   :  { %845 = vmatprep.subr.bf16.mxu0 %v7459_v24 }
  0xcc   :  { %846 = vmatpush2.bf16.msra.mxu0 %v7457_v26  ;;  %v935_v26 = vld [vmem:[#allocation13 + $0xa0] sm:$0xff] }
  0xcd   :  { %847 = vmatprep.subr.bf16.mxu0 %v7465_v28  ;;  %v1063_v28 = vld [vmem:[#allocation13 + $0x4a0] sm:$0xff] }
  0xd0   :  { %848 = vmatpush2.bf16.msra.mxu0 %v7463_v30 }
  0xd1   :  { %2493 = vmatprep.subr.bf16.mxu0 %v6561_v36  ;;  %v1055_v36 = vld [vmem:[#allocation13 + $0x460] sm:$0xff] }
 0x153   :  { %v244_v53 = vpop.f32.mrf.mxu0 }
 0x154   :  { %v245_v54 = vadd.f32 %v6418_v52, %v244_v53 }
 0x155   :  { %v7319_v55 = vpop.f32.mrf.mxu0 }
 0x156   :  { %vm250_vm2 = vcmp.gt.f32.partialorder %v245_v54, 0.0  ;;  %v251_v56 = vmul.f32 0.2, %v245_v54 }
 0x157   :  { %v247_v58 = vpop.f32.mrf.mxu0 }
 0x158   :  { %v252_v60 = vsel %vm250_vm2, %v245_v54, %v251_v56  ;;  %v963_v54 = vld [vmem:[#allocation13 + $0x180] sm:$0xff] }
 0x159   :  { %v7320_v61 = vpop.f32.mrf.mxu0  ;;  %v253_v62 = vpack.c.bf16 %v252_v60, %v252_v60  ;;  %v1091_v58 = vld [vmem:[#allocation13 + $0x580] sm:$0xff] }
 0x15b   :  { %395 = vmatmul.mubr.bf16.vlgmr.msra.gmra.mxu1 %v253_v62 }
 0x15c   :  { %859 = vmatpush1.bf16.msra.mxu1 %v7376_v57  ;;  %v967_v57 = vld [vmem:[#allocation13 + $0x1a0] sm:$0xff] }
 0x15d   :  { %860 = vmatprep.subr.bf16.mxu1 %v7384_v59  ;;  %v1095_v59 = vld [vmem:[#allocation13 + $0x5a0] sm:$0xff] }
 0x160   :  { %861 = vmatpush1.bf16.msra.mxu1 %v7382_v63  ;;  %v6553_v63 = vcombine.high %v963_v54, %v967_v57 }
 0x161   :  { %862 = vmatprep.subr.bf16.mxu1 %v7390_v0  ;;  %v6681_v0 = vcombine.high %v1091_v58, %v1095_v59 }
 0x164   :  { %863 = vmatpush1.bf16.msra.mxu1 %v7388_v1  ;;  %v955_v1 = vld [vmem:[#allocation13 + $0x140] sm:$0xff] }
 0x165   :  { %864 = vmatprep.subr.bf16.mxu1 %v7396_v2  ;;  %v959_v2 = vld [vmem:[#allocation13 + $0x160] sm:$0xff] }
 0x168   :  { %865 = vmatpush1.bf16.msra.mxu1 %v7394_v3  ;;  %v1083_v3 = vld [vmem:[#allocation13 + $0x540] sm:$0xff] }
 0x169   :  { %866 = vmatprep.subr.bf16.mxu1 %v7402_v4  ;;  %v1087_v4 = vld [vmem:[#allocation13 + $0x560] sm:$0xff] }
 0x16c   :  { %867 = vmatpush1.bf16.msra.mxu1 %v7400_v5  ;;  %v6552_v5 = vcombine.low %v963_v54, %v967_v57  ;;  %v1163_v54 = vld [vmem:[#allocation13 + $0x7c0] sm:$0xff] }
 0x16d   :  { %868 = vmatprep.subr.bf16.mxu1 %v7408_v6  ;;  %v6680_v6 = vcombine.low %v1091_v58, %v1095_v59 }
 0x170   :  { %869 = vmatpush1.bf16.msra.mxu1 %v7406_v7  ;;  %v6545_v7 = vcombine.high %v955_v1, %v959_v2 }
 0x171   :  { %870 = vmatprep.subr.bf16.mxu1 %v7414_v8  ;;  %v6673_v8 = vcombine.high %v1083_v3, %v1087_v4 }
 0x174   :  { %871 = vmatpush1.bf16.msra.mxu1 %v7412_v9  ;;  %v947_v9 = vld [vmem:[#allocation13 + $0x100] sm:$0xff] }
 0x175   :  { %872 = vmatprep.subr.bf16.mxu1 %v7420_v10  ;;  %v951_v10 = vld [vmem:[#allocation13 + $0x120] sm:$0xff] }
 0x178   :  { %873 = vmatpush1.bf16.msra.mxu1 %v7418_v11  ;;  %v1075_v11 = vld [vmem:[#allocation13 + $0x500] sm:$0xff] }
 0x179   :  { %874 = vmatprep.subr.bf16.mxu1 %v7426_v12  ;;  %v1079_v12 = vld [vmem:[#allocation13 + $0x520] sm:$0xff] }
 0x17c   :  { %875 = vmatpush2.bf16.msra.mxu1 %v7424_v13  ;;  %v6544_v13 = vcombine.low %v955_v1, %v959_v2 }
 0x17d   :  { %876 = vmatprep.subr.bf16.mxu1 %v7432_v14  ;;  %v6672_v14 = vcombine.low %v1083_v3, %v1087_v4  ;;  %v1019_v4 = vld [vmem:[#allocation13 + $0x340] sm:$0xff] }
 0x180   :  { %877 = vmatpush2.bf16.msra.mxu1 %v7430_v15  ;;  %v6537_v15 = vcombine.high %v947_v9, %v951_v10 }
 0x181   :  { %878 = vmatprep.subr.bf16.mxu1 %v7438_v16  ;;  %v6665_v16 = vcombine.high %v1075_v11, %v1079_v12 }
 0x184   :  { %879 = vmatpush2.bf16.msra.mxu1 %v7436_v17  ;;  %v939_v17 = vld [vmem:[#allocation13 + $0xc0] sm:$0xff] }
 0x185   :  { %880 = vmatprep.subr.bf16.mxu1 %v7444_v18  ;;  %v943_v18 = vld [vmem:[#allocation13 + $0xe0] sm:$0xff] }
 0x188   :  { %881 = vmatpush2.bf16.msra.mxu1 %v7442_v19  ;;  %v1067_v19 = vld [vmem:[#allocation13 + $0x4c0] sm:$0xff] }
 0x189   :  { %882 = vmatprep.subr.bf16.mxu1 %v7450_v20  ;;  %v1071_v20 = vld [vmem:[#allocation13 + $0x4e0] sm:$0xff] }
 0x18a   :  { %v6657_v24 = vcombine.high %v1067_v19, %v1071_v20  ;;  %v6656_v30 = vcombine.low %v1067_v19, %v1071_v20  ;;  %v1003_v20 = vld [vmem:[#allocation13 + $0x2c0] sm:$0xff] }
 0x18c   :  { %883 = vmatpush2.bf16.msra.mxu1 %v7448_v21  ;;  %v6536_v21 = vcombine.low %v947_v9, %v951_v10 }
 0x18d   :  { %884 = vmatprep.subr.bf16.mxu1 %v7456_v22  ;;  %v6664_v22 = vcombine.low %v1075_v11, %v1079_v12  ;;  %v1011_v12 = vld [vmem:[#allocation13 + $0x300] sm:$0xff] }
 0x190   :  { %885 = vmatpush2.bf16.msra.mxu1 %v7454_v23  ;;  %v6529_v23 = vcombine.high %v939_v17, %v943_v18 }
 0x191   :  { %886 = vmatprep.subr.bf16.mxu1 %v7462_v25  ;;  %v931_v25 = vld [vmem:[#allocation13 + $0x80] sm:$0xff] }
 0x192   :  { %v6520_v37 = vcombine.low %v931_v25, %v935_v26 }
 0x194   :  { %887 = vmatpush2.bf16.msra.mxu1 %v7460_v27  ;;  %v1059_v27 = vld [vmem:[#allocation13 + $0x480] sm:$0xff] }
 0x195   :  { %888 = vmatprep.subr.bf16.mxu1 %v7468_v29  ;;  %v6528_v29 = vcombine.low %v939_v17, %v943_v18  ;;  %v6649_v32 = vcombine.high %v1059_v27, %v1063_v28 }
 0x198   :  { %889 = vmatpush2.bf16.msra.mxu1 %v7466_v31  ;;  %v6521_v31 = vcombine.high %v931_v25, %v935_v26 }
 0x199   :  { %2534 = vmatprep.subr.bf16.mxu1 %v6689_v39  ;;  %v6513_v39 = vcombine.high %v923_v33, %v927_v34 }
 0x21b   :  { %v396_v47 = vpop.f32.mrf.mxu1 }
 0x21c   :  { %v397_v48 = vadd.f32 %v396_v47, %v275_v45  ;;  %v919_v45 = vld [vmem:[#allocation13 + $0x20] sm:$0xff] }
 0x21d   :  { %v398_v49 = vpop.f32.mrf.mxu1  ;;  %v1047_v47 = vld [vmem:[#allocation13 + $0x420] sm:$0xff] }
 0x21e   :  { %vm403_vm3 = vcmp.gt.f32.partialorder %v397_v48, 0.0  ;;  %v405_v50 = vmul.f32 0.2, %v397_v48  ;;  %v399_v51 = vadd.f32 %v398_v49, %v279_v46  ;;  %v1043_v46 = vld [vmem:[#allocation13 + $0x400] sm:$0xff] }
 0x21f   :  { %v400_v52 = vpop.f32.mrf.mxu1  ;;  %v6632_v57 = vcombine.low %v1043_v46, %v1047_v47 }
 0x220   :  { %vm404_vm4 = vcmp.gt.f32.partialorder %v399_v51, 0.0  ;;  %v406_v53 = vmul.f32 0.2, %v399_v51  ;;  %v407_v55 = vsel %vm403_vm3, %v397_v48, %v405_v50  ;;  %v6512_v48 = vcombine.low %v923_v33, %v927_v34  ;;  %v1035_v52 = vld [vmem:[#allocation13 + $0x3c0] sm:$0xff] }
 0x221   :  { %v401_v56 = vpop.f32.mrf.mxu1  ;;  %v409_v62 = vpack.c.bf16 %v407_v55, %v407_v55  ;;  %v6505_v50 = vcombine.high %v915_v43, %v919_v45  ;;  %v1167_v55 = vld [vmem:[#allocation13 + $0x7e0] sm:$0xff] }
 0x222   :  { %v408_v60 = vsel %vm404_vm4, %v399_v51, %v406_v53  ;;  %v6633_v51 = vcombine.high %v1043_v46, %v1047_v47  ;;  %v1039_v53 = vld [vmem:[#allocation13 + $0x3e0] sm:$0xff]  ;;  %v6504_v56 = vcombine.low %v915_v43, %v919_v45  ;;  %v6753_v59 = vcombine.high %v1163_v54, %v1167_v55 }
 0x223   :  { %v410_v61 = vpack.c.bf16 %v408_v60, %v408_v60  ;;  %v6625_v58 = vcombine.high %v1035_v52, %v1039_v53  ;;  %v1027_v60 = vld [vmem:[#allocation13 + $0x380] sm:$0xff]  ;;  %v6752_v1 = vcombine.low %v1163_v54, %v1167_v55 }
 0x224   :  { %v1119_v45 = vld [vmem:[#allocation13 + $0x660] sm:$0xff] }
 0x225   :  { %849 = vmatprep.mubr.bf16.mxu0 %v410_v61  ;;  %890 = vmatprep.mubr.bf16.mxu1 %v410_v61  ;;  %v1031_v61 = vld [vmem:[#allocation13 + $0x3a0] sm:$0xff] }
 0x226   :  { %850 = vmatmul.mubr.bf16.vlgmr.msra.gmra.mxu0 %v409_v62  ;;  %891 = vmatmul.mubr.bf16.vlgmr.msra.gmra.mxu1 %v409_v62  ;;  %v1155_v62 = vld [vmem:[#allocation13 + $0x780] sm:$0xff]  ;;  %v6617_v2 = vcombine.high %v1027_v60, %v1031_v61 }
 0x227   :  { %2494 = vmatpush1.bf16.msra.mxu0 %v6560_v35  ;;  %2535 = vmatpush1.bf16.msra.mxu1 %v6688_v38  ;;  %v1051_v35 = vld [vmem:[#allocation13 + $0x440] sm:$0xff]  ;;  %v6648_v38 = vcombine.low %v1059_v27, %v1063_v28 }
 0x228   :  { %2495 = vmatprep.subr.bf16.mxu0 %v6553_v63  ;;  %2536 = vmatprep.subr.bf16.mxu1 %v6681_v0  ;;  %v6641_v40 = vcombine.high %v1051_v35, %v1055_v36  ;;  %v6640_v49 = vcombine.low %v1051_v35, %v1055_v36  ;;  %v1159_v63 = vld [vmem:[#allocation13 + $0x7a0] sm:$0xff]  ;;  %v6624_v0 = vcombine.low %v1035_v52, %v1039_v53 }
 0x229   :  { %v6745_v3 = vcombine.high %v1155_v62, %v1159_v63  ;;  %v6744_v9 = vcombine.low %v1155_v62, %v1159_v63  ;;  %v995_v28 = vld [vmem:[#allocation13 + $0x280] sm:$0xff] }
 0x22a   :  { %v1111_v53 = vld [vmem:[#allocation13 + $0x620] sm:$0xff] }
 0x22b   :  { %2496 = vmatpush1.bf16.msra.mxu0 %v6552_v5  ;;  %2537 = vmatpush1.bf16.msra.mxu1 %v6680_v6  ;;  %v1023_v5 = vld [vmem:[#allocation13 + $0x360] sm:$0xff] }
 0x22c   :  { %2497 = vmatprep.subr.bf16.mxu0 %v6545_v7  ;;  %2538 = vmatprep.subr.bf16.mxu1 %v6673_v8  ;;  %v1147_v6 = vld [vmem:[#allocation13 + $0x740] sm:$0xff]  ;;  %v6616_v8 = vcombine.low %v1027_v60, %v1031_v61  ;;  %v6609_v10 = vcombine.high %v1019_v4, %v1023_v5  ;;  %v1104_v61 = vld [vmem:[#allocation13 + $0x5e8] sm:$0xff] }
 0x22d   :  { %v1151_v7 = vld [vmem:[#allocation13 + $0x760] sm:$0xff] }
 0x22e   :  { %v6737_v11 = vcombine.high %v1147_v6, %v1151_v7  ;;  %v6736_v17 = vcombine.low %v1147_v6, %v1151_v7 }
 0x22f   :  { %2498 = vmatpush1.bf16.msra.mxu0 %v6544_v13  ;;  %2539 = vmatpush1.bf16.msra.mxu1 %v6672_v14  ;;  %v1015_v13 = vld [vmem:[#allocation13 + $0x320] sm:$0xff] }
 0x230   :  { %2499 = vmatprep.subr.bf16.mxu0 %v6537_v15  ;;  %2540 = vmatprep.subr.bf16.mxu1 %v6665_v16  ;;  %v1139_v14 = vld [vmem:[#allocation13 + $0x700] sm:$0xff]  ;;  %v6608_v16 = vcombine.low %v1019_v4, %v1023_v5  ;;  %v6601_v18 = vcombine.high %v1011_v12, %v1015_v13 }
 0x231   :  { %v1143_v15 = vld [vmem:[#allocation13 + $0x720] sm:$0xff] }
 0x232   :  { %v6729_v19 = vcombine.high %v1139_v14, %v1143_v15  ;;  %v6728_v25 = vcombine.low %v1139_v14, %v1143_v15 }
 0x233   :  { %2500 = vmatpush1.bf16.msra.mxu0 %v6536_v21  ;;  %2541 = vmatpush1.bf16.msra.mxu1 %v6664_v22  ;;  %v1007_v21 = vld [vmem:[#allocation13 + $0x2e0] sm:$0xff] }
 0x234   :  { %2501 = vmatprep.subr.bf16.mxu0 %v6529_v23  ;;  %2542 = vmatprep.subr.bf16.mxu1 %v6657_v24  ;;  %v1131_v22 = vld [vmem:[#allocation13 + $0x6c0] sm:$0xff]  ;;  %v6600_v24 = vcombine.low %v1011_v12, %v1015_v13  ;;  %v6593_v26 = vcombine.high %v1003_v20, %v1007_v21 }
 0x235   :  { %v1135_v23 = vld [vmem:[#allocation13 + $0x6e0] sm:$0xff] }
 0x236   :  { %v6721_v27 = vcombine.high %v1131_v22, %v1135_v23  ;;  %v6720_v33 = vcombine.low %v1131_v22, %v1135_v23 }
 0x237   :  { %2502 = vmatpush1.bf16.msra.mxu0 %v6528_v29  ;;  %2543 = vmatpush1.bf16.msra.mxu1 %v6656_v30  ;;  %v999_v29 = vld [vmem:[#allocation13 + $0x2a0] sm:$0xff] }
 0x238   :  { %2503 = vmatprep.subr.bf16.mxu0 %v6521_v31  ;;  %2544 = vmatprep.subr.bf16.mxu1 %v6649_v32  ;;  %v1123_v30 = vld [vmem:[#allocation13 + $0x680] sm:$0xff]  ;;  %v6592_v32 = vcombine.low %v1003_v20, %v1007_v21  ;;  %v6585_v34 = vcombine.high %v995_v28, %v999_v29  ;;  %v6584_v36 = vcombine.low %v995_v28, %v999_v29  ;;  %v968_v28 = vld [vmem:[#allocation13 + $0x1a8] sm:$0xff] }
 0x239   :  { %v1127_v31 = vld [vmem:[#allocation13 + $0x6a0] sm:$0xff] }
 0x23a   :  { %v6713_v35 = vcombine.high %v1123_v30, %v1127_v31 }
 0x23b   :  { %2504 = vmatpush1.bf16.msra.mxu0 %v6520_v37  ;;  %2545 = vmatpush1.bf16.msra.mxu1 %v6648_v38  ;;  %v6712_v37 = vcombine.low %v1123_v30, %v1127_v31  ;;  %v987_v38 = vld [vmem:[#allocation13 + $0x240] sm:$0xff]  ;;  %v1092_v31 = vld [vmem:[#allocation13 + $0x588] sm:$0xff] }
 0x23c   :  { %2505 = vmatprep.subr.bf16.mxu0 %v6513_v39  ;;  %2546 = vmatprep.subr.bf16.mxu1 %v6641_v40  ;;  %v991_v39 = vld [vmem:[#allocation13 + $0x260] sm:$0xff] }
 0x23d   :  { %v1115_v40 = vld [vmem:[#allocation13 + $0x640] sm:$0xff]  ;;  %v6577_v43 = vcombine.high %v987_v38, %v991_v39  ;;  %v6576_v46 = vcombine.low %v987_v38, %v991_v39  ;;  %v960_v38 = vld [vmem:[#allocation13 + $0x168] sm:$0xff] }
 0x23e   :  { %v6704_v47 = vcombine.low %v1115_v40, %v1119_v45 }
 0x23f   :  { %2506 = vmatpush1.bf16.msra.mxu0 %v6512_v48  ;;  %2547 = vmatpush1.bf16.msra.mxu1 %v6640_v49  ;;  %v6705_v48 = vcombine.high %v1115_v40, %v1119_v45  ;;  %v979_v49 = vld [vmem:[#allocation13 + $0x200] sm:$0xff]  ;;  %v1084_v40 = vld [vmem:[#allocation13 + $0x548] sm:$0xff] }
 0x240   :  { %2507 = vmatprep.subr.bf16.mxu0 %v6505_v50  ;;  %2548 = vmatprep.subr.bf16.mxu1 %v6633_v51  ;;  %v983_v50 = vld [vmem:[#allocation13 + $0x220] sm:$0xff] }
 0x241   :  { %v1107_v51 = vld [vmem:[#allocation13 + $0x600] sm:$0xff]  ;;  %v6569_v52 = vcombine.high %v979_v49, %v983_v50  ;;  %v6568_v54 = vcombine.low %v979_v49, %v983_v50  ;;  %v948_v49 = vld [vmem:[#allocation13 + $0x108] sm:$0xff] }
 0x242   :  { %v6696_v55 = vcombine.low %v1107_v51, %v1111_v53  ;;  %v952_v50 = vld [vmem:[#allocation13 + $0x128] sm:$0xff] }
 0x243   :  { %2508 = vmatpush1.bf16.msra.mxu0 %v6504_v56  ;;  %2549 = vmatpush1.bf16.msra.mxu1 %v6632_v57  ;;  %v6697_v56 = vcombine.high %v1107_v51, %v1111_v53  ;;  %v972_v57 = vld [vmem:[#allocation13 + $0x1c8] sm:$0xff] }
 0x244   :  { %2509 = vmatprep.subr.bf16.mxu0 %v6625_v58  ;;  %2550 = vmatprep.subr.bf16.mxu1 %v6753_v59  ;;  %v976_v58 = vld [vmem:[#allocation13 + $0x1e8] sm:$0xff] }
 0x245   :  { %v1100_v59 = vld [vmem:[#allocation13 + $0x5c8] sm:$0xff]  ;;  %v6563_v60 = vcombine.high %v972_v57, %v976_v58  ;;  %v6562_v62 = vcombine.low %v972_v57, %v976_v58 }
 0x246   :  { %v6690_v63 = vcombine.low %v1100_v59, %v1104_v61  ;;  %v1076_v51 = vld [vmem:[#allocation13 + $0x508] sm:$0xff] }
 0x247   :  { %2510 = vmatpush2.bf16.msra.mxu0 %v6624_v0  ;;  %2551 = vmatpush2.bf16.msra.mxu1 %v6752_v1  ;;  %v6691_v0 = vcombine.high %v1100_v59, %v1104_v61  ;;  %v8486_v1 = vsub.s32 2, %v8475_v41  ;;  %v940_v57 = vld [vmem:[#allocation13 + $0xc8] sm:$0xff]  ;;  %v6538_v61 = vcombine.low %v948_v49, %v952_v50 }
 0x248   :  { %2511 = vmatprep.subr.bf16.mxu0 %v6617_v2  ;;  %2552 = vmatprep.subr.bf16.mxu1 %v6745_v3  ;;  %v475_v2 = vld [vmem:[#allocation11] sm:$0xf]  ;;  %v8489_v3 = vsub.s32 3, %v8475_v41  ;;  %v944_v58 = vld [vmem:[#allocation13 + $0xe8] sm:$0xff] }
 0x249   :  { %v480_v4 = vrot.slane %v475_v2, %v8478_v42  ;;  %v488_v5 = vrot.slane %v475_v2, %v8486_v1  ;;  %v1068_v59 = vld [vmem:[#allocation13 + $0x4c8] sm:$0xff] }
 0x24b   :  { %2512 = vmatpush2.bf16.msra.mxu0 %v6616_v8  ;;  %2553 = vmatpush2.bf16.msra.mxu1 %v6744_v9  ;;  %v484_v8 = vrot.slane %v475_v2, %v8481_v44  ;;  %v492_v9 = vrot.slane %v475_v2, %v8489_v3  ;;  %v932_v2 = vld [vmem:[#allocation13 + $0x88] sm:$0xff] }
 0x24c   :  { %2513 = vmatprep.subr.bf16.mxu0 %v6609_v10  ;;  %2554 = vmatprep.subr.bf16.mxu1 %v6737_v11 }
 0x24f   :  { %2514 = vmatpush2.bf16.msra.mxu0 %v6608_v16  ;;  %2555 = vmatpush2.bf16.msra.mxu1 %v6736_v17 }
 0x250   :  { %2515 = vmatprep.subr.bf16.mxu0 %v6601_v18  ;;  %2556 = vmatprep.subr.bf16.mxu1 %v6729_v19 }
 0x253   :  { %2516 = vmatpush2.bf16.msra.mxu0 %v6600_v24  ;;  %2557 = vmatpush2.bf16.msra.mxu1 %v6728_v25 }
 0x254   :  { %2517 = vmatprep.subr.bf16.mxu0 %v6593_v26  ;;  %2558 = vmatprep.subr.bf16.mxu1 %v6721_v27  ;;  %v964_v27 = vld [vmem:[#allocation13 + $0x188] sm:$0xff] }
 0x255   :  { %v6554_v45 = vcombine.low %v964_v27, %v968_v28 }
 0x257   :  { %2518 = vmatpush2.bf16.msra.mxu0 %v6592_v32  ;;  %2559 = vmatpush2.bf16.msra.mxu1 %v6720_v33  ;;  %v1096_v32 = vld [vmem:[#allocation13 + $0x5a8] sm:$0xff] }
 0x258   :  { %2519 = vmatprep.subr.bf16.mxu0 %v6585_v34  ;;  %2560 = vmatprep.subr.bf16.mxu1 %v6713_v35  ;;  %v6683_v39 = vcombine.high %v1092_v31, %v1096_v32 }
 0x25b   :  { %2520 = vmatpush2.bf16.msra.mxu0 %v6584_v36  ;;  %2561 = vmatpush2.bf16.msra.mxu1 %v6712_v37  ;;  %v6555_v36 = vcombine.high %v964_v27, %v968_v28  ;;  %v956_v37 = vld [vmem:[#allocation13 + $0x148] sm:$0xff] }
 0x25c   :  { %2521 = vmatprep.subr.bf16.mxu0 %v6577_v43  ;;  %2562 = vmatprep.subr.bf16.mxu1 %v6705_v48  ;;  %v1088_v43 = vld [vmem:[#allocation13 + $0x568] sm:$0xff]  ;;  %v6546_v53 = vcombine.low %v956_v37, %v960_v38 }
 0x25d   :  { %v6675_v48 = vcombine.high %v1084_v40, %v1088_v43  ;;  %v1036_v27 = vld [vmem:[#allocation13 + $0x3c8] sm:$0xff] }
 0x25e   :  { %v1040_v28 = vld [vmem:[#allocation13 + $0x3e8] sm:$0xff] }
 0x25f   :  { %2522 = vmatpush2.bf16.msra.mxu0 %v6576_v46  ;;  %2563 = vmatpush2.bf16.msra.mxu1 %v6704_v47  ;;  %v6682_v46 = vcombine.low %v1092_v31, %v1096_v32  ;;  %v6547_v47 = vcombine.high %v956_v37, %v960_v38  ;;  %v1168_v31 = vld [vmem:[#allocation13 + $0x7e8] sm:$0xff]  ;;  %v6627_v37 = vcombine.high %v1036_v27, %v1040_v28 }
 0x260   :  { %2523 = vmatprep.subr.bf16.mxu0 %v6569_v52  ;;  %2564 = vmatprep.subr.bf16.mxu1 %v6697_v56  ;;  %v1080_v52 = vld [vmem:[#allocation13 + $0x528] sm:$0xff] }
 0x261   :  { %v6667_v56 = vcombine.high %v1076_v51, %v1080_v52 }
 0x263   :  { %2524 = vmatpush2.bf16.msra.mxu0 %v6568_v54  ;;  %2565 = vmatpush2.bf16.msra.mxu1 %v6696_v55  ;;  %v6674_v54 = vcombine.low %v1084_v40, %v1088_v43  ;;  %v6539_v55 = vcombine.high %v948_v49, %v952_v50  ;;  %v1032_v40 = vld [vmem:[#allocation13 + $0x3a8] sm:$0xff] }
 0x264   :  { %2575 = vmatprep.subr.bf16.mxu0 %v6563_v60  ;;  %2616 = vmatprep.subr.bf16.mxu1 %v6691_v0  ;;  %v1072_v60 = vld [vmem:[#allocation13 + $0x4e8] sm:$0xff] }
 0x265   :  { %v6659_v0 = vcombine.high %v1068_v59, %v1072_v60  ;;  %v1156_v43 = vld [vmem:[#allocation13 + $0x788] sm:$0xff] }
 0x266   :  { %v1020_v50 = vld [vmem:[#allocation13 + $0x348] sm:$0xff] }
 0x2e6   :  { %v851_v6 = vpop.f32.mrf.mxu0  ;;  %v892_v7 = vpop.f32.mrf.mxu1 }
 0x2e7   :  { %v852_v10 = vadd.f32 %v851_v6, %v480_v4  ;;  %v893_v11 = vadd.f32 %v892_v7, %v488_v5  ;;  %v936_v4 = vld [vmem:[#allocation13 + $0xa8] sm:$0xff]  ;;  %v6530_v7 = vcombine.low %v940_v57, %v944_v58 }
 0x2e8   :  { %v853_v12 = vpop.f32.mrf.mxu0  ;;  %v894_v13 = vpop.f32.mrf.mxu1  ;;  %v1060_v5 = vld [vmem:[#allocation13 + $0x488] sm:$0xff] }
 0x2e9   :  { %v903_v14 = vmul.f32 0.2, %v852_v10  ;;  %vm899_vm5 = vcmp.gt.f32.partialorder %v852_v10, 0.0  ;;  %v905_v15 = vmul.f32 0.2, %v893_v11  ;;  %v854_v16 = vadd.f32 %v853_v12, %v484_v8  ;;  %v1064_v6 = vld [vmem:[#allocation13 + $0x4a8] sm:$0xff] }
 0x2ea   :  { %v895_v17 = vadd.f32 %v894_v13, %v492_v9  ;;  %v855_v18 = vpop.f32.mrf.mxu0  ;;  %v896_v19 = vpop.f32.mrf.mxu1  ;;  %vm901_vm6 = vcmp.gt.f32.partialorder %v893_v11, 0.0  ;;  %v6658_v8 = vcombine.low %v1068_v59, %v1072_v60  ;;  %v6523_v9 = vcombine.high %v932_v2, %v936_v4  ;;  %v928_v12 = vld [vmem:[#allocation13 + $0x68] sm:$0xff] }
 0x2eb   :  { %vm900_vm7 = vcmp.gt.f32.partialorder %v854_v16, 0.0  ;;  %v904_v20 = vmul.f32 0.2, %v854_v16  ;;  %v907_v23 = vsel %vm899_vm5, %v852_v10, %v903_v14  ;;  %v909_v25 = vsel %vm901_vm6, %v893_v11, %v905_v15  ;;  %v924_v11 = vld [vmem:[#allocation13 + $0x48] sm:$0xff] }
 0x2ec   :  { %v856_v21 = vpop.f32.mrf.mxu0  ;;  %v897_v22 = vpop.f32.mrf.mxu1  ;;  %vm902_vm8 = vcmp.gt.f32.partialorder %v895_v17, 0.0  ;;  %v906_v24 = vmul.f32 0.2, %v895_v17  ;;  %v8497_v33 = vpack.c.bf16 %v907_v23, %v907_v23  ;;  %v8501_v35 = vpack.c.bf16 %v909_v25, %v909_v25  ;;  %v1052_v13 = vld [vmem:[#allocation13 + $0x448] sm:$0xff] }
 0x2ed   :  { %v908_v26 = vsel %vm900_vm7, %v854_v16, %v904_v20  ;;  %v6651_v10 = vcombine.high %v1060_v5, %v1064_v6  ;;  %v1056_v14 = vld [vmem:[#allocation13 + $0x468] sm:$0xff]  ;;  %v6522_v15 = vcombine.low %v932_v2, %v936_v4  ;;  %v6650_v16 = vcombine.low %v1060_v5, %v1064_v6 }
 0x2ee   :  { %v8495_v29 = vpack.c.bf16 %v908_v26, %v908_v26  ;;  %v910_v30 = vsel %vm902_vm8, %v895_v17, %v906_v24  ;;  %v6515_v17 = vcombine.high %v924_v11, %v928_v12  ;;  %v6643_v18 = vcombine.high %v1052_v13, %v1056_v14  ;;  %v916_v19 = vld [vmem:[#allocation13 + $0x8] sm:$0xff] }
 0x2ef   :  { %v8499_v34 = vpack.c.bf16 %v910_v30, %v910_v30  ;;  %v920_v20 = vld [vmem:[#allocation13 + $0x28] sm:$0xff]  ;;  %v6514_v23 = vcombine.low %v924_v11, %v928_v12  ;;  %v6642_v24 = vcombine.low %v1052_v13, %v1056_v14 }
 0x2f0   :  { %2525 = vmatprep.mubr.bf16.mxu0 %v8495_v29  ;;  %v1044_v21 = vld [vmem:[#allocation13 + $0x408] sm:$0xff]  ;;  %v6507_v25 = vcombine.high %v916_v19, %v920_v20  ;;  %v6506_v32 = vcombine.low %v916_v19, %v920_v20 }
 0x2f1   :  { %2566 = vmatprep.mubr.bf16.mxu1 %v8499_v34  ;;  %2526 = vmatmul.mubr.bf16.vlgmr.msra.gmra.mxu0 %v8497_v33  ;;  %v1048_v22 = vld [vmem:[#allocation13 + $0x428] sm:$0xff] }
 0x2f2   :  { %2567 = vmatmul.mubr.bf16.vlgmr.msra.gmra.mxu1 %v8501_v35  ;;  %2576 = vmatpush1.bf16.msra.mxu0 %v6562_v62  ;;  %v6666_v62 = vcombine.low %v1076_v51, %v1080_v52  ;;  %v6635_v26 = vcombine.high %v1044_v21, %v1048_v22  ;;  %v1164_v30 = vld [vmem:[#allocation13 + $0x7c8] sm:$0xff] }
 0x2f3   :  { %2617 = vmatpush1.bf16.msra.mxu1 %v6690_v63  ;;  %2607 = vmatprep.mubr.bf16.mxu0 %v8495_v29  ;;  %v6531_v63 = vcombine.high %v940_v57, %v944_v58  ;;  %v6755_v38 = vcombine.high %v1164_v30, %v1168_v31  ;;  %v1024_v51 = vld [vmem:[#allocation13 + $0x368] sm:$0xff] }
 0x2f4   :  { %2648 = vmatprep.mubr.bf16.mxu1 %v8499_v34  ;;  %2577 = vmatprep.subr.bf16.mxu0 %v6555_v36  ;;  %v6634_v36 = vcombine.low %v1044_v21, %v1048_v22  ;;  %v1148_v52 = vld [vmem:[#allocation13 + $0x748] sm:$0xff] }
 0x2f5   :  { %2618 = vmatprep.subr.bf16.mxu1 %v6683_v39  ;;  %v1028_v39 = vld [vmem:[#allocation13 + $0x388] sm:$0xff] }
 0x2f6   :  { %2578 = vmatpush1.bf16.msra.mxu0 %v6554_v45  ;;  %v1160_v45 = vld [vmem:[#allocation13 + $0x7a8] sm:$0xff] }
 0x2f7   :  { %2619 = vmatpush1.bf16.msra.mxu1 %v6682_v46  ;;  %2579 = vmatprep.subr.bf16.mxu0 %v6547_v47  ;;  %v6626_v46 = vcombine.low %v1036_v27, %v1040_v28  ;;  %v6754_v47 = vcombine.low %v1164_v30, %v1168_v31  ;;  %v6747_v49 = vcombine.high %v1156_v43, %v1160_v45  ;;  %v1012_v58 = vld [vmem:[#allocation13 + $0x308] sm:$0xff] }
 0x2f8   :  { %2620 = vmatprep.subr.bf16.mxu1 %v6675_v48  ;;  %v6619_v48 = vcombine.high %v1028_v39, %v1032_v40  ;;  %v1016_v59 = vld [vmem:[#allocation13 + $0x328] sm:$0xff] }
 0x2f9   :  { %v1140_v60 = vld [vmem:[#allocation13 + $0x708] sm:$0xff] }
 0x2fa   :  { %2580 = vmatpush1.bf16.msra.mxu0 %v6546_v53  ;;  %v1152_v53 = vld [vmem:[#allocation13 + $0x768] sm:$0xff] }
 0x2fb   :  { %2621 = vmatpush1.bf16.msra.mxu1 %v6674_v54  ;;  %2581 = vmatprep.subr.bf16.mxu0 %v6539_v55  ;;  %v6618_v54 = vcombine.low %v1028_v39, %v1032_v40  ;;  %v6746_v55 = vcombine.low %v1156_v43, %v1160_v45  ;;  %v6739_v57 = vcombine.high %v1148_v52, %v1152_v53  ;;  %v1004_v4 = vld [vmem:[#allocation13 + $0x2c8] sm:$0xff]  ;;  %v973_v40 = vld [vmem:[#allocation13 + $0x1d0] sm:$0xff] }
 0x2fc   :  { %2622 = vmatprep.subr.bf16.mxu1 %v6667_v56  ;;  %v6611_v56 = vcombine.high %v1020_v50, %v1024_v51  ;;  %v1008_v5 = vld [vmem:[#allocation13 + $0x2e8] sm:$0xff]  ;;  %v977_v43 = vld [vmem:[#allocation13 + $0x1f0] sm:$0xff] }
 0x2fd   :  { %v1132_v6 = vld [vmem:[#allocation13 + $0x6c8] sm:$0xff]  ;;  %v1101_v45 = vld [vmem:[#allocation13 + $0x5d0] sm:$0xff] }
 0x2fe   :  { %2582 = vmatpush1.bf16.msra.mxu0 %v6538_v61  ;;  %v1144_v61 = vld [vmem:[#allocation13 + $0x728] sm:$0xff] }
 0x2ff   :  { %2623 = vmatpush1.bf16.msra.mxu1 %v6666_v62  ;;  %2583 = vmatprep.subr.bf16.mxu0 %v6531_v63  ;;  %v6610_v62 = vcombine.low %v1020_v50, %v1024_v51  ;;  %v6738_v63 = vcombine.low %v1148_v52, %v1152_v53  ;;  %v6731_v2 = vcombine.high %v1140_v60, %v1144_v61  ;;  %v996_v12 = vld [vmem:[#allocation13 + $0x288] sm:$0xff]  ;;  %v965_v51 = vld [vmem:[#allocation13 + $0x190] sm:$0xff] }
 0x300   :  { %2624 = vmatprep.subr.bf16.mxu1 %v6659_v0  ;;  %v6603_v0 = vcombine.high %v1012_v58, %v1016_v59  ;;  %v1000_v13 = vld [vmem:[#allocation13 + $0x2a8] sm:$0xff]  ;;  %v969_v52 = vld [vmem:[#allocation13 + $0x1b0] sm:$0xff]  ;;  %v6564_v53 = vcombine.low %v973_v40, %v977_v43 }
 0x301   :  { %v1124_v14 = vld [vmem:[#allocation13 + $0x688] sm:$0xff] }
 0x302   :  { %2584 = vmatpush1.bf16.msra.mxu0 %v6530_v7  ;;  %v1136_v7 = vld [vmem:[#allocation13 + $0x6e8] sm:$0xff] }
 0x303   :  { %2625 = vmatpush1.bf16.msra.mxu1 %v6658_v8  ;;  %2585 = vmatprep.subr.bf16.mxu0 %v6523_v9  ;;  %v6602_v8 = vcombine.low %v1012_v58, %v1016_v59  ;;  %v6730_v9 = vcombine.low %v1140_v60, %v1144_v61  ;;  %v6723_v11 = vcombine.high %v1132_v6, %v1136_v7  ;;  %v988_v20 = vld [vmem:[#allocation13 + $0x248] sm:$0xff]  ;;  %v957_v58 = vld [vmem:[#allocation13 + $0x150] sm:$0xff] }
 0x304   :  { %2626 = vmatprep.subr.bf16.mxu1 %v6651_v10  ;;  %v6595_v10 = vcombine.high %v1004_v4, %v1008_v5  ;;  %v992_v21 = vld [vmem:[#allocation13 + $0x268] sm:$0xff]  ;;  %v961_v59 = vld [vmem:[#allocation13 + $0x170] sm:$0xff] }
 0x305   :  { %v1116_v22 = vld [vmem:[#allocation13 + $0x648] sm:$0xff]  ;;  %v1085_v61 = vld [vmem:[#allocation13 + $0x550] sm:$0xff] }
 0x306   :  { %2586 = vmatpush1.bf16.msra.mxu0 %v6522_v15  ;;  %v1128_v15 = vld [vmem:[#allocation13 + $0x6a8] sm:$0xff] }
 0x307   :  { %2627 = vmatpush1.bf16.msra.mxu1 %v6650_v16  ;;  %2587 = vmatprep.subr.bf16.mxu0 %v6515_v17  ;;  %v6594_v16 = vcombine.low %v1004_v4, %v1008_v5  ;;  %v6722_v17 = vcombine.low %v1132_v6, %v1136_v7  ;;  %v6715_v19 = vcombine.high %v1124_v14, %v1128_v15  ;;  %v980_v28 = vld [vmem:[#allocation13 + $0x208] sm:$0xff]  ;;  %v949_v5 = vld [vmem:[#allocation13 + $0x110] sm:$0xff] }
 0x308   :  { %2628 = vmatprep.subr.bf16.mxu1 %v6643_v18  ;;  %v6587_v18 = vcombine.high %v996_v12, %v1000_v13  ;;  %v984_v30 = vld [vmem:[#allocation13 + $0x228] sm:$0xff]  ;;  %v953_v6 = vld [vmem:[#allocation13 + $0x130] sm:$0xff] }
 0x309   :  { %v1108_v31 = vld [vmem:[#allocation13 + $0x608] sm:$0xff]  ;;  %v1077_v7 = vld [vmem:[#allocation13 + $0x510] sm:$0xff] }
 0x30a   :  { %2588 = vmatpush1.bf16.msra.mxu0 %v6514_v23  ;;  %v1120_v23 = vld [vmem:[#allocation13 + $0x668] sm:$0xff] }
 0x30b   :  { %2629 = vmatpush1.bf16.msra.mxu1 %v6642_v24  ;;  %2589 = vmatprep.subr.bf16.mxu0 %v6507_v25  ;;  %v6586_v24 = vcombine.low %v996_v12, %v1000_v13  ;;  %v6714_v25 = vcombine.low %v1124_v14, %v1128_v15  ;;  %v6707_v27 = vcombine.high %v1116_v22, %v1120_v23  ;;  %v941_v13 = vld [vmem:[#allocation13 + $0xd0] sm:$0xff] }
 0x30c   :  { %2630 = vmatprep.subr.bf16.mxu1 %v6635_v26  ;;  %v6579_v26 = vcombine.high %v988_v20, %v992_v21  ;;  %v945_v14 = vld [vmem:[#allocation13 + $0xf0] sm:$0xff] }
 0x30d   :  { %v1069_v15 = vld [vmem:[#allocation13 + $0x4d0] sm:$0xff] }
 0x30e   :  { %2590 = vmatpush1.bf16.msra.mxu0 %v6506_v32  ;;  %v1112_v32 = vld [vmem:[#allocation13 + $0x628] sm:$0xff] }
 0x30f   :  { %2631 = vmatpush1.bf16.msra.mxu1 %v6634_v36  ;;  %2591 = vmatprep.subr.bf16.mxu0 %v6627_v37  ;;  %v6578_v36 = vcombine.low %v988_v20, %v992_v21  ;;  %v6706_v37 = vcombine.low %v1116_v22, %v1120_v23  ;;  %v6699_v39 = vcombine.high %v1108_v31, %v1112_v32  ;;  %v933_v21 = vld [vmem:[#allocation13 + $0x90] sm:$0xff] }
 0x310   :  { %2632 = vmatprep.subr.bf16.mxu1 %v6755_v38  ;;  %v6571_v38 = vcombine.high %v980_v28, %v984_v30  ;;  %v937_v22 = vld [vmem:[#allocation13 + $0xb0] sm:$0xff] }
 0x311   :  { %v1061_v23 = vld [vmem:[#allocation13 + $0x490] sm:$0xff] }
 0x312   :  { %2592 = vmatpush2.bf16.msra.mxu0 %v6626_v46  ;;  %v1105_v46 = vld [vmem:[#allocation13 + $0x5f0] sm:$0xff] }
 0x313   :  { %2633 = vmatpush2.bf16.msra.mxu1 %v6754_v47  ;;  %2593 = vmatprep.subr.bf16.mxu0 %v6619_v48  ;;  %v6570_v47 = vcombine.low %v980_v28, %v984_v30  ;;  %v6698_v48 = vcombine.low %v1108_v31, %v1112_v32  ;;  %v6693_v50 = vcombine.high %v1101_v45, %v1105_v46  ;;  %v925_v30 = vld [vmem:[#allocation13 + $0x50] sm:$0xff] }
 0x314   :  { %2634 = vmatprep.subr.bf16.mxu1 %v6747_v49  ;;  %v6565_v49 = vcombine.high %v973_v40, %v977_v43  ;;  %v929_v31 = vld [vmem:[#allocation13 + $0x70] sm:$0xff] }
 0x315   :  { %v1053_v32 = vld [vmem:[#allocation13 + $0x450] sm:$0xff] }
 0x316   :  { %2594 = vmatpush2.bf16.msra.mxu0 %v6618_v54  ;;  %v1093_v54 = vld [vmem:[#allocation13 + $0x590] sm:$0xff] }
 0x317   :  { %2635 = vmatpush2.bf16.msra.mxu1 %v6746_v55  ;;  %2595 = vmatprep.subr.bf16.mxu0 %v6611_v56  ;;  %v1097_v55 = vld [vmem:[#allocation13 + $0x5b0] sm:$0xff]  ;;  %v6692_v56 = vcombine.low %v1101_v45, %v1105_v46 }
 0x318   :  { %2636 = vmatprep.subr.bf16.mxu1 %v6739_v57  ;;  %v6557_v57 = vcombine.high %v965_v51, %v969_v52  ;;  %v6685_v60 = vcombine.high %v1093_v54, %v1097_v55  ;;  %v917_v43 = vld [vmem:[#allocation13 + $0x10] sm:$0xff] }
 0x319   :  { %v921_v45 = vld [vmem:[#allocation13 + $0x30] sm:$0xff] }
 0x31a   :  { %2596 = vmatpush2.bf16.msra.mxu0 %v6610_v62  ;;  %v1089_v62 = vld [vmem:[#allocation13 + $0x570] sm:$0xff] }
 0x31b   :  { %2637 = vmatpush2.bf16.msra.mxu1 %v6738_v63  ;;  %2597 = vmatprep.subr.bf16.mxu0 %v6603_v0  ;;  %v6556_v63 = vcombine.low %v965_v51, %v969_v52  ;;  %v6684_v0 = vcombine.low %v1093_v54, %v1097_v55  ;;  %v6677_v4 = vcombine.high %v1085_v61, %v1089_v62  ;;  %v1045_v46 = vld [vmem:[#allocation13 + $0x410] sm:$0xff] }
 0x31c   :  { %2638 = vmatprep.subr.bf16.mxu1 %v6731_v2  ;;  %v6549_v2 = vcombine.high %v957_v58, %v961_v59  ;;  %v1037_v52 = vld [vmem:[#allocation13 + $0x3d0] sm:$0xff] }
 0x31d   :  { %v1165_v54 = vld [vmem:[#allocation13 + $0x7d0] sm:$0xff] }
 0x31e   :  { %2598 = vmatpush2.bf16.msra.mxu0 %v6602_v8  ;;  %v1081_v8 = vld [vmem:[#allocation13 + $0x530] sm:$0xff] }
 0x31f   :  { %2639 = vmatpush2.bf16.msra.mxu1 %v6730_v9  ;;  %2599 = vmatprep.subr.bf16.mxu0 %v6595_v10  ;;  %v6548_v9 = vcombine.low %v957_v58, %v961_v59  ;;  %v6676_v10 = vcombine.low %v1085_v61, %v1089_v62  ;;  %v6669_v12 = vcombine.high %v1077_v7, %v1081_v8  ;;  %v1169_v55 = vld [vmem:[#allocation13 + $0x7f0] sm:$0xff] }
 0x320   :  { %2640 = vmatprep.subr.bf16.mxu1 %v6723_v11  ;;  %v6541_v11 = vcombine.high %v949_v5, %v953_v6  ;;  %v6757_v59 = vcombine.high %v1165_v54, %v1169_v55  ;;  %v1033_v61 = vld [vmem:[#allocation13 + $0x3b0] sm:$0xff] }
 0x321   :  { %v1157_v62 = vld [vmem:[#allocation13 + $0x790] sm:$0xff] }
 0x322   :  { %2600 = vmatpush2.bf16.msra.mxu0 %v6594_v16  ;;  %v1073_v16 = vld [vmem:[#allocation13 + $0x4f0] sm:$0xff] }
 0x323   :  { %2641 = vmatpush2.bf16.msra.mxu1 %v6722_v17  ;;  %2601 = vmatprep.subr.bf16.mxu0 %v6587_v18  ;;  %v6540_v17 = vcombine.low %v949_v5, %v953_v6  ;;  %v6668_v18 = vcombine.low %v1077_v7, %v1081_v8  ;;  %v6661_v20 = vcombine.high %v1069_v15, %v1073_v16  ;;  %v1021_v6 = vld [vmem:[#allocation13 + $0x350] sm:$0xff] }
 0x324   :  { %2642 = vmatprep.subr.bf16.mxu1 %v6715_v19  ;;  %v6533_v19 = vcombine.high %v941_v13, %v945_v14  ;;  %v1025_v7 = vld [vmem:[#allocation13 + $0x370] sm:$0xff] }
 0x325   :  { %v1149_v8 = vld [vmem:[#allocation13 + $0x750] sm:$0xff] }
 0x326   :  { %2602 = vmatpush2.bf16.msra.mxu0 %v6586_v24  ;;  %v1065_v24 = vld [vmem:[#allocation13 + $0x4b0] sm:$0xff] }
 0x327   :  { %2643 = vmatpush2.bf16.msra.mxu1 %v6714_v25  ;;  %2603 = vmatprep.subr.bf16.mxu0 %v6579_v26  ;;  %v6532_v25 = vcombine.low %v941_v13, %v945_v14  ;;  %v6660_v26 = vcombine.low %v1069_v15, %v1073_v16  ;;  %v6653_v28 = vcombine.high %v1061_v23, %v1065_v24  ;;  %v1013_v14 = vld [vmem:[#allocation13 + $0x310] sm:$0xff] }
 0x328   :  { %2644 = vmatprep.subr.bf16.mxu1 %v6707_v27  ;;  %v6525_v27 = vcombine.high %v933_v21, %v937_v22  ;;  %v1017_v15 = vld [vmem:[#allocation13 + $0x330] sm:$0xff] }
 0x329   :  { %v1141_v16 = vld [vmem:[#allocation13 + $0x710] sm:$0xff] }
 0x32a   :  { %2604 = vmatpush2.bf16.msra.mxu0 %v6578_v36  ;;  %v1057_v36 = vld [vmem:[#allocation13 + $0x470] sm:$0xff] }
 0x32b   :  { %2645 = vmatpush2.bf16.msra.mxu1 %v6706_v37  ;;  %2605 = vmatprep.subr.bf16.mxu0 %v6571_v38  ;;  %v6524_v37 = vcombine.low %v933_v21, %v937_v22  ;;  %v6652_v38 = vcombine.low %v1061_v23, %v1065_v24  ;;  %v6645_v40 = vcombine.high %v1053_v32, %v1057_v36  ;;  %v1005_v22 = vld [vmem:[#allocation13 + $0x2d0] sm:$0xff] }
 0x32c   :  { %2646 = vmatprep.subr.bf16.mxu1 %v6699_v39  ;;  %v6517_v39 = vcombine.high %v925_v30, %v929_v31  ;;  %v1009_v23 = vld [vmem:[#allocation13 + $0x2f0] sm:$0xff] }
 0x32d   :  { %v1133_v24 = vld [vmem:[#allocation13 + $0x6d0] sm:$0xff] }
 0x32e   :  { %2606 = vmatpush2.bf16.msra.mxu0 %v6570_v47  ;;  %v1049_v47 = vld [vmem:[#allocation13 + $0x430] sm:$0xff] }
 0x32f   :  { %2647 = vmatpush2.bf16.msra.mxu1 %v6698_v48  ;;  %2657 = vmatprep.subr.bf16.mxu0 %v6565_v49  ;;  %v6516_v48 = vcombine.low %v925_v30, %v929_v31  ;;  %v6644_v49 = vcombine.low %v1053_v32, %v1057_v36  ;;  %v6637_v51 = vcombine.high %v1045_v46, %v1049_v47  ;;  %v997_v31 = vld [vmem:[#allocation13 + $0x290] sm:$0xff] }
 0x330   :  { %2698 = vmatprep.subr.bf16.mxu1 %v6693_v50  ;;  %v6509_v50 = vcombine.high %v917_v43, %v921_v45  ;;  %v1001_v32 = vld [vmem:[#allocation13 + $0x2b0] sm:$0xff] }
 0x331   :  { %2608 = vmatmul.mubr.bf16.vlgmr.msra.gmra.mxu0 %v8497_v33  ;;  %v1125_v36 = vld [vmem:[#allocation13 + $0x690] sm:$0xff] }
 0x332   :  { %2649 = vmatmul.mubr.bf16.vlgmr.msra.gmra.mxu1 %v8501_v35  ;;  %2658 = vmatpush1.bf16.msra.mxu0 %v6564_v53  ;;  %v1041_v53 = vld [vmem:[#allocation13 + $0x3f0] sm:$0xff] }
 0x333   :  { %2689 = vmatprep.mubr.bf16.mxu0 %v8495_v29  ;;  %2699 = vmatpush1.bf16.msra.mxu1 %v6692_v56  ;;  %v6508_v56 = vcombine.low %v917_v43, %v921_v45  ;;  %v6629_v58 = vcombine.high %v1037_v52, %v1041_v53  ;;  %v989_v45 = vld [vmem:[#allocation13 + $0x250] sm:$0xff] }
 0x334   :  { %2730 = vmatprep.mubr.bf16.mxu1 %v8499_v34  ;;  %2659 = vmatprep.subr.bf16.mxu0 %v6557_v57  ;;  %v6636_v57 = vcombine.low %v1045_v46, %v1049_v47  ;;  %v993_v46 = vld [vmem:[#allocation13 + $0x270] sm:$0xff] }
 0x335   :  { %2700 = vmatprep.subr.bf16.mxu1 %v6685_v60  ;;  %v1029_v60 = vld [vmem:[#allocation13 + $0x390] sm:$0xff] }
 0x336   :  { %2660 = vmatpush1.bf16.msra.mxu0 %v6556_v63  ;;  %v1161_v63 = vld [vmem:[#allocation13 + $0x7b0] sm:$0xff] }
 0x337   :  { %2701 = vmatpush1.bf16.msra.mxu1 %v6684_v0  ;;  %2661 = vmatprep.subr.bf16.mxu0 %v6549_v2  ;;  %v6628_v0 = vcombine.low %v1037_v52, %v1041_v53  ;;  %v6756_v2 = vcombine.low %v1165_v54, %v1169_v55  ;;  %v6749_v5 = vcombine.high %v1157_v62, %v1161_v63  ;;  %v1117_v47 = vld [vmem:[#allocation13 + $0x650] sm:$0xff] }
 0x338   :  { %2702 = vmatprep.subr.bf16.mxu1 %v6677_v4  ;;  %v6621_v4 = vcombine.high %v1029_v60, %v1033_v61  ;;  %v981_v53 = vld [vmem:[#allocation13 + $0x210] sm:$0xff] }
 0x339   :  { %v985_v54 = vld [vmem:[#allocation13 + $0x230] sm:$0xff] }
 0x33a   :  { %2662 = vmatpush1.bf16.msra.mxu0 %v6548_v9  ;;  %v1153_v9 = vld [vmem:[#allocation13 + $0x770] sm:$0xff] }
 0x33b   :  { %2703 = vmatpush1.bf16.msra.mxu1 %v6676_v10  ;;  %2663 = vmatprep.subr.bf16.mxu0 %v6541_v11  ;;  %v6620_v10 = vcombine.low %v1029_v60, %v1033_v61  ;;  %v6748_v11 = vcombine.low %v1157_v62, %v1161_v63  ;;  %v6741_v13 = vcombine.high %v1149_v8, %v1153_v9  ;;  %v1109_v55 = vld [vmem:[#allocation13 + $0x610] sm:$0xff]  ;;  %v974_v61 = vld [vmem:[#allocation13 + $0x1d8] sm:$0xff] }
 0x33c   :  { %2704 = vmatprep.subr.bf16.mxu1 %v6669_v12  ;;  %v6613_v12 = vcombine.high %v1021_v6, %v1025_v7  ;;  %v978_v62 = vld [vmem:[#allocation13 + $0x1f8] sm:$0xff] }
 0x33d   :  { %v1102_v63 = vld [vmem:[#allocation13 + $0x5d8] sm:$0xff] }
 0x33e   :  { %2664 = vmatpush1.bf16.msra.mxu0 %v6540_v17  ;;  %v1145_v17 = vld [vmem:[#allocation13 + $0x730] sm:$0xff] }
 0x33f   :  { %2705 = vmatpush1.bf16.msra.mxu1 %v6668_v18  ;;  %2665 = vmatprep.subr.bf16.mxu0 %v6533_v19  ;;  %v6612_v18 = vcombine.low %v1021_v6, %v1025_v7  ;;  %v6740_v19 = vcombine.low %v1149_v8, %v1153_v9  ;;  %v6733_v21 = vcombine.high %v1141_v16, %v1145_v17  ;;  %v966_v7 = vld [vmem:[#allocation13 + $0x198] sm:$0xff] }
 0x340   :  { %2706 = vmatprep.subr.bf16.mxu1 %v6661_v20  ;;  %v6605_v20 = vcombine.high %v1013_v14, %v1017_v15  ;;  %v970_v8 = vld [vmem:[#allocation13 + $0x1b8] sm:$0xff]  ;;  %v6566_v9 = vcombine.low %v974_v61, %v978_v62 }
 0x342   :  { %2666 = vmatpush1.bf16.msra.mxu0 %v6532_v25  ;;  %v1137_v25 = vld [vmem:[#allocation13 + $0x6f0] sm:$0xff] }
 0x343   :  { %2707 = vmatpush1.bf16.msra.mxu1 %v6660_v26  ;;  %2667 = vmatprep.subr.bf16.mxu0 %v6525_v27  ;;  %v6604_v26 = vcombine.low %v1013_v14, %v1017_v15  ;;  %v6732_v27 = vcombine.low %v1141_v16, %v1145_v17  ;;  %v6725_v30 = vcombine.high %v1133_v24, %v1137_v25  ;;  %v958_v14 = vld [vmem:[#allocation13 + $0x158] sm:$0xff] }
 0x344   :  { %2708 = vmatprep.subr.bf16.mxu1 %v6653_v28  ;;  %v6597_v28 = vcombine.high %v1005_v22, %v1009_v23  ;;  %v962_v15 = vld [vmem:[#allocation13 + $0x178] sm:$0xff] }
 0x345   :  { %v1086_v17 = vld [vmem:[#allocation13 + $0x558] sm:$0xff] }
 0x346   :  { %2668 = vmatpush1.bf16.msra.mxu0 %v6524_v37  ;;  %v1129_v37 = vld [vmem:[#allocation13 + $0x6b0] sm:$0xff] }
 0x347   :  { %2709 = vmatpush1.bf16.msra.mxu1 %v6652_v38  ;;  %2669 = vmatprep.subr.bf16.mxu0 %v6517_v39  ;;  %v6596_v38 = vcombine.low %v1005_v22, %v1009_v23  ;;  %v6724_v39 = vcombine.low %v1133_v24, %v1137_v25  ;;  %v6717_v43 = vcombine.high %v1125_v36, %v1129_v37  ;;  %v950_v23 = vld [vmem:[#allocation13 + $0x118] sm:$0xff] }
 0x348   :  { %2710 = vmatprep.subr.bf16.mxu1 %v6645_v40  ;;  %v6589_v40 = vcombine.high %v997_v31, %v1001_v32  ;;  %v954_v24 = vld [vmem:[#allocation13 + $0x138] sm:$0xff] }
 0x349   :  { %v1078_v25 = vld [vmem:[#allocation13 + $0x518] sm:$0xff] }
 0x34a   :  { %2670 = vmatpush1.bf16.msra.mxu0 %v6516_v48  ;;  %v1121_v48 = vld [vmem:[#allocation13 + $0x670] sm:$0xff] }
 0x34b   :  { %2711 = vmatpush1.bf16.msra.mxu1 %v6644_v49  ;;  %2671 = vmatprep.subr.bf16.mxu0 %v6509_v50  ;;  %v6588_v49 = vcombine.low %v997_v31, %v1001_v32  ;;  %v6716_v50 = vcombine.low %v1125_v36, %v1129_v37  ;;  %v6709_v52 = vcombine.high %v1117_v47, %v1121_v48  ;;  %v942_v31 = vld [vmem:[#allocation13 + $0xd8] sm:$0xff] }
 0x34c   :  { %2712 = vmatprep.subr.bf16.mxu1 %v6637_v51  ;;  %v6581_v51 = vcombine.high %v989_v45, %v993_v46  ;;  %v946_v32 = vld [vmem:[#allocation13 + $0xf8] sm:$0xff] }
 0x34d   :  { %v1070_v36 = vld [vmem:[#allocation13 + $0x4d8] sm:$0xff] }
 0x34e   :  { %2672 = vmatpush1.bf16.msra.mxu0 %v6508_v56  ;;  %v1113_v56 = vld [vmem:[#allocation13 + $0x630] sm:$0xff]  ;;  %v1074_v37 = vld [vmem:[#allocation13 + $0x4f8] sm:$0xff] }
 0x34f   :  { %2713 = vmatpush1.bf16.msra.mxu1 %v6636_v57  ;;  %2673 = vmatprep.subr.bf16.mxu0 %v6629_v58  ;;  %v6580_v57 = vcombine.low %v989_v45, %v993_v46  ;;  %v6708_v58 = vcombine.low %v1117_v47, %v1121_v48  ;;  %v6701_v60 = vcombine.high %v1109_v55, %v1113_v56  ;;  %v938_v45 = vld [vmem:[#allocation13 + $0xb8] sm:$0xff] }
 0x350   :  { %2714 = vmatprep.subr.bf16.mxu1 %v6757_v59  ;;  %v6573_v59 = vcombine.high %v981_v53, %v985_v54  ;;  %v1062_v46 = vld [vmem:[#allocation13 + $0x498] sm:$0xff]  ;;  %v6534_v48 = vcombine.low %v942_v31, %v946_v32 }
 0x351   :  { %v1066_v47 = vld [vmem:[#allocation13 + $0x4b8] sm:$0xff] }
 0x352   :  { %2674 = vmatpush2.bf16.msra.mxu0 %v6628_v0  ;;  %v1106_v0 = vld [vmem:[#allocation13 + $0x5f8] sm:$0xff] }
 0x353   :  { %2715 = vmatpush2.bf16.msra.mxu1 %v6756_v2  ;;  %2675 = vmatprep.subr.bf16.mxu0 %v6621_v4  ;;  %v6572_v2 = vcombine.low %v981_v53, %v985_v54  ;;  %v6700_v4 = vcombine.low %v1109_v55, %v1113_v56  ;;  %v6695_v6 = vcombine.high %v1102_v63, %v1106_v0  ;;  %v930_v53 = vld [vmem:[#allocation13 + $0x78] sm:$0xff] }
 0x354   :  { %2716 = vmatprep.subr.bf16.mxu1 %v6749_v5  ;;  %v6567_v5 = vcombine.high %v974_v61, %v978_v62  ;;  %v1054_v54 = vld [vmem:[#allocation13 + $0x458] sm:$0xff] }
 0x355   :  { %v1058_v55 = vld [vmem:[#allocation13 + $0x478] sm:$0xff] }
 0x356   :  { %2676 = vmatpush2.bf16.msra.mxu0 %v6620_v10  ;;  %v1094_v10 = vld [vmem:[#allocation13 + $0x598] sm:$0xff] }
 0x357   :  { %2717 = vmatpush2.bf16.msra.mxu1 %v6748_v11  ;;  %2677 = vmatprep.subr.bf16.mxu0 %v6613_v12  ;;  %v1098_v11 = vld [vmem:[#allocation13 + $0x5b8] sm:$0xff]  ;;  %v6694_v12 = vcombine.low %v1102_v63, %v1106_v0 }
 0x358   :  { %2718 = vmatprep.subr.bf16.mxu1 %v6741_v13  ;;  %v6559_v13 = vcombine.high %v966_v7, %v970_v8  ;;  %v6687_v16 = vcombine.high %v1094_v10, %v1098_v11  ;;  %v922_v61 = vld [vmem:[#allocation13 + $0x38] sm:$0xff] }
 0x359   :  { %v1046_v62 = vld [vmem:[#allocation13 + $0x418] sm:$0xff] }
 0x35a   :  { %2678 = vmatpush2.bf16.msra.mxu0 %v6612_v18  ;;  %v1090_v18 = vld [vmem:[#allocation13 + $0x578] sm:$0xff] }
 0x35b   :  { %2719 = vmatpush2.bf16.msra.mxu1 %v6740_v19  ;;  %2679 = vmatprep.subr.bf16.mxu0 %v6605_v20  ;;  %v6558_v19 = vcombine.low %v966_v7, %v970_v8  ;;  %v6686_v20 = vcombine.low %v1094_v10, %v1098_v11  ;;  %v6679_v22 = vcombine.high %v1086_v17, %v1090_v18  ;;  %v1050_v63 = vld [vmem:[#allocation13 + $0x438] sm:$0xff] }
 0x35c   :  { %2720 = vmatprep.subr.bf16.mxu1 %v6733_v21  ;;  %v6551_v21 = vcombine.high %v958_v14, %v962_v15  ;;  %v1042_v7 = vld [vmem:[#allocation13 + $0x3f8] sm:$0xff]  ;;  %v6638_v11 = vcombine.low %v1046_v62, %v1050_v63 }
 0x35d   :  { %v1166_v8 = vld [vmem:[#allocation13 + $0x7d8] sm:$0xff] }
 0x35e   :  { %2680 = vmatpush2.bf16.msra.mxu0 %v6604_v26  ;;  %v1082_v26 = vld [vmem:[#allocation13 + $0x538] sm:$0xff] }
 0x35f   :  { %2721 = vmatpush2.bf16.msra.mxu1 %v6732_v27  ;;  %2681 = vmatprep.subr.bf16.mxu0 %v6597_v28  ;;  %v6550_v27 = vcombine.low %v958_v14, %v962_v15  ;;  %v6678_v28 = vcombine.low %v1086_v17, %v1090_v18  ;;  %v1030_v14 = vld [vmem:[#allocation13 + $0x398] sm:$0xff] }
 0x360   :  { %2722 = vmatprep.subr.bf16.mxu1 %v6725_v30  ;;  %v6543_v30 = vcombine.high %v950_v23, %v954_v24  ;;  %v1034_v15 = vld [vmem:[#allocation13 + $0x3b8] sm:$0xff] }
 0x361   :  { %v1162_v17 = vld [vmem:[#allocation13 + $0x7b8] sm:$0xff] }
 0x362   :  { %2682 = vmatpush2.bf16.msra.mxu0 %v6596_v38  ;;  %v6670_v38 = vcombine.low %v1078_v25, %v1082_v26 }
 0x363   :  { %2723 = vmatpush2.bf16.msra.mxu1 %v6724_v39  ;;  %2683 = vmatprep.subr.bf16.mxu0 %v6589_v40  ;;  %v6535_v39 = vcombine.high %v942_v31, %v946_v32  ;;  %v6663_v40 = vcombine.high %v1070_v36, %v1074_v37  ;;  %v1018_v31 = vld [vmem:[#allocation13 + $0x338] sm:$0xff] }
 0x364   :  { %2724 = vmatprep.subr.bf16.mxu1 %v6717_v43  ;;  %v934_v43 = vld [vmem:[#allocation13 + $0x98] sm:$0xff] }
 0x365   :  { %v6526_v56 = vcombine.low %v934_v43, %v938_v45  ;;  %v1142_v32 = vld [vmem:[#allocation13 + $0x718] sm:$0xff] }
 0x366   :  { %2684 = vmatpush2.bf16.msra.mxu0 %v6588_v49  ;;  %v6662_v49 = vcombine.low %v1070_v36, %v1074_v37  ;;  %v1146_v36 = vld [vmem:[#allocation13 + $0x738] sm:$0xff] }
 0x367   :  { %2725 = vmatpush2.bf16.msra.mxu1 %v6716_v50  ;;  %2685 = vmatprep.subr.bf16.mxu0 %v6581_v51  ;;  %v6527_v50 = vcombine.high %v934_v43, %v938_v45  ;;  %v6655_v51 = vcombine.high %v1062_v46, %v1066_v47  ;;  %v1010_v43 = vld [vmem:[#allocation13 + $0x2f8] sm:$0xff] }
 0x368   :  { %2726 = vmatprep.subr.bf16.mxu1 %v6709_v52  ;;  %v926_v52 = vld [vmem:[#allocation13 + $0x58] sm:$0xff] }
 0x369   :  { %v6518_v0 = vcombine.low %v926_v52, %v930_v53  ;;  %v1134_v45 = vld [vmem:[#allocation13 + $0x6d8] sm:$0xff] }
 0x36a   :  { %2686 = vmatpush2.bf16.msra.mxu0 %v6580_v57  ;;  %v6654_v57 = vcombine.low %v1062_v46, %v1066_v47  ;;  %v1138_v46 = vld [vmem:[#allocation13 + $0x6f8] sm:$0xff] }
 0x36b   :  { %2727 = vmatpush2.bf16.msra.mxu1 %v6708_v58  ;;  %2687 = vmatprep.subr.bf16.mxu0 %v6573_v59  ;;  %v6519_v58 = vcombine.high %v926_v52, %v930_v53  ;;  %v6647_v59 = vcombine.high %v1054_v54, %v1058_v55  ;;  %v1002_v52 = vld [vmem:[#allocation13 + $0x2b8] sm:$0xff] }
 0x36c   :  { %2728 = vmatprep.subr.bf16.mxu1 %v6701_v60  ;;  %v918_v60 = vld [vmem:[#allocation13 + $0x18] sm:$0xff] }
 0x36d   :  { %v6510_v10 = vcombine.low %v918_v60, %v922_v61  ;;  %v1126_v53 = vld [vmem:[#allocation13 + $0x698] sm:$0xff] }
 0x36e   :  { %2688 = vmatpush2.bf16.msra.mxu0 %v6572_v2  ;;  %v6646_v2 = vcombine.low %v1054_v54, %v1058_v55  ;;  %v1130_v54 = vld [vmem:[#allocation13 + $0x6b8] sm:$0xff] }
 0x36f   :  { %2729 = vmatpush2.bf16.msra.mxu1 %v6700_v4  ;;  %2739 = vmatprep.subr.bf16.mxu0 %v6567_v5  ;;  %v6511_v4 = vcombine.high %v918_v60, %v922_v61  ;;  %v6639_v5 = vcombine.high %v1046_v62, %v1050_v63  ;;  %v994_v60 = vld [vmem:[#allocation13 + $0x278] sm:$0xff] }
 0x370   :  { %2780 = vmatprep.subr.bf16.mxu1 %v6695_v6  ;;  %v1038_v6 = vld [vmem:[#allocation13 + $0x3d8] sm:$0xff] }
 0x371   :  { %2690 = vmatmul.mubr.bf16.vlgmr.msra.gmra.mxu0 %v8497_v33  ;;  %v6630_v18 = vcombine.low %v1038_v6, %v1042_v7  ;;  %v1118_v61 = vld [vmem:[#allocation13 + $0x658] sm:$0xff] }
 0x372   :  { %2731 = vmatmul.mubr.bf16.vlgmr.msra.gmra.mxu1 %v8501_v35  ;;  %2740 = vmatpush1.bf16.msra.mxu0 %v6566_v9  ;;  %v1170_v9 = vld [vmem:[#allocation13 + $0x7f8] sm:$0xff] }
 0x373   :  { %2771 = vmatprep.mubr.bf16.mxu0 %v8495_v29  ;;  %2781 = vmatpush1.bf16.msra.mxu1 %v6694_v12  ;;  %v6671_v29 = vcombine.high %v1078_v25, %v1082_v26  ;;  %v6631_v12 = vcombine.high %v1038_v6, %v1042_v7  ;;  %v1154_v25 = vld [vmem:[#allocation13 + $0x778] sm:$0xff]  ;;  %v6622_v26 = vcombine.low %v1030_v14, %v1034_v15 }
 0x374   :  { %2812 = vmatprep.mubr.bf16.mxu1 %v8499_v34  ;;  %2741 = vmatprep.subr.bf16.mxu0 %v6559_v13  ;;  %v6542_v34 = vcombine.low %v950_v23, %v954_v24  ;;  %v6759_v13 = vcombine.high %v1166_v8, %v1170_v9  ;;  %v1026_v23 = vld [vmem:[#allocation13 + $0x378] sm:$0xff] }
 0x375   :  { %2782 = vmatprep.subr.bf16.mxu1 %v6687_v16  ;;  %v1158_v16 = vld [vmem:[#allocation13 + $0x798] sm:$0xff] }
 0x376   :  { %2742 = vmatpush1.bf16.msra.mxu0 %v6558_v19  ;;  %v6758_v19 = vcombine.low %v1166_v8, %v1170_v9  ;;  %v1150_v24 = vld [vmem:[#allocation13 + $0x758] sm:$0xff] }
 0x377   :  { %2783 = vmatpush1.bf16.msra.mxu1 %v6686_v20  ;;  %2743 = vmatprep.subr.bf16.mxu0 %v6551_v21  ;;  %v6623_v20 = vcombine.high %v1030_v14, %v1034_v15  ;;  %v6751_v21 = vcombine.high %v1158_v16, %v1162_v17  ;;  %v1122_v62 = vld [vmem:[#allocation13 + $0x678] sm:$0xff]  ;;  %v7471_v15 = vld [vmem:[#allocation16 + $0x18c] ss:$28 sps:$4 sm:$0xff]  }
 0x378   :  { %2784 = vmatprep.subr.bf16.mxu1 %v6679_v22  ;;  %v1022_v22 = vld [vmem:[#allocation13 + $0x358] sm:$0xff] }
 0x379   :  { %v6614_v37 = vcombine.low %v1022_v22, %v1026_v23  ;;  %v986_v6 = vld [vmem:[#allocation13 + $0x238] sm:$0xff] }
 0x37a   :  { %2744 = vmatpush1.bf16.msra.mxu0 %v6550_v27  ;;  %v6750_v27 = vcombine.low %v1158_v16, %v1162_v17  ;;  %v1110_v7 = vld [vmem:[#allocation13 + $0x618] sm:$0xff]  ;;  %v7483_v16 = vld [vmem:[#allocation16 + $0x50c] ss:$28 sps:$4 sm:$0xff]  }
 0x37b   :  { %2785 = vmatpush1.bf16.msra.mxu1 %v6678_v28  ;;  %2745 = vmatprep.subr.bf16.mxu0 %v6543_v30  ;;  %v6615_v28 = vcombine.high %v1022_v22, %v1026_v23  ;;  %v6743_v30 = vcombine.high %v1150_v24, %v1154_v25  ;;  %v1114_v8 = vld [vmem:[#allocation13 + $0x638] sm:$0xff]  ;;  %v7469_v17 = vld [vmem:[#allocation16 + $0x188] ss:$28 sps:$4 sm:$0xff]  }
 0x37c   :  { %2786 = vmatprep.subr.bf16.mxu1 %v6671_v29  ;;  %v1014_v29 = vld [vmem:[#allocation13 + $0x318] sm:$0xff]  ;;  %v6702_v14 = vcombine.low %v1110_v7, %v1114_v8 }
 0x37d   :  { %v6606_v47 = vcombine.low %v1014_v29, %v1018_v31  ;;  %v7489_v22 = vld [vmem:[#allocation16 + $0x4d4] ss:$28 sps:$4 sm:$0xff]  }
 0x37e   :  { %2746 = vmatpush1.bf16.msra.mxu0 %v6542_v34  ;;  %v6742_v34 = vcombine.low %v1150_v24, %v1154_v25  ;;  %v7472_v25 = vld [vmem:[#allocation16 + $0x150] ss:$28 sps:$4 sm:$0xff]  }
 0x37f   :  { %2787 = vmatpush1.bf16.msra.mxu1 %v6670_v38  ;;  %2747 = vmatprep.subr.bf16.mxu0 %v6535_v39  ;;  %v6607_v38 = vcombine.high %v1014_v29, %v1018_v31  ;;  %v6735_v39 = vcombine.high %v1142_v32, %v1146_v36  ;;  %v7495_v31 = vld [vmem:[#allocation16 + $0x49c] ss:$28 sps:$4 sm:$0xff]  }
 0x380   :  { %2788 = vmatprep.subr.bf16.mxu1 %v6663_v40  ;;  %v1006_v40 = vld [vmem:[#allocation13 + $0x2d8] sm:$0xff] }
 0x381   :  { %v6598_v55 = vcombine.low %v1006_v40, %v1010_v43 }
 0x382   :  { %2748 = vmatpush1.bf16.msra.mxu0 %v6534_v48  ;;  %v6734_v48 = vcombine.low %v1142_v32, %v1146_v36 }
 0x383   :  { %2789 = vmatpush1.bf16.msra.mxu1 %v6662_v49  ;;  %2749 = vmatprep.subr.bf16.mxu0 %v6527_v50  ;;  %v6599_v49 = vcombine.high %v1006_v40, %v1010_v43  ;;  %v6727_v50 = vcombine.high %v1134_v45, %v1138_v46  ;;  %v7501_v43 = vld [vmem:[#allocation16 + $0x464] ss:$28 sps:$4 sm:$0xff]  }
 0x384   :  { %2790 = vmatprep.subr.bf16.mxu1 %v6655_v51  ;;  %v998_v51 = vld [vmem:[#allocation13 + $0x298] sm:$0xff] }
 0x385   :  { %v6590_v63 = vcombine.low %v998_v51, %v1002_v52 }
 0x386   :  { %2750 = vmatpush1.bf16.msra.mxu0 %v6526_v56  ;;  %v6726_v56 = vcombine.low %v1134_v45, %v1138_v46  ;;  %v7478_v46 = vld [vmem:[#allocation16 + $0xe0] ss:$28 sps:$4 sm:$0xff]  }
 0x387   :  { %2791 = vmatpush1.bf16.msra.mxu1 %v6654_v57  ;;  %2751 = vmatprep.subr.bf16.mxu0 %v6519_v58  ;;  %v6591_v57 = vcombine.high %v998_v51, %v1002_v52  ;;  %v6719_v58 = vcombine.high %v1126_v53, %v1130_v54  ;;  %v7484_v51 = vld [vmem:[#allocation16 + $0xa8] ss:$28 sps:$4 sm:$0xff]   ;;  %v7492_v52 = vld [vmem:[#allocation16 + $0x74] ss:$28 sps:$4 sm:$0xff]  }
 0x388   :  { %2792 = vmatprep.subr.bf16.mxu1 %v6647_v59  ;;  %v990_v59 = vld [vmem:[#allocation13 + $0x258] sm:$0xff] }
 0x389   :  { %v6582_v9 = vcombine.low %v990_v59, %v994_v60 }
 0x38a   :  { %2752 = vmatpush1.bf16.msra.mxu0 %v6518_v0  ;;  %v6718_v0 = vcombine.low %v1126_v53, %v1130_v54  ;;  %v7505_v53 = vld [vmem:[#allocation16 + $0x428] ss:$28 sps:$4 sm:$0xff]   ;;  %v7513_v54 = vld [vmem:[#allocation16 + $0x3f4] ss:$28 sps:$4 sm:$0xff]  }
 0x38b   :  { %2793 = vmatpush1.bf16.msra.mxu1 %v6646_v2  ;;  %2753 = vmatprep.subr.bf16.mxu0 %v6511_v4  ;;  %v6583_v2 = vcombine.high %v990_v59, %v994_v60  ;;  %v6711_v4 = vcombine.high %v1118_v61, %v1122_v62  ;;  %v7496_v59 = vld [vmem:[#allocation16 + $0x38] ss:$28 sps:$4 sm:$0xff]   ;;  %v7504_v60 = vld [vmem:[#allocation16 + $0x4] ss:$28 sps:$4 sm:$0xff]  }
 0x38c   :  { %2794 = vmatprep.subr.bf16.mxu1 %v6639_v5  ;;  %v982_v5 = vld [vmem:[#allocation13 + $0x218] sm:$0xff] }
 0x38e   :  { %2754 = vmatpush1.bf16.msra.mxu0 %v6510_v10  ;;  %v6710_v10 = vcombine.low %v1118_v61, %v1122_v62  ;;  %v7517_v61 = vld [vmem:[#allocation16 + $0x3b8] ss:$28 sps:$4 sm:$0xff]   ;;  %v7525_v62 = vld [vmem:[#allocation16 + $0x384] ss:$28 sps:$4 sm:$0xff]  }
 0x38f   :  { %2795 = vmatpush1.bf16.msra.mxu1 %v6638_v11  ;;  %2755 = vmatprep.subr.bf16.mxu0 %v6631_v12  ;;  %v6575_v11 = vcombine.high %v982_v5, %v986_v6  ;;  %v6703_v12 = vcombine.high %v1110_v7, %v1114_v8  ;;  %v7529_v7 = vld [vmem:[#allocation16 + $0x6c8] ss:$28 sps:$4 sm:$0xff]   ;;  %v7537_v8 = vld [vmem:[#allocation16 + $0x694] ss:$28 sps:$4 sm:$0xff]  }
 0x390   :  { %2796 = vmatprep.subr.bf16.mxu1 %v6759_v13  ;;  %v6574_v13 = vcombine.low %v982_v5, %v986_v6  ;;  %v7508_v5 = vld [vmem:[#allocation16 + $0x348] ss:$28 sps:$4 sm:$0xff]   ;;  %v7516_v6 = vld [vmem:[#allocation16 + $0x314] ss:$28 sps:$4 sm:$0xff]  }
 0x392   :  { %2756 = vmatpush2.bf16.msra.mxu0 %v6630_v18  ;;  %v8517_v18 = vld [vmem:[#allocation14] sm:$0xff] }
 0x393   :  { %2797 = vmatpush2.bf16.msra.mxu1 %v6758_v19  ;;  %2757 = vmatprep.subr.bf16.mxu0 %v6623_v20  ;;  %v7474_v19 = vld [vmem:[#allocation16 + $0x154] ss:$28 sps:$4 sm:$0xff]   ;;  %v7481_v20 = vld [vmem:[#allocation16 + $0x508] ss:$28 sps:$4 sm:$0xff]  }
 0x394   :  { %2798 = vmatprep.subr.bf16.mxu1 %v6751_v21  ;;  %v1180_v21 = vrot.slane %v8517_v18, %v8481_v44 }
 0x396   :  { %2758 = vmatpush2.bf16.msra.mxu0 %v6622_v26 }
 0x397   :  { %2799 = vmatpush2.bf16.msra.mxu1 %v6750_v27  ;;  %2759 = vmatprep.subr.bf16.mxu0 %v6615_v28  ;;  %v7477_v27 = vld [vmem:[#allocation16 + $0x11c] ss:$28 sps:$4 sm:$0xff]   ;;  %v7487_v28 = vld [vmem:[#allocation16 + $0x4d0] ss:$28 sps:$4 sm:$0xff]  }
 0x398   :  { %2800 = vmatprep.subr.bf16.mxu1 %v6743_v30 }
 0x39a   :  { %2760 = vmatpush2.bf16.msra.mxu0 %v6614_v37  ;;  %v7475_v37 = vld [vmem:[#allocation16 + $0x118] ss:$28 sps:$4 sm:$0xff]  }
 0x39b   :  { %2801 = vmatpush2.bf16.msra.mxu1 %v6742_v34  ;;  %2761 = vmatprep.subr.bf16.mxu0 %v6607_v38  ;;  %v7493_v38 = vld [vmem:[#allocation16 + $0x498] ss:$28 sps:$4 sm:$0xff]  }
 0x39c   :  { %2802 = vmatprep.subr.bf16.mxu1 %v6735_v39 }
 0x39e   :  { %2762 = vmatpush2.bf16.msra.mxu0 %v6606_v47 }
 0x39f   :  { %2803 = vmatpush2.bf16.msra.mxu1 %v6734_v48  ;;  %2763 = vmatprep.subr.bf16.mxu0 %v6599_v49  ;;  %v7486_v48 = vld [vmem:[#allocation16 + $0xac] ss:$28 sps:$4 sm:$0xff]   ;;  %v7499_v49 = vld [vmem:[#allocation16 + $0x460] ss:$28 sps:$4 sm:$0xff]  }
 0x3a0   :  { %2804 = vmatprep.subr.bf16.mxu1 %v6727_v50  ;;  %v7507_v50 = vld [vmem:[#allocation16 + $0x42c] ss:$28 sps:$4 sm:$0xff]  }
 0x3a2   :  { %2764 = vmatpush2.bf16.msra.mxu0 %v6598_v55  ;;  %v7490_v55 = vld [vmem:[#allocation16 + $0x70] ss:$28 sps:$4 sm:$0xff]  }
 0x3a3   :  { %2805 = vmatpush2.bf16.msra.mxu1 %v6726_v56  ;;  %2765 = vmatprep.subr.bf16.mxu0 %v6591_v57  ;;  %v7498_v56 = vld [vmem:[#allocation16 + $0x3c] ss:$28 sps:$4 sm:$0xff]   ;;  %v7511_v57 = vld [vmem:[#allocation16 + $0x3f0] ss:$28 sps:$4 sm:$0xff]  }
 0x3a4   :  { %2806 = vmatprep.subr.bf16.mxu1 %v6719_v58  ;;  %v7519_v58 = vld [vmem:[#allocation16 + $0x3bc] ss:$28 sps:$4 sm:$0xff]  }
 0x3a6   :  { %2766 = vmatpush2.bf16.msra.mxu0 %v6590_v63  ;;  %v7502_v63 = vld [vmem:[#allocation16] ss:$28 sps:$4 sm:$0xff]  }
 0x3a7   :  { %2807 = vmatpush2.bf16.msra.mxu1 %v6718_v0  ;;  %2767 = vmatprep.subr.bf16.mxu0 %v6583_v2  ;;  %v7510_v0 = vld [vmem:[#allocation16 + $0x34c] ss:$28 sps:$4 sm:$0xff]   ;;  %v7523_v2 = vld [vmem:[#allocation16 + $0x380] ss:$28 sps:$4 sm:$0xff]  }
 0x3a8   :  { %2808 = vmatprep.subr.bf16.mxu1 %v6711_v4  ;;  %v7531_v4 = vld [vmem:[#allocation16 + $0x6cc] ss:$28 sps:$4 sm:$0xff]  }
 0x3aa   :  { %2768 = vmatpush2.bf16.msra.mxu0 %v6582_v9  ;;  %v7514_v9 = vld [vmem:[#allocation16 + $0x310] ss:$28 sps:$4 sm:$0xff]  }
 0x3ab   :  { %2809 = vmatpush2.bf16.msra.mxu1 %v6710_v10  ;;  %2769 = vmatprep.subr.bf16.mxu0 %v6575_v11  ;;  %v7522_v10 = vld [vmem:[#allocation16 + $0x2dc] ss:$28 sps:$4 sm:$0xff]   ;;  %v7535_v11 = vld [vmem:[#allocation16 + $0x690] ss:$28 sps:$4 sm:$0xff]  }
 0x3ac   :  { %2810 = vmatprep.subr.bf16.mxu1 %v6703_v12  ;;  %v7543_v12 = vld [vmem:[#allocation16 + $0x65c] ss:$28 sps:$4 sm:$0xff]  }
 0x3ae   :  { %2770 = vmatpush2.bf16.msra.mxu0 %v6574_v13  ;;  %v7520_v13 = vld [vmem:[#allocation16 + $0x2d8] ss:$28 sps:$4 sm:$0xff]  }
 0x3af   :  { %2811 = vmatpush2.bf16.msra.mxu1 %v6702_v14  ;;  %5706 = vmatprep.subr.bf16.mxu0 %v7471_v15  ;;  %v7528_v14 = vld [vmem:[#allocation16 + $0x2a4] ss:$28 sps:$4 sm:$0xff]   ;;  %v7541_v15 = vld [vmem:[#allocation16 + $0x658] ss:$28 sps:$4 sm:$0xff]  }
 0x3b0   :  { %5747 = vmatprep.subr.bf16.mxu1 %v7483_v16  ;;  %v7549_v16 = vld [vmem:[#allocation16 + $0x624] ss:$28 sps:$4 sm:$0xff]  }
 0x3b1   :  { %2772 = vmatmul.mubr.bf16.vlgmr.msra.gmra.mxu0 %v8497_v33  ;;  %v8522_v23 = vpop.f32.mrf.mxu0 }
 0x3b2   :  { %2813 = vmatmul.mubr.bf16.vlgmr.msra.gmra.mxu1 %v8501_v35  ;;  %v8525_v24 = vpop.f32.mrf.mxu1  ;;  %5707 = vmatpush1.bf16.msra.mxu0 %v7469_v17  ;;  %v7480_v35 = vld [vmem:[#allocation16 + $0xe4] ss:$28 sps:$4 sm:$0xff]  }
 0x3b3   :  { %v2529_v26 = vpop.f32.mrf.mxu0  ;;  %5708 = vmatprep.subr.bf16.mxu0 %v7474_v19  ;;  %5748 = vmatpush1.bf16.msra.mxu1 %v7481_v20  ;;  %v7526_v17 = vld [vmem:[#allocation16 + $0x2a0] ss:$28 sps:$4 sm:$0xff]   ;;  %v7534_v19 = vld [vmem:[#allocation16 + $0x26c] ss:$28 sps:$4 sm:$0xff]  }
 0x3b4   :  { %v2530_v30 = vadd.f32 %v2529_v26, %v1180_v21  ;;  %v2570_v29 = vpop.f32.mrf.mxu1  ;;  %5749 = vmatprep.subr.bf16.mxu1 %v7489_v22  ;;  %v7547_v20 = vld [vmem:[#allocation16 + $0x620] ss:$28 sps:$4 sm:$0xff]   ;;  %v1176_v21 = vrot.slane %v8517_v18, %v8478_v42  ;;  %v7555_v22 = vld [vmem:[#allocation16 + $0x5ec] ss:$28 sps:$4 sm:$0xff]   ;;  %v7540_v26 = vld [vmem:[#allocation16 + $0x234] ss:$28 sps:$4 sm:$0xff]  }
 0x3b5   :  { %v2531_v32 = vpop.f32.mrf.mxu0 }
 0x3b6   :  { %v2571_v36 = vadd.f32 %v2570_v29, %v2530_v30  ;;  %v2572_v33 = vpop.f32.mrf.mxu1  ;;  %5709 = vmatpush1.bf16.msra.mxu0 %v7472_v25  ;;  %v7532_v25 = vld [vmem:[#allocation16 + $0x268] ss:$28 sps:$4 sm:$0xff]   ;;  %v7558_v30 = vld [vmem:[#allocation16 + $0x5b4] ss:$28 sps:$4 sm:$0xff]  }
 0x3b7   :  { %v2532_v34 = vpop.f32.mrf.mxu0  ;;  %5710 = vmatprep.subr.bf16.mxu0 %v7477_v27  ;;  %5750 = vmatpush1.bf16.msra.mxu1 %v7487_v28  ;;  %v7553_v27 = vld [vmem:[#allocation16 + $0x5e8] ss:$28 sps:$4 sm:$0xff]   ;;  %v2528_v28 = vadd.f32 %v8522_v23, %v1176_v21  ;;  %v7538_v29 = vld [vmem:[#allocation16 + $0x230] ss:$28 sps:$4 sm:$0xff]   ;;  %v7561_v33 = vld [vmem:[#allocation16 + $0x57c] ss:$28 sps:$4 sm:$0xff]  }
 0x3b8   :  { %vm2822_vm9 = vcmp.gt.f32.partialorder %v2571_v36, 0.0  ;;  %v2830_v39 = vmul.f32 0.2, %v2571_v36  ;;  %v2573_v40 = vpop.f32.mrf.mxu1  ;;  %5751 = vmatprep.subr.bf16.mxu1 %v7495_v31  ;;  %v7546_v31 = vld [vmem:[#allocation16 + $0x1fc] ss:$28 sps:$4 sm:$0xff]  }
 0x3b9   :  { %v7556_v32 = vld [vmem:[#allocation16 + $0x5b0] ss:$28 sps:$4 sm:$0xff]   ;;  %v7552_v34 = vld [vmem:[#allocation16 + $0x1c4] ss:$28 sps:$4 sm:$0xff]  }
 0x3ba   :  { %v2838_v45 = vsel %vm2822_vm9, %v2571_v36, %v2830_v39  ;;  %5711 = vmatpush1.bf16.msra.mxu0 %v7475_v37  ;;  %v2569_v36 = vadd.f32 %v8525_v24, %v2528_v28  ;;  %v7544_v37 = vld [vmem:[#allocation16 + $0x1f8] ss:$28 sps:$4 sm:$0xff]   ;;  %v7564_v23 = vld [vmem:[#allocation16 + $0x544] ss:$28 sps:$4 sm:$0xff]   ;;  %v7615_v24 = vld [vmem:[#allocation16 + $0xc0c] ss:$28 sps:$4 sm:$0xff]  }
 0x3bb   :  { %v8527_v47 = vpack.c.bf16 %v2838_v45, %v2838_v45  ;;  %5712 = vmatprep.subr.bf16.mxu0 %v7480_v35  ;;  %5752 = vmatpush1.bf16.msra.mxu1 %v7493_v38  ;;  %v7559_v35 = vld [vmem:[#allocation16 + $0x578] ss:$28 sps:$4 sm:$0xff]   ;;  %v7550_v39 = vld [vmem:[#allocation16 + $0x1c0] ss:$28 sps:$4 sm:$0xff]   ;;  %v7580_v21 = vld [vmem:[#allocation16 + $0x770] ss:$28 sps:$4 sm:$0xff]  }
 0x3bc   :  { %5753 = vmatprep.subr.bf16.mxu1 %v7501_v43  ;;  %v2829_v38 = vmul.f32 0.2, %v2569_v36  ;;  %vm2821_vm10 = vcmp.gt.f32.partialorder %v2569_v36, 0.0  ;;  %v7562_v40 = vld [vmem:[#allocation16 + $0x540] ss:$28 sps:$4 sm:$0xff]  }
 0x3bd   :  { %5738 = vmatprep.mubr.bf16.mxu0 %v8527_v47  ;;  %v7567_v43 = vld [vmem:[#allocation16 + $0x88c] ss:$28 sps:$4 sm:$0xff]   ;;  %v7588_v28 = vld [vmem:[#allocation16 + $0x704] ss:$28 sps:$4 sm:$0xff]  }
 0x3be   :  { %5713 = vmatpush1.bf16.msra.mxu0 %v7478_v46  ;;  %v2837_v45 = vsel %vm2821_vm10, %v2569_v36, %v2829_v38  ;;  %v1184_v46 = vrot.slane %v8517_v18, %v8486_v1  ;;  %v7637_v36 = vld [vmem:[#allocation16 + $0xb28] ss:$28 sps:$4 sm:$0xff]   ;;  %v7651_v38 = vld [vmem:[#allocation16 + $0xabc] ss:$28 sps:$4 sm:$0xff]  }
 0x3bf   :  { %5714 = vmatprep.subr.bf16.mxu0 %v7486_v48  ;;  %5754 = vmatpush1.bf16.msra.mxu1 %v7499_v49  ;;  %v7565_v48 = vld [vmem:[#allocation16 + $0x888] ss:$28 sps:$4 sm:$0xff]   ;;  %v8536_v49 = vpack.c.bf16 %v2837_v45, %v2837_v45  ;;  %v7595_v45 = vld [vmem:[#allocation16 + $0x9d8] ss:$28 sps:$4 sm:$0xff]  }
 0x3c0   :  { %5755 = vmatprep.subr.bf16.mxu1 %v7507_v50  ;;  %v7570_v50 = vld [vmem:[#allocation16 + $0x854] ss:$28 sps:$4 sm:$0xff]  }
 0x3c2   :  { %5715 = vmatpush1.bf16.msra.mxu0 %v7484_v51  ;;  %v1188_v51 = vrot.slane %v8517_v18, %v8489_v3 }
 0x3c3   :  { %5716 = vmatprep.subr.bf16.mxu0 %v7492_v52  ;;  %5756 = vmatpush1.bf16.msra.mxu1 %v7505_v53 }
 0x3c4   :  { %5757 = vmatprep.subr.bf16.mxu1 %v7513_v54 }
 0x3c6   :  { %5717 = vmatpush1.bf16.msra.mxu0 %v7490_v55  ;;  %v7568_v55 = vld [vmem:[#allocation16 + $0x850] ss:$28 sps:$4 sm:$0xff]  }
 0x3c7   :  { %5718 = vmatprep.subr.bf16.mxu0 %v7498_v56  ;;  %5758 = vmatpush1.bf16.msra.mxu1 %v7511_v57  ;;  %v7573_v57 = vld [vmem:[#allocation16 + $0x81c] ss:$28 sps:$4 sm:$0xff]  }
 0x3c8   :  { %5759 = vmatprep.subr.bf16.mxu1 %v7519_v58 }
 0x3ca   :  { %5719 = vmatpush1.bf16.msra.mxu0 %v7496_v59 }
 0x3cb   :  { %5720 = vmatprep.subr.bf16.mxu0 %v7504_v60  ;;  %5760 = vmatpush1.bf16.msra.mxu1 %v7517_v61 }
 0x3cc   :  { %5761 = vmatprep.subr.bf16.mxu1 %v7525_v62 }
 0x3ce   :  { %5721 = vmatpush1.bf16.msra.mxu0 %v7502_v63 }
 0x3cf   :  { %5722 = vmatprep.subr.bf16.mxu0 %v7510_v0  ;;  %5762 = vmatpush1.bf16.msra.mxu1 %v7523_v2  ;;  %v7571_v2 = vld [vmem:[#allocation16 + $0x818] ss:$28 sps:$4 sm:$0xff]  }
 0x3d0   :  { %5763 = vmatprep.subr.bf16.mxu1 %v7531_v4 }
 0x3d2   :  { %5723 = vmatpush2.bf16.msra.mxu0 %v7508_v5  ;;  %v7576_v5 = vld [vmem:[#allocation16 + $0x7e4] ss:$28 sps:$4 sm:$0xff]  }
 0x3d3   :  { %5724 = vmatprep.subr.bf16.mxu0 %v7516_v6  ;;  %5764 = vmatpush2.bf16.msra.mxu1 %v7529_v7 }
 0x3d4   :  { %5765 = vmatprep.subr.bf16.mxu1 %v7537_v8 }
 0x3d6   :  { %5725 = vmatpush2.bf16.msra.mxu0 %v7514_v9 }
 0x3d7   :  { %5726 = vmatprep.subr.bf16.mxu0 %v7522_v10  ;;  %5766 = vmatpush2.bf16.msra.mxu1 %v7535_v11  ;;  %v7574_v10 = vld [vmem:[#allocation16 + $0x7e0] ss:$28 sps:$4 sm:$0xff]  }
 0x3d8   :  { %5767 = vmatprep.subr.bf16.mxu1 %v7543_v12  ;;  %v7579_v12 = vld [vmem:[#allocation16 + $0x7ac] ss:$28 sps:$4 sm:$0xff]  }
 0x3da   :  { %5727 = vmatpush2.bf16.msra.mxu0 %v7520_v13  ;;  %v7613_v13 = vld [vmem:[#allocation16 + $0xc08] ss:$28 sps:$4 sm:$0xff]  }
 0x3db   :  { %5728 = vmatprep.subr.bf16.mxu0 %v7528_v14  ;;  %5768 = vmatpush2.bf16.msra.mxu1 %v7541_v15  ;;  %v7621_v15 = vld [vmem:[#allocation16 + $0xbd4] ss:$28 sps:$4 sm:$0xff]  }
 0x3dc   :  { %5769 = vmatprep.subr.bf16.mxu1 %v7549_v16  ;;  %v7577_v16 = vld [vmem:[#allocation16 + $0x7a8] ss:$28 sps:$4 sm:$0xff]  }
 0x3de   :  { %5729 = vmatpush2.bf16.msra.mxu0 %v7526_v17  ;;  %v7582_v17 = vld [vmem:[#allocation16 + $0x774] ss:$28 sps:$4 sm:$0xff]  }
 0x3df   :  { %5730 = vmatprep.subr.bf16.mxu0 %v7534_v19  ;;  %5770 = vmatpush2.bf16.msra.mxu1 %v7547_v20  ;;  %v7619_v19 = vld [vmem:[#allocation16 + $0xbd0] ss:$28 sps:$4 sm:$0xff]   ;;  %v7627_v20 = vld [vmem:[#allocation16 + $0xb9c] ss:$28 sps:$4 sm:$0xff]  }
 0x3e0   :  { %5771 = vmatprep.subr.bf16.mxu1 %v7555_v22  ;;  %v7585_v22 = vld [vmem:[#allocation16 + $0x73c] ss:$28 sps:$4 sm:$0xff]  }
 0x3e2   :  { %5731 = vmatpush2.bf16.msra.mxu0 %v7532_v25  ;;  %v7625_v25 = vld [vmem:[#allocation16 + $0xb98] ss:$28 sps:$4 sm:$0xff]  }
 0x3e3   :  { %5732 = vmatprep.subr.bf16.mxu0 %v7540_v26  ;;  %5772 = vmatpush2.bf16.msra.mxu1 %v7553_v27  ;;  %v7633_v26 = vld [vmem:[#allocation16 + $0xb64] ss:$28 sps:$4 sm:$0xff]   ;;  %v7583_v27 = vld [vmem:[#allocation16 + $0x738] ss:$28 sps:$4 sm:$0xff]  }
 0x3e4   :  { %5773 = vmatprep.subr.bf16.mxu1 %v7558_v30  ;;  %v7631_v30 = vld [vmem:[#allocation16 + $0xb60] ss:$28 sps:$4 sm:$0xff]  }
 0x3e6   :  { %5733 = vmatpush2.bf16.msra.mxu0 %v7538_v29  ;;  %v7639_v29 = vld [vmem:[#allocation16 + $0xb2c] ss:$28 sps:$4 sm:$0xff]  }
 0x3e7   :  { %5734 = vmatprep.subr.bf16.mxu0 %v7546_v31  ;;  %5774 = vmatpush2.bf16.msra.mxu1 %v7556_v32  ;;  %v7586_v31 = vld [vmem:[#allocation16 + $0x700] ss:$28 sps:$4 sm:$0xff]   ;;  %v7591_v32 = vld [vmem:[#allocation16 + $0xa4c] ss:$28 sps:$4 sm:$0xff]  }
 0x3e8   :  { %5775 = vmatprep.subr.bf16.mxu1 %v7561_v33  ;;  %v7645_v33 = vld [vmem:[#allocation16 + $0xaf4] ss:$28 sps:$4 sm:$0xff]  }
 0x3ea   :  { %5735 = vmatpush2.bf16.msra.mxu0 %v7544_v37  ;;  %v7589_v37 = vld [vmem:[#allocation16 + $0xa48] ss:$28 sps:$4 sm:$0xff]  }
 0x3eb   :  { %5736 = vmatprep.subr.bf16.mxu0 %v7552_v34  ;;  %5776 = vmatpush2.bf16.msra.mxu1 %v7559_v35  ;;  %v7594_v34 = vld [vmem:[#allocation16 + $0xa14] ss:$28 sps:$4 sm:$0xff]  }
 0x3ec   :  { %5777 = vmatprep.subr.bf16.mxu1 %v7564_v23  ;;  %v7643_v35 = vld [vmem:[#allocation16 + $0xaf0] ss:$28 sps:$4 sm:$0xff]  }
 0x3ed   :  { %v7592_v23 = vld [vmem:[#allocation16 + $0xa10] ss:$28 sps:$4 sm:$0xff]  }
 0x3ee   :  { %5737 = vmatpush2.bf16.msra.mxu0 %v7550_v39  ;;  %v7597_v39 = vld [vmem:[#allocation16 + $0x9dc] ss:$28 sps:$4 sm:$0xff]  }
 0x3ef   :  { %5778 = vmatpush2.bf16.msra.mxu1 %v7562_v40  ;;  %5788 = vmatprep.subr.bf16.mxu0 %v7567_v43  ;;  %v7649_v40 = vld [vmem:[#allocation16 + $0xab8] ss:$28 sps:$4 sm:$0xff]   ;;  %v7657_v43 = vld [vmem:[#allocation16 + $0xa84] ss:$28 sps:$4 sm:$0xff]  }
 0x3f0   :  { %5829 = vmatprep.subr.bf16.mxu1 %v7615_v24  ;;  %v7600_v24 = vld [vmem:[#allocation16 + $0x9a4] ss:$28 sps:$4 sm:$0xff]  }
 0x3f1   :  { %v2609_v52 = vpop.f32.mrf.mxu0  ;;  %5739 = vmatmul.mubr.bf16.vlgmr.msra.gmra.mxu0 %v8536_v49 }
 0x3f2   :  { %v2610_v53 = vadd.f32 %v2609_v52, %v1184_v46  ;;  %v2650_v54 = vpop.f32.mrf.mxu1  ;;  %5789 = vmatpush1.bf16.msra.mxu0 %v7565_v48  ;;  %v7655_v46 = vld [vmem:[#allocation16 + $0xa80] ss:$28 sps:$4 sm:$0xff]   ;;  %v7663_v48 = vld [vmem:[#allocation16 + $0xdcc] ss:$28 sps:$4 sm:$0xff]  }
 0x3f3   :  { %v2611_v56 = vpop.f32.mrf.mxu0  ;;  %5790 = vmatprep.subr.bf16.mxu0 %v7570_v50  ;;  %v7598_v50 = vld [vmem:[#allocation16 + $0x9a0] ss:$28 sps:$4 sm:$0xff]   ;;  %v7661_v52 = vld [vmem:[#allocation16 + $0xdc8] ss:$28 sps:$4 sm:$0xff]  }
 0x3f4   :  { %v2651_v58 = vadd.f32 %v2650_v54, %v2610_v53  ;;  %v2612_v59 = vadd.f32 %v2611_v56, %v1188_v51  ;;  %v2652_v60 = vpop.f32.mrf.mxu1  ;;  %v7603_v51 = vld [vmem:[#allocation16 + $0x96c] ss:$28 sps:$4 sm:$0xff]   ;;  %v7669_v53 = vld [vmem:[#allocation16 + $0xd94] ss:$28 sps:$4 sm:$0xff]  }
 0x3f5   :  { %v2613_v61 = vpop.f32.mrf.mxu0  ;;  %v7601_v54 = vld [vmem:[#allocation16 + $0x968] ss:$28 sps:$4 sm:$0xff]   ;;  %v7667_v56 = vld [vmem:[#allocation16 + $0xd90] ss:$28 sps:$4 sm:$0xff]  }
 0x3f6   :  { %vm2823_vm11 = vcmp.gt.f32.partialorder %v2651_v58, 0.0  ;;  %v2831_v62 = vmul.f32 0.2, %v2651_v58  ;;  %v2653_v63 = vadd.f32 %v2652_v60, %v2612_v59  ;;  %v2654_v0 = vpop.f32.mrf.mxu1  ;;  %5791 = vmatpush1.bf16.msra.mxu0 %v7568_v55  ;;  %v7606_v55 = vld [vmem:[#allocation16 + $0x934] ss:$28 sps:$4 sm:$0xff]  }
 0x3f7   :  { %v2614_v4 = vpop.f32.mrf.mxu0  ;;  %5792 = vmatprep.subr.bf16.mxu0 %v7573_v57  ;;  %v7675_v57 = vld [vmem:[#allocation16 + $0xd5c] ss:$28 sps:$4 sm:$0xff]   ;;  %v7681_v61 = vld [vmem:[#allocation16 + $0xd24] ss:$28 sps:$4 sm:$0xff]  }
 0x3f8   :  { %vm2824_vm12 = vcmp.gt.f32.partialorder %v2653_v63, 0.0  ;;  %v2832_v6 = vmul.f32 0.2, %v2653_v63  ;;  %v2655_v7 = vpop.f32.mrf.mxu1  ;;  %v2839_v8 = vsel %vm2823_vm11, %v2651_v58, %v2831_v62  ;;  %v7604_v58 = vld [vmem:[#allocation16 + $0x930] ss:$28 sps:$4 sm:$0xff]   ;;  %v1191_v4 = vsub.s32 4, %v8475_v41 }
 0x3f9   :  { %v8543_v14 = vpack.c.bf16 %v2839_v8, %v2839_v8  ;;  %v7609_v59 = vld [vmem:[#allocation16 + $0x8fc] ss:$28 sps:$4 sm:$0xff]   ;;  %v7685_v7 = vld [vmem:[#allocation16 + $0xce8] ss:$28 sps:$4 sm:$0xff]   ;;  %v1195_v8 = vsub.s32 5, %v8475_v41 }
 0x3fa   :  { %v2840_v9 = vsel %vm2824_vm12, %v2653_v63, %v2832_v6  ;;  %5793 = vmatpush1.bf16.msra.mxu0 %v7571_v2  ;;  %v7673_v60 = vld [vmem:[#allocation16 + $0xd58] ss:$28 sps:$4 sm:$0xff]   ;;  %v7612_v63 = vld [vmem:[#allocation16 + $0x8c4] ss:$28 sps:$4 sm:$0xff]   ;;  %v7687_v2 = vld [vmem:[#allocation16 + $0xcec] ss:$28 sps:$4 sm:$0xff]  }
 0x3fb   :  { %v8541_v11 = vpack.c.bf16 %v2840_v9, %v2840_v9  ;;  %5794 = vmatprep.subr.bf16.mxu0 %v7576_v5  ;;  %v7607_v62 = vld [vmem:[#allocation16 + $0x8f8] ss:$28 sps:$4 sm:$0xff]   ;;  %v7679_v0 = vld [vmem:[#allocation16 + $0xd20] ss:$28 sps:$4 sm:$0xff]  }
 0x3fc   :  { %v7610_v5 = vld [vmem:[#allocation16 + $0x8c0] ss:$28 sps:$4 sm:$0xff]   ;;  %v7618_v6 = vld [vmem:[#allocation16 + $0x194] ss:$28 sps:$4 sm:$0xff]  }
 0x3fd   :  { %5779 = vmatprep.mubr.bf16.mxu1 %v8541_v11  ;;  %v7693_v9 = vld [vmem:[#allocation16 + $0xcb4] ss:$28 sps:$4 sm:$0xff]  }
 0x3fe   :  { %5780 = vmatmul.mubr.bf16.vlgmr.msra.gmra.mxu1 %v8543_v14  ;;  %5795 = vmatpush1.bf16.msra.mxu0 %v7574_v10  ;;  %v1192_v10 = vrot.slane %v8517_v18, %v1191_v4 }
 0x3ff   :  { %5796 = vmatprep.subr.bf16.mxu0 %v7579_v12  ;;  %5830 = vmatpush1.bf16.msra.mxu1 %v7613_v13  ;;  %v7691_v12 = vld [vmem:[#allocation16 + $0xcb0] ss:$28 sps:$4 sm:$0xff]   ;;  %v1196_v13 = vrot.slane %v8517_v18, %v1195_v8 }
 0x400   :  { %5831 = vmatprep.subr.bf16.mxu1 %v7621_v15  ;;  %v7699_v15 = vld [vmem:[#allocation16 + $0xc7c] ss:$28 sps:$4 sm:$0xff]  }
 0x402   :  { %5797 = vmatpush1.bf16.msra.mxu0 %v7577_v16 }
 0x403   :  { %5798 = vmatprep.subr.bf16.mxu0 %v7582_v17  ;;  %5832 = vmatpush1.bf16.msra.mxu1 %v7619_v19 }
 0x404   :  { %5833 = vmatprep.subr.bf16.mxu1 %v7627_v20 }
 0x406   :  { %5799 = vmatpush1.bf16.msra.mxu0 %v7580_v21  ;;  %v7697_v21 = vld [vmem:[#allocation16 + $0xc78] ss:$28 sps:$4 sm:$0xff]  }
 0x407   :  { %5800 = vmatprep.subr.bf16.mxu0 %v7585_v22  ;;  %5834 = vmatpush1.bf16.msra.mxu1 %v7625_v25 }
 0x408   :  { %5835 = vmatprep.subr.bf16.mxu1 %v7633_v26 }
 0x40a   :  { %5801 = vmatpush1.bf16.msra.mxu0 %v7583_v27  ;;  %v7705_v27 = vld [vmem:[#allocation16 + $0xc44] ss:$28 sps:$4 sm:$0xff]  }
 0x40b   :  { %5802 = vmatprep.subr.bf16.mxu0 %v7588_v28  ;;  %5836 = vmatpush1.bf16.msra.mxu1 %v7631_v30 }
 0x40c   :  { %5837 = vmatprep.subr.bf16.mxu1 %v7639_v29 }
 0x40e   :  { %5803 = vmatpush1.bf16.msra.mxu0 %v7586_v31 }
 0x40f   :  { %5804 = vmatprep.subr.bf16.mxu0 %v7591_v32  ;;  %5838 = vmatpush1.bf16.msra.mxu1 %v7637_v36  ;;  %v7703_v36 = vld [vmem:[#allocation16 + $0xc40] ss:$28 sps:$4 sm:$0xff]  }
 0x410   :  { %5839 = vmatprep.subr.bf16.mxu1 %v7645_v33 }
 0x412   :  { %5805 = vmatpush2.bf16.msra.mxu0 %v7589_v37 }
 0x413   :  { %5806 = vmatprep.subr.bf16.mxu0 %v7594_v34  ;;  %5840 = vmatpush1.bf16.msra.mxu1 %v7643_v35  ;;  %v7711_v34 = vld [vmem:[#allocation16 + $0x514] ss:$28 sps:$4 sm:$0xff]  }
 0x414   :  { %5841 = vmatprep.subr.bf16.mxu1 %v7651_v38 }
 0x416   :  { %5807 = vmatpush2.bf16.msra.mxu0 %v7592_v23 }
 0x417   :  { %5808 = vmatprep.subr.bf16.mxu0 %v7597_v39  ;;  %5842 = vmatpush1.bf16.msra.mxu1 %v7649_v40  ;;  %v7616_v39 = vld [vmem:[#allocation16 + $0x190] ss:$28 sps:$4 sm:$0xff]  }
 0x418   :  { %5843 = vmatprep.subr.bf16.mxu1 %v7657_v43  ;;  %v7624_v43 = vld [vmem:[#allocation16 + $0x15c] ss:$28 sps:$4 sm:$0xff]  }
 0x41a   :  { %5809 = vmatpush2.bf16.msra.mxu0 %v7595_v45  ;;  %v7622_v45 = vld [vmem:[#allocation16 + $0x158] ss:$28 sps:$4 sm:$0xff]  }
 0x41b   :  { %5810 = vmatprep.subr.bf16.mxu0 %v7600_v24  ;;  %5844 = vmatpush1.bf16.msra.mxu1 %v7655_v46  ;;  %v7630_v24 = vld [vmem:[#allocation16 + $0x124] ss:$28 sps:$4 sm:$0xff]  }
 0x41c   :  { %5845 = vmatprep.subr.bf16.mxu1 %v7663_v48  ;;  %v7628_v46 = vld [vmem:[#allocation16 + $0x120] ss:$28 sps:$4 sm:$0xff]   ;;  %v7636_v48 = vld [vmem:[#allocation16 + $0xec] ss:$28 sps:$4 sm:$0xff]  }
 0x41e   :  { %5811 = vmatpush2.bf16.msra.mxu0 %v7598_v50  ;;  %v7634_v50 = vld [vmem:[#allocation16 + $0xe8] ss:$28 sps:$4 sm:$0xff]  }
 0x41f   :  { %5812 = vmatprep.subr.bf16.mxu0 %v7603_v51  ;;  %5846 = vmatpush2.bf16.msra.mxu1 %v7661_v52  ;;  %v7642_v51 = vld [vmem:[#allocation16 + $0xb4] ss:$28 sps:$4 sm:$0xff]  }
 0x420   :  { %5847 = vmatprep.subr.bf16.mxu1 %v7669_v53  ;;  %v7640_v52 = vld [vmem:[#allocation16 + $0xb0] ss:$28 sps:$4 sm:$0xff]   ;;  %v7648_v53 = vld [vmem:[#allocation16 + $0x7c] ss:$28 sps:$4 sm:$0xff]  }
 0x422   :  { %5813 = vmatpush2.bf16.msra.mxu0 %v7601_v54  ;;  %v7646_v54 = vld [vmem:[#allocation16 + $0x78] ss:$28 sps:$4 sm:$0xff]  }
 0x423   :  { %5814 = vmatprep.subr.bf16.mxu0 %v7606_v55  ;;  %5848 = vmatpush2.bf16.msra.mxu1 %v7667_v56  ;;  %v7654_v55 = vld [vmem:[#allocation16 + $0x44] ss:$28 sps:$4 sm:$0xff]  }
 0x424   :  { %5849 = vmatprep.subr.bf16.mxu1 %v7675_v57  ;;  %v7652_v56 = vld [vmem:[#allocation16 + $0x40] ss:$28 sps:$4 sm:$0xff]   ;;  %v7660_v57 = vld [vmem:[#allocation16 + $0xc] ss:$28 sps:$4 sm:$0xff]  }
 0x426   :  { %5815 = vmatpush2.bf16.msra.mxu0 %v7604_v58  ;;  %v7658_v58 = vld [vmem:[#allocation16 + $0x8] ss:$28 sps:$4 sm:$0xff]  }
 0x427   :  { %5816 = vmatprep.subr.bf16.mxu0 %v7609_v59  ;;  %5850 = vmatpush2.bf16.msra.mxu1 %v7673_v60  ;;  %v7666_v59 = vld [vmem:[#allocation16 + $0x354] ss:$28 sps:$4 sm:$0xff]  }
 0x428   :  { %5851 = vmatprep.subr.bf16.mxu1 %v7681_v61  ;;  %v7664_v60 = vld [vmem:[#allocation16 + $0x350] ss:$28 sps:$4 sm:$0xff]   ;;  %v7672_v61 = vld [vmem:[#allocation16 + $0x31c] ss:$28 sps:$4 sm:$0xff]  }
 0x42a   :  { %5817 = vmatpush2.bf16.msra.mxu0 %v7607_v62  ;;  %v7670_v62 = vld [vmem:[#allocation16 + $0x318] ss:$28 sps:$4 sm:$0xff]  }
 0x42b   :  { %5818 = vmatprep.subr.bf16.mxu0 %v7612_v63  ;;  %5852 = vmatpush2.bf16.msra.mxu1 %v7679_v0  ;;  %v7678_v63 = vld [vmem:[#allocation16 + $0x2e4] ss:$28 sps:$4 sm:$0xff]  }
 0x42c   :  { %5853 = vmatprep.subr.bf16.mxu1 %v7687_v2  ;;  %v7676_v0 = vld [vmem:[#allocation16 + $0x2e0] ss:$28 sps:$4 sm:$0xff]   ;;  %v7684_v2 = vld [vmem:[#allocation16 + $0x2ac] ss:$28 sps:$4 sm:$0xff]  }
 0x42e   :  { %5819 = vmatpush2.bf16.msra.mxu0 %v7610_v5  ;;  %v7682_v5 = vld [vmem:[#allocation16 + $0x2a8] ss:$28 sps:$4 sm:$0xff]  }
 0x42f   :  { %5870 = vmatprep.subr.bf16.mxu0 %v7618_v6  ;;  %5854 = vmatpush2.bf16.msra.mxu1 %v7685_v7  ;;  %v7690_v6 = vld [vmem:[#allocation16 + $0x274] ss:$28 sps:$4 sm:$0xff]   ;;  %v1199_v7 = vsub.s32 6, %v8475_v41 }
 0x430   :  { %5855 = vmatprep.subr.bf16.mxu1 %v7693_v9  ;;  %v7688_v9 = vld [vmem:[#allocation16 + $0x270] ss:$28 sps:$4 sm:$0xff]  }
 0x431   :  { %v2691_v16 = vpop.f32.mrf.mxu0 }
 0x432   :  { %v2692_v17 = vadd.f32 %v2691_v16, %v1192_v10  ;;  %v2732_v19 = vpop.f32.mrf.mxu1  ;;  %v7696_v10 = vld [vmem:[#allocation16 + $0x23c] ss:$28 sps:$4 sm:$0xff]  }
 0x433   :  { %v2693_v20 = vpop.f32.mrf.mxu0  ;;  %5856 = vmatpush2.bf16.msra.mxu1 %v7691_v12  ;;  %v1203_v12 = vsub.s32 7, %v8475_v41 }
 0x434   :  { %v2733_v22 = vadd.f32 %v2732_v19, %v2692_v17  ;;  %v2694_v25 = vadd.f32 %v2693_v20, %v1196_v13  ;;  %v2734_v26 = vpop.f32.mrf.mxu1  ;;  %5857 = vmatprep.subr.bf16.mxu1 %v7699_v15  ;;  %v1200_v13 = vrot.slane %v8517_v18, %v1199_v7  ;;  %v7694_v15 = vld [vmem:[#allocation16 + $0x238] ss:$28 sps:$4 sm:$0xff]   ;;  %v7702_v17 = vld [vmem:[#allocation16 + $0x204] ss:$28 sps:$4 sm:$0xff]  }
 0x435   :  { %v2695_v28 = vpop.f32.mrf.mxu0  ;;  %v1204_v16 = vrot.slane %v8517_v18, %v1203_v12  ;;  %v7706_v18 = vld [vmem:[#allocation16 + $0x1c8] ss:$28 sps:$4 sm:$0xff]  }
 0x436   :  { %vm2825_vm13 = vcmp.gt.f32.partialorder %v2733_v22, 0.0  ;;  %v2833_v30 = vmul.f32 0.2, %v2733_v22  ;;  %v2735_v29 = vadd.f32 %v2734_v26, %v2694_v25  ;;  %v2736_v31 = vpop.f32.mrf.mxu1  ;;  %v7700_v25 = vld [vmem:[#allocation16 + $0x200] ss:$28 sps:$4 sm:$0xff]  }
 0x437   :  { %v2696_v32 = vpop.f32.mrf.mxu0  ;;  %5858 = vmatpush2.bf16.msra.mxu1 %v7697_v21  ;;  %v7750_v12 = vld [vmem:[#allocation16 + $0x744] ss:$28 sps:$4 sm:$0xff]  }
 0x438   :  { %vm2826_vm14 = vcmp.gt.f32.partialorder %v2735_v29, 0.0  ;;  %v2834_v33 = vmul.f32 0.2, %v2735_v29  ;;  %v2737_v37 = vpop.f32.mrf.mxu1  ;;  %5859 = vmatprep.subr.bf16.mxu1 %v7705_v27  ;;  %v2841_v35 = vsel %vm2825_vm13, %v2733_v22, %v2833_v30  ;;  %v7708_v30 = vld [vmem:[#allocation16 + $0x1cc] ss:$28 sps:$4 sm:$0xff]  }
 0x439   :  { %v8557_v40 = vpack.c.bf16 %v2841_v35, %v2841_v35  ;;  %v7714_v35 = vld [vmem:[#allocation16 + $0x894] ss:$28 sps:$4 sm:$0xff]  }
 0x43a   :  { %v2842_v38 = vsel %vm2826_vm14, %v2735_v29, %v2834_v33 }
 0x43b   :  { %v8555_v23 = vpack.c.bf16 %v2842_v38, %v2842_v38  ;;  %5860 = vmatpush2.bf16.msra.mxu1 %v7703_v36 }
 0x43c   :  { %5911 = vmatprep.subr.bf16.mxu1 %v7711_v34 }
 0x43d   :  { %5820 = vmatprep.mubr.bf16.mxu0 %v8555_v23 }
 0x43e   :  { %5821 = vmatmul.mubr.bf16.vlgmr.msra.gmra.mxu0 %v8557_v40 }
 0x43f   :  { %5871 = vmatpush1.bf16.msra.mxu0 %v7616_v39  ;;  %5902 = vmatprep.mubr.bf16.mxu0 %v8527_v47 }
 0x440   :  { %5872 = vmatprep.subr.bf16.mxu0 %v7624_v43 }
 0x443   :  { %5873 = vmatpush1.bf16.msra.mxu0 %v7622_v45  ;;  %v7709_v45 = vld [vmem:[#allocation16 + $0x510] ss:$28 sps:$4 sm:$0xff]  }
 0x444   :  { %5874 = vmatprep.subr.bf16.mxu0 %v7630_v24  ;;  %v7712_v24 = vld [vmem:[#allocation16 + $0x890] ss:$28 sps:$4 sm:$0xff]  }
 0x447   :  { %5875 = vmatpush1.bf16.msra.mxu0 %v7628_v46 }
 0x448   :  { %5876 = vmatprep.subr.bf16.mxu0 %v7636_v48  ;;  %v7717_v48 = vld [vmem:[#allocation16 + $0x4dc] ss:$28 sps:$4 sm:$0xff]  }
 0x44b   :  { %5877 = vmatpush1.bf16.msra.mxu0 %v7634_v50  ;;  %v7720_v50 = vld [vmem:[#allocation16 + $0x85c] ss:$28 sps:$4 sm:$0xff]  }
 0x44c   :  { %5878 = vmatprep.subr.bf16.mxu0 %v7642_v51  ;;  %v7715_v51 = vld [vmem:[#allocation16 + $0x4d8] ss:$28 sps:$4 sm:$0xff]  }
 0x44f   :  { %5879 = vmatpush1.bf16.msra.mxu0 %v7640_v52  ;;  %v7718_v52 = vld [vmem:[#allocation16 + $0x858] ss:$28 sps:$4 sm:$0xff]  }
 0x450   :  { %5880 = vmatprep.subr.bf16.mxu0 %v7648_v53  ;;  %v7723_v53 = vld [vmem:[#allocation16 + $0x4a4] ss:$28 sps:$4 sm:$0xff]  }
 0x453   :  { %5881 = vmatpush1.bf16.msra.mxu0 %v7646_v54  ;;  %v7726_v54 = vld [vmem:[#allocation16 + $0x824] ss:$28 sps:$4 sm:$0xff]  }
 0x454   :  { %5882 = vmatprep.subr.bf16.mxu0 %v7654_v55  ;;  %v7721_v55 = vld [vmem:[#allocation16 + $0x4a0] ss:$28 sps:$4 sm:$0xff]  }
 0x457   :  { %5883 = vmatpush1.bf16.msra.mxu0 %v7652_v56  ;;  %v7724_v56 = vld [vmem:[#allocation16 + $0x820] ss:$28 sps:$4 sm:$0xff]  }
 0x458   :  { %5884 = vmatprep.subr.bf16.mxu0 %v7660_v57  ;;  %v7729_v57 = vld [vmem:[#allocation16 + $0x46c] ss:$28 sps:$4 sm:$0xff]  }
 0x45b   :  { %5885 = vmatpush1.bf16.msra.mxu0 %v7658_v58  ;;  %v7732_v58 = vld [vmem:[#allocation16 + $0x7ec] ss:$28 sps:$4 sm:$0xff]  }
 0x45c   :  { %5886 = vmatprep.subr.bf16.mxu0 %v7666_v59  ;;  %v7727_v59 = vld [vmem:[#allocation16 + $0x468] ss:$28 sps:$4 sm:$0xff]  }
 0x45f   :  { %5887 = vmatpush2.bf16.msra.mxu0 %v7664_v60  ;;  %v7730_v60 = vld [vmem:[#allocation16 + $0x7e8] ss:$28 sps:$4 sm:$0xff]  }
 0x460   :  { %5888 = vmatprep.subr.bf16.mxu0 %v7672_v61  ;;  %v7735_v61 = vld [vmem:[#allocation16 + $0x434] ss:$28 sps:$4 sm:$0xff]  }
 0x463   :  { %5889 = vmatpush2.bf16.msra.mxu0 %v7670_v62  ;;  %v7738_v62 = vld [vmem:[#allocation16 + $0x7b4] ss:$28 sps:$4 sm:$0xff]  }
 0x464   :  { %5890 = vmatprep.subr.bf16.mxu0 %v7678_v63  ;;  %v7733_v63 = vld [vmem:[#allocation16 + $0x430] ss:$28 sps:$4 sm:$0xff]  }
 0x467   :  { %5891 = vmatpush2.bf16.msra.mxu0 %v7676_v0  ;;  %v7736_v0 = vld [vmem:[#allocation16 + $0x7b0] ss:$28 sps:$4 sm:$0xff]  }
 0x468   :  { %5892 = vmatprep.subr.bf16.mxu0 %v7684_v2  ;;  %v7741_v2 = vld [vmem:[#allocation16 + $0x3fc] ss:$28 sps:$4 sm:$0xff]  }
 0x46b   :  { %5893 = vmatpush2.bf16.msra.mxu0 %v7682_v5  ;;  %v7744_v5 = vld [vmem:[#allocation16 + $0x77c] ss:$28 sps:$4 sm:$0xff]  }
 0x46c   :  { %5894 = vmatprep.subr.bf16.mxu0 %v7690_v6  ;;  %v7739_v6 = vld [vmem:[#allocation16 + $0x3f8] ss:$28 sps:$4 sm:$0xff]  }
 0x46f   :  { %5895 = vmatpush2.bf16.msra.mxu0 %v7688_v9  ;;  %v7742_v9 = vld [vmem:[#allocation16 + $0x778] ss:$28 sps:$4 sm:$0xff]  }
 0x470   :  { %5896 = vmatprep.subr.bf16.mxu0 %v7696_v10  ;;  %v7747_v10 = vld [vmem:[#allocation16 + $0x3c4] ss:$28 sps:$4 sm:$0xff]  }
 0x471   :  { %v2773_v19 = vpop.f32.mrf.mxu0 }
 0x472   :  { %v2774_v20 = vadd.f32 %v2773_v19, %v1200_v13  ;;  %v2814_v21 = vpop.f32.mrf.mxu1  ;;  %v7745_v13 = vld [vmem:[#allocation16 + $0x3c0] ss:$28 sps:$4 sm:$0xff]   ;;  %v7751_v19 = vld [vmem:[#allocation16 + $0x388] ss:$28 sps:$4 sm:$0xff]  }
 0x473   :  { %5897 = vmatpush2.bf16.msra.mxu0 %v7694_v15  ;;  %v2775_v22 = vpop.f32.mrf.mxu0  ;;  %v7748_v15 = vld [vmem:[#allocation16 + $0x740] ss:$28 sps:$4 sm:$0xff]  }
 0x474   :  { %v2815_v26 = vadd.f32 %v2814_v21, %v2774_v20  ;;  %v2776_v27 = vadd.f32 %v2775_v22, %v1204_v16  ;;  %v2816_v28 = vpop.f32.mrf.mxu1  ;;  %5898 = vmatprep.subr.bf16.mxu0 %v7702_v17  ;;  %v7753_v16 = vld [vmem:[#allocation16 + $0x38c] ss:$28 sps:$4 sm:$0xff]   ;;  %v7759_v21 = vld [vmem:[#allocation16 + $0x6d4] ss:$28 sps:$4 sm:$0xff]  }
 0x475   :  { %v2777_v29 = vpop.f32.mrf.mxu0  ;;  %v7756_v17 = vld [vmem:[#allocation16 + $0x70c] ss:$28 sps:$4 sm:$0xff]   ;;  %v7762_v22 = vld [vmem:[#allocation16 + $0xa54] ss:$28 sps:$4 sm:$0xff]  }
 0x476   :  { %vm2827_vm15 = vcmp.gt.f32.partialorder %v2815_v26, 0.0  ;;  %v2835_v31 = vmul.f32 0.2, %v2815_v26  ;;  %v2817_v32 = vadd.f32 %v2816_v28, %v2776_v27  ;;  %v2818_v36 = vpop.f32.mrf.mxu1  ;;  %v7754_v20 = vld [vmem:[#allocation16 + $0x708] ss:$28 sps:$4 sm:$0xff]  }
 0x477   :  { %5899 = vmatpush2.bf16.msra.mxu0 %v7700_v25  ;;  %v2778_v33 = vpop.f32.mrf.mxu0  ;;  %v7757_v25 = vld [vmem:[#allocation16 + $0x6d0] ss:$28 sps:$4 sm:$0xff]   ;;  %v7765_v27 = vld [vmem:[#allocation16 + $0x69c] ss:$28 sps:$4 sm:$0xff]  }
 0x478   :  { %vm2828_vm0 = vcmp.gt.f32.partialorder %v2817_v32, 0.0  ;;  %v2836_v37 = vmul.f32 0.2, %v2817_v32  ;;  %v2819_v34 = vpop.f32.mrf.mxu1  ;;  %5900 = vmatprep.subr.bf16.mxu0 %v7708_v30  ;;  %v2843_v38 = vsel %vm2827_vm15, %v2815_v26, %v2835_v31  ;;  %v7760_v26 = vld [vmem:[#allocation16 + $0xa50] ss:$28 sps:$4 sm:$0xff]  }
 0x479   :  { %v8570_v46 = vpack.c.bf16 %v2843_v38, %v2843_v38  ;;  %v7768_v28 = vld [vmem:[#allocation16 + $0xa1c] ss:$28 sps:$4 sm:$0xff]   ;;  %v7771_v31 = vld [vmem:[#allocation16 + $0x664] ss:$28 sps:$4 sm:$0xff]   ;;  %v7783_v38 = vld [vmem:[#allocation16 + $0x5f4] ss:$28 sps:$4 sm:$0xff]  }
 0x47a   :  { %v2844_v39 = vsel %vm2828_vm0, %v2817_v32, %v2836_v37  ;;  %v7763_v30 = vld [vmem:[#allocation16 + $0x698] ss:$28 sps:$4 sm:$0xff]   ;;  %v7774_v32 = vld [vmem:[#allocation16 + $0x9e4] ss:$28 sps:$4 sm:$0xff]   ;;  %v7780_v37 = vld [vmem:[#allocation16 + $0x9ac] ss:$28 sps:$4 sm:$0xff]  }
 0x47b   :  { %v8568_v43 = vpack.c.bf16 %v2844_v39, %v2844_v39  ;;  %5901 = vmatpush2.bf16.msra.mxu0 %v7706_v18  ;;  %v7766_v29 = vld [vmem:[#allocation16 + $0xa18] ss:$28 sps:$4 sm:$0xff]   ;;  %v7769_v36 = vld [vmem:[#allocation16 + $0x660] ss:$28 sps:$4 sm:$0xff]   ;;  %v7777_v18 = vld [vmem:[#allocation16 + $0x62c] ss:$28 sps:$4 sm:$0xff]  }
 0x47c   :  { %5952 = vmatprep.subr.bf16.mxu0 %v7714_v35  ;;  %v7772_v33 = vld [vmem:[#allocation16 + $0x9e0] ss:$28 sps:$4 sm:$0xff]   ;;  %v7775_v34 = vld [vmem:[#allocation16 + $0x628] ss:$28 sps:$4 sm:$0xff]   ;;  %v7786_v39 = vld [vmem:[#allocation16 + $0x974] ss:$28 sps:$4 sm:$0xff]  }
 0x47d   :  { %5861 = vmatprep.mubr.bf16.mxu1 %v8568_v43  ;;  %v7778_v35 = vld [vmem:[#allocation16 + $0x9a8] ss:$28 sps:$4 sm:$0xff]  }
 0x47e   :  { %5903 = vmatmul.mubr.bf16.vlgmr.msra.gmra.mxu0 %v8536_v49  ;;  %5862 = vmatmul.mubr.bf16.vlgmr.msra.gmra.mxu1 %v8570_v46 }
 0x47f   :  { %5912 = vmatpush1.bf16.msra.mxu1 %v7709_v45  ;;  %5953 = vmatpush1.bf16.msra.mxu0 %v7712_v24  ;;  %v7781_v45 = vld [vmem:[#allocation16 + $0x5f0] ss:$28 sps:$4 sm:$0xff]  }
 0x480   :  { %5984 = vmatprep.mubr.bf16.mxu0 %v8555_v23  ;;  %5943 = vmatprep.mubr.bf16.mxu1 %v8541_v11  ;;  %v7784_v24 = vld [vmem:[#allocation16 + $0x970] ss:$28 sps:$4 sm:$0xff]  }
 0x481   :  { %5913 = vmatprep.subr.bf16.mxu1 %v7717_v48  ;;  %5954 = vmatprep.subr.bf16.mxu0 %v7720_v50  ;;  %v7789_v48 = vld [vmem:[#allocation16 + $0x5bc] ss:$28 sps:$4 sm:$0xff]  }
 0x482   :  { %v7792_v50 = vld [vmem:[#allocation16 + $0x93c] ss:$28 sps:$4 sm:$0xff]  }
 0x483   :  { %5914 = vmatpush1.bf16.msra.mxu1 %v7715_v51  ;;  %5955 = vmatpush1.bf16.msra.mxu0 %v7718_v52  ;;  %v7787_v51 = vld [vmem:[#allocation16 + $0x5b8] ss:$28 sps:$4 sm:$0xff]  }
 0x484   :  { %5915 = vmatprep.subr.bf16.mxu1 %v7723_v53  ;;  %5956 = vmatprep.subr.bf16.mxu0 %v7726_v54  ;;  %v7790_v52 = vld [vmem:[#allocation16 + $0x938] ss:$28 sps:$4 sm:$0xff]   ;;  %v7795_v53 = vld [vmem:[#allocation16 + $0x584] ss:$28 sps:$4 sm:$0xff]  }
 0x485   :  { %v7798_v54 = vld [vmem:[#allocation16 + $0x904] ss:$28 sps:$4 sm:$0xff]  }
 0x487   :  { %5916 = vmatpush1.bf16.msra.mxu1 %v7721_v55  ;;  %5957 = vmatpush1.bf16.msra.mxu0 %v7724_v56 }
 0x488   :  { %5917 = vmatprep.subr.bf16.mxu1 %v7729_v57  ;;  %5958 = vmatprep.subr.bf16.mxu0 %v7732_v58  ;;  %v7793_v57 = vld [vmem:[#allocation16 + $0x580] ss:$28 sps:$4 sm:$0xff]  }
 0x489   :  { %v7796_v58 = vld [vmem:[#allocation16 + $0x900] ss:$28 sps:$4 sm:$0xff]  }
 0x48b   :  { %5918 = vmatpush1.bf16.msra.mxu1 %v7727_v59  ;;  %5959 = vmatpush1.bf16.msra.mxu0 %v7730_v60  ;;  %v7801_v59 = vld [vmem:[#allocation16 + $0x54c] ss:$28 sps:$4 sm:$0xff]  }
 0x48c   :  { %5919 = vmatprep.subr.bf16.mxu1 %v7735_v61  ;;  %5960 = vmatprep.subr.bf16.mxu0 %v7738_v62  ;;  %v7804_v60 = vld [vmem:[#allocation16 + $0x8cc] ss:$28 sps:$4 sm:$0xff]   ;;  %v8577_v62 = vld [vmem:[#allocation17] sm:$0xff] }
 0x48f   :  { %5920 = vmatpush1.bf16.msra.mxu1 %v7733_v63  ;;  %5961 = vmatpush1.bf16.msra.mxu0 %v7736_v0  ;;  %v7799_v0 = vld [vmem:[#allocation16 + $0x548] ss:$28 sps:$4 sm:$0xff]  }
 0x490   :  { %5921 = vmatprep.subr.bf16.mxu1 %v7741_v2  ;;  %5962 = vmatprep.subr.bf16.mxu0 %v7744_v5  ;;  %v7802_v2 = vld [vmem:[#allocation16 + $0x8c8] ss:$28 sps:$4 sm:$0xff]   ;;  %v7807_v5 = vld [vmem:[#allocation16 + $0xc14] ss:$28 sps:$4 sm:$0xff]  }
 0x493   :  { %5922 = vmatpush1.bf16.msra.mxu1 %v7739_v6  ;;  %5963 = vmatpush1.bf16.msra.mxu0 %v7742_v9  ;;  %v7810_v6 = vld [vmem:[#allocation16 + $0x19c] ss:$28 sps:$4 sm:$0xff]   ;;  %v3370_v9 = vrot.slane %v8577_v62, %v8478_v42 }
 0x494   :  { %5923 = vmatprep.subr.bf16.mxu1 %v7747_v10  ;;  %5964 = vmatprep.subr.bf16.mxu0 %v7750_v12  ;;  %v3374_v10 = vrot.slane %v8577_v62, %v8481_v44  ;;  %v7805_v12 = vld [vmem:[#allocation16 + $0xc10] ss:$28 sps:$4 sm:$0xff]   ;;  %v7811_v42 = vld [vmem:[#allocation16 + $0xbd8] ss:$28 sps:$4 sm:$0xff]  }
 0x497   :  { %5924 = vmatpush1.bf16.msra.mxu1 %v7745_v13  ;;  %5965 = vmatpush1.bf16.msra.mxu0 %v7748_v15  ;;  %v7808_v13 = vld [vmem:[#allocation16 + $0x198] ss:$28 sps:$4 sm:$0xff]  }
 0x498   :  { %5925 = vmatprep.subr.bf16.mxu1 %v7753_v16  ;;  %5966 = vmatprep.subr.bf16.mxu0 %v7756_v17  ;;  %v7813_v16 = vld [vmem:[#allocation16 + $0xbdc] ss:$28 sps:$4 sm:$0xff]   ;;  %v7816_v17 = vld [vmem:[#allocation16 + $0x164] ss:$28 sps:$4 sm:$0xff]  }
 0x49b   :  { %5926 = vmatpush1.bf16.msra.mxu1 %v7751_v19  ;;  %5967 = vmatpush1.bf16.msra.mxu0 %v7754_v20 }
 0x49c   :  { %5927 = vmatprep.subr.bf16.mxu1 %v7759_v21  ;;  %5968 = vmatprep.subr.bf16.mxu0 %v7762_v22  ;;  %v7814_v22 = vld [vmem:[#allocation16 + $0x160] ss:$28 sps:$4 sm:$0xff]  }
 0x49f   :  { %5928 = vmatpush2.bf16.msra.mxu1 %v7757_v25  ;;  %5969 = vmatpush2.bf16.msra.mxu0 %v7760_v26  ;;  %v7819_v25 = vld [vmem:[#allocation16 + $0xba4] ss:$28 sps:$4 sm:$0xff]  }
 0x4a0   :  { %5929 = vmatprep.subr.bf16.mxu1 %v7765_v27  ;;  %5970 = vmatprep.subr.bf16.mxu0 %v7768_v28  ;;  %v7822_v27 = vld [vmem:[#allocation16 + $0x12c] ss:$28 sps:$4 sm:$0xff]  }
 0x4a3   :  { %5930 = vmatpush2.bf16.msra.mxu1 %v7763_v30  ;;  %5971 = vmatpush2.bf16.msra.mxu0 %v7766_v29  ;;  %v7817_v30 = vld [vmem:[#allocation16 + $0xba0] ss:$28 sps:$4 sm:$0xff]  }
 0x4a4   :  { %5931 = vmatprep.subr.bf16.mxu1 %v7771_v31  ;;  %5972 = vmatprep.subr.bf16.mxu0 %v7774_v32  ;;  %v7820_v31 = vld [vmem:[#allocation16 + $0x128] ss:$28 sps:$4 sm:$0xff]  }
 0x4a5   :  { %v7825_v32 = vld [vmem:[#allocation16 + $0xb6c] ss:$28 sps:$4 sm:$0xff]  }
 0x4a7   :  { %5932 = vmatpush2.bf16.msra.mxu1 %v7769_v36  ;;  %5973 = vmatpush2.bf16.msra.mxu0 %v7772_v33  ;;  %v7828_v36 = vld [vmem:[#allocation16 + $0xf4] ss:$28 sps:$4 sm:$0xff]   ;;  %v7823_v33 = vld [vmem:[#allocation16 + $0xb68] ss:$28 sps:$4 sm:$0xff]  }
 0x4a8   :  { %5933 = vmatprep.subr.bf16.mxu1 %v7777_v18  ;;  %5974 = vmatprep.subr.bf16.mxu0 %v7780_v37  ;;  %v7826_v18 = vld [vmem:[#allocation16 + $0xf0] ss:$28 sps:$4 sm:$0xff]  }
 0x4a9   :  { %v7831_v37 = vld [vmem:[#allocation16 + $0xb34] ss:$28 sps:$4 sm:$0xff]  }
 0x4ab   :  { %5934 = vmatpush2.bf16.msra.mxu1 %v7775_v34  ;;  %5975 = vmatpush2.bf16.msra.mxu0 %v7778_v35  ;;  %v7834_v34 = vld [vmem:[#allocation16 + $0xbc] ss:$28 sps:$4 sm:$0xff]   ;;  %v7829_v35 = vld [vmem:[#allocation16 + $0xb30] ss:$28 sps:$4 sm:$0xff]  }
 0x4ac   :  { %5935 = vmatprep.subr.bf16.mxu1 %v7783_v38  ;;  %5976 = vmatprep.subr.bf16.mxu0 %v7786_v39  ;;  %v7832_v38 = vld [vmem:[#allocation16 + $0xb8] ss:$28 sps:$4 sm:$0xff]  }
 0x4ad   :  { %v7837_v39 = vld [vmem:[#allocation16 + $0xafc] ss:$28 sps:$4 sm:$0xff]  }
 0x4af   :  { %5936 = vmatpush2.bf16.msra.mxu1 %v7781_v45  ;;  %5977 = vmatpush2.bf16.msra.mxu0 %v7784_v24  ;;  %v7840_v45 = vld [vmem:[#allocation16 + $0x84] ss:$28 sps:$4 sm:$0xff]   ;;  %v7835_v24 = vld [vmem:[#allocation16 + $0xaf8] ss:$28 sps:$4 sm:$0xff]  }
 0x4b0   :  { %5937 = vmatprep.subr.bf16.mxu1 %v7789_v48  ;;  %5978 = vmatprep.subr.bf16.mxu0 %v7792_v50  ;;  %v7838_v48 = vld [vmem:[#allocation16 + $0x80] ss:$28 sps:$4 sm:$0xff]  }
 0x4b1   :  { %v5740_v55 = vpop.f32.mrf.mxu0  ;;  %v7843_v50 = vld [vmem:[#allocation16 + $0xac4] ss:$28 sps:$4 sm:$0xff]  }
 0x4b2   :  { %v5741_v15 = vadd.f32 %v5740_v55, %v3370_v9  ;;  %v7852_v55 = vld [vmem:[#allocation16 + $0x14] ss:$28 sps:$4 sm:$0xff]   ;;  %v7870_v9 = vld [vmem:[#allocation16 + $0x2ec] ss:$28 sps:$4 sm:$0xff]  }
 0x4b3   :  { %5938 = vmatpush2.bf16.msra.mxu1 %v7787_v51  ;;  %5979 = vmatpush2.bf16.msra.mxu0 %v7790_v52  ;;  %v5742_v56 = vpop.f32.mrf.mxu0  ;;  %v7846_v51 = vld [vmem:[#allocation16 + $0x4c] ss:$28 sps:$4 sm:$0xff]   ;;  %v7841_v52 = vld [vmem:[#allocation16 + $0xac0] ss:$28 sps:$4 sm:$0xff]  }
 0x4b4   :  { %5939 = vmatprep.subr.bf16.mxu1 %v7795_v53  ;;  %5980 = vmatprep.subr.bf16.mxu0 %v7798_v54  ;;  %v5743_v20 = vadd.f32 %v5742_v56, %v3374_v10  ;;  %v7844_v53 = vld [vmem:[#allocation16 + $0x48] ss:$28 sps:$4 sm:$0xff]   ;;  %v7865_v10 = vld [vmem:[#allocation16 + $0xd60] ss:$28 sps:$4 sm:$0xff]  }
 0x4b5   :  { %v5744_v61 = vpop.f32.mrf.mxu0  ;;  %v7849_v54 = vld [vmem:[#allocation16 + $0xa8c] ss:$28 sps:$4 sm:$0xff]  }
 0x4b6   :  { %v7847_v56 = vld [vmem:[#allocation16 + $0xa88] ss:$28 sps:$4 sm:$0xff]   ;;  %v7856_v61 = vld [vmem:[#allocation16 + $0x358] ss:$28 sps:$4 sm:$0xff]  }
 0x4b7   :  { %5940 = vmatpush2.bf16.msra.mxu1 %v7793_v57  ;;  %5981 = vmatpush2.bf16.msra.mxu0 %v7796_v58  ;;  %v5745_v63 = vpop.f32.mrf.mxu0  ;;  %v7850_v57 = vld [vmem:[#allocation16 + $0x10] ss:$28 sps:$4 sm:$0xff]  }
 0x4b8   :  { %5941 = vmatprep.subr.bf16.mxu1 %v7801_v59  ;;  %5982 = vmatprep.subr.bf16.mxu0 %v7804_v60  ;;  %v7855_v58 = vld [vmem:[#allocation16 + $0xdd4] ss:$28 sps:$4 sm:$0xff]   ;;  %v7858_v59 = vld [vmem:[#allocation16 + $0x35c] ss:$28 sps:$4 sm:$0xff]  }
 0x4b9   :  { %v7853_v60 = vld [vmem:[#allocation16 + $0xdd0] ss:$28 sps:$4 sm:$0xff]   ;;  %v7861_v63 = vld [vmem:[#allocation16 + $0xd9c] ss:$28 sps:$4 sm:$0xff]  }
 0x4bb   :  { %5942 = vmatpush2.bf16.msra.mxu1 %v7799_v0  ;;  %5983 = vmatpush2.bf16.msra.mxu0 %v7802_v2  ;;  %v7864_v0 = vld [vmem:[#allocation16 + $0x324] ss:$28 sps:$4 sm:$0xff]   ;;  %v7859_v2 = vld [vmem:[#allocation16 + $0xd98] ss:$28 sps:$4 sm:$0xff]  }
 0x4bc   :  { %5993 = vmatprep.subr.bf16.mxu1 %v7807_v5  ;;  %6034 = vmatprep.subr.bf16.mxu0 %v7810_v6  ;;  %v7862_v5 = vld [vmem:[#allocation16 + $0x320] ss:$28 sps:$4 sm:$0xff]  }
 0x4bd   :  { %v7867_v6 = vld [vmem:[#allocation16 + $0xd64] ss:$28 sps:$4 sm:$0xff]  }
 0x4be   :  { %5944 = vmatmul.mubr.bf16.vlgmr.msra.gmra.mxu1 %v8543_v14  ;;  %5985 = vmatmul.mubr.bf16.vlgmr.msra.gmra.mxu0 %v8557_v40  ;;  %v5781_v19 = vpop.f32.mrf.mxu1 }
 0x4bf   :  { %v8585_v21 = vadd.f32 %v5781_v19, %v5741_v15  ;;  %5994 = vmatpush1.bf16.msra.mxu1 %v7805_v12  ;;  %6025 = vmatprep.mubr.bf16.mxu1 %v8568_v43  ;;  %v7868_v12 = vld [vmem:[#allocation16 + $0x2e8] ss:$28 sps:$4 sm:$0xff]   ;;  %v7876_v15 = vld [vmem:[#allocation16 + $0x2b4] ss:$28 sps:$4 sm:$0xff]  }
 0x4c0   :  { %6035 = vmatpush1.bf16.msra.mxu0 %v7808_v13  ;;  %6066 = vmatprep.mubr.bf16.mxu0 %v8527_v47  ;;  %v5783_v44 = vpop.f32.mrf.mxu1  ;;  %v7873_v13 = vld [vmem:[#allocation16 + $0xd2c] ss:$28 sps:$4 sm:$0xff]   ;;  %v7879_v19 = vld [vmem:[#allocation16 + $0xcf4] ss:$28 sps:$4 sm:$0xff]  }
 0x4c1   :  { %v8589_v26 = vadd.f32 %v5783_v44, %v5743_v20  ;;  %5995 = vmatprep.subr.bf16.mxu1 %v7813_v16  ;;  %6036 = vmatprep.subr.bf16.mxu0 %v7816_v17  ;;  %v7871_v16 = vld [vmem:[#allocation16 + $0xd28] ss:$28 sps:$4 sm:$0xff]   ;;  %v7874_v17 = vld [vmem:[#allocation16 + $0x2b0] ss:$28 sps:$4 sm:$0xff]   ;;  %v7882_v20 = vld [vmem:[#allocation16 + $0x27c] ss:$28 sps:$4 sm:$0xff]  }
 0x4c2   :  { %v5785_v28 = vpop.f32.mrf.mxu1  ;;  %v7880_v44 = vld [vmem:[#allocation16 + $0x278] ss:$28 sps:$4 sm:$0xff]  }
 0x4c3   :  { %5996 = vmatpush1.bf16.msra.mxu1 %v7811_v42  ;;  %v7877_v42 = vld [vmem:[#allocation16 + $0xcf0] ss:$28 sps:$4 sm:$0xff]   ;;  %v7886_v28 = vld [vmem:[#allocation16 + $0x240] ss:$28 sps:$4 sm:$0xff]  }
 0x4c4   :  { %6037 = vmatpush1.bf16.msra.mxu0 %v7814_v22  ;;  %v5786_v29 = vpop.f32.mrf.mxu1  ;;  %5997 = vmatprep.subr.bf16.mxu1 %v7819_v25  ;;  %v7885_v22 = vld [vmem:[#allocation16 + $0xcbc] ss:$28 sps:$4 sm:$0xff]   ;;  %v7888_v25 = vld [vmem:[#allocation16 + $0x244] ss:$28 sps:$4 sm:$0xff]  }
 0x4c5   :  { %6038 = vmatprep.subr.bf16.mxu0 %v7822_v27  ;;  %v7883_v27 = vld [vmem:[#allocation16 + $0xcb8] ss:$28 sps:$4 sm:$0xff]   ;;  %v7894_v29 = vld [vmem:[#allocation16 + $0x20c] ss:$28 sps:$4 sm:$0xff]  }
 0x4c7   :  { %5998 = vmatpush1.bf16.msra.mxu1 %v7817_v30  ;;  %v7891_v30 = vld [vmem:[#allocation16 + $0xc84] ss:$28 sps:$4 sm:$0xff]  }
 0x4c8   :  { %6039 = vmatpush1.bf16.msra.mxu0 %v7820_v31  ;;  %5999 = vmatprep.subr.bf16.mxu1 %v7825_v32  ;;  %v7889_v31 = vld [vmem:[#allocation16 + $0xc80] ss:$28 sps:$4 sm:$0xff]   ;;  %v7892_v32 = vld [vmem:[#allocation16 + $0x208] ss:$28 sps:$4 sm:$0xff]  }
 0x4c9   :  { %6040 = vmatprep.subr.bf16.mxu0 %v7828_v36  ;;  %v7897_v36 = vld [vmem:[#allocation16 + $0xc4c] ss:$28 sps:$4 sm:$0xff]  }
 0x4cb   :  { %6000 = vmatpush1.bf16.msra.mxu1 %v7823_v33  ;;  %v7900_v33 = vld [vmem:[#allocation16 + $0x1d4] ss:$28 sps:$4 sm:$0xff]  }
 0x4cc   :  { %6041 = vmatpush1.bf16.msra.mxu0 %v7826_v18  ;;  %6001 = vmatprep.subr.bf16.mxu1 %v7831_v37  ;;  %v7895_v18 = vld [vmem:[#allocation16 + $0xc48] ss:$28 sps:$4 sm:$0xff]   ;;  %v7898_v37 = vld [vmem:[#allocation16 + $0x1d0] ss:$28 sps:$4 sm:$0xff]  }
 0x4cd   :  { %6042 = vmatprep.subr.bf16.mxu0 %v7834_v34  ;;  %v7903_v34 = vld [vmem:[#allocation16 + $0x51c] ss:$28 sps:$4 sm:$0xff]  }
 0x4cf   :  { %6002 = vmatpush1.bf16.msra.mxu1 %v7829_v35  ;;  %v7906_v35 = vld [vmem:[#allocation16 + $0x89c] ss:$28 sps:$4 sm:$0xff]  }
 0x4d0   :  { %6043 = vmatpush1.bf16.msra.mxu0 %v7832_v38  ;;  %6003 = vmatprep.subr.bf16.mxu1 %v7837_v39  ;;  %v7901_v38 = vld [vmem:[#allocation16 + $0x518] ss:$28 sps:$4 sm:$0xff]  }
 0x4d1   :  { %6044 = vmatprep.subr.bf16.mxu0 %v7840_v45  ;;  %v7904_v39 = vld [vmem:[#allocation16 + $0x898] ss:$28 sps:$4 sm:$0xff]   ;;  %v7909_v45 = vld [vmem:[#allocation16 + $0x4e4] ss:$28 sps:$4 sm:$0xff]  }
 0x4d3   :  { %6004 = vmatpush1.bf16.msra.mxu1 %v7835_v24 }
 0x4d4   :  { %6045 = vmatpush1.bf16.msra.mxu0 %v7838_v48  ;;  %6005 = vmatprep.subr.bf16.mxu1 %v7843_v50  ;;  %v7912_v48 = vld [vmem:[#allocation16 + $0x864] ss:$28 sps:$4 sm:$0xff]  }
 0x4d5   :  { %6046 = vmatprep.subr.bf16.mxu0 %v7846_v51  ;;  %v7907_v51 = vld [vmem:[#allocation16 + $0x4e0] ss:$28 sps:$4 sm:$0xff]  }
 0x4d7   :  { %6006 = vmatpush1.bf16.msra.mxu1 %v7841_v52 }
 0x4d8   :  { %6047 = vmatpush1.bf16.msra.mxu0 %v7844_v53  ;;  %6007 = vmatprep.subr.bf16.mxu1 %v7849_v54  ;;  %v7910_v53 = vld [vmem:[#allocation16 + $0x860] ss:$28 sps:$4 sm:$0xff]   ;;  %v7915_v54 = vld [vmem:[#allocation16 + $0x4ac] ss:$28 sps:$4 sm:$0xff]  }
 0x4d9   :  { %6048 = vmatprep.subr.bf16.mxu0 %v7852_v55  ;;  %v7918_v55 = vld [vmem:[#allocation16 + $0x82c] ss:$28 sps:$4 sm:$0xff]  }
 0x4db   :  { %6008 = vmatpush1.bf16.msra.mxu1 %v7847_v56 }
 0x4dc   :  { %6049 = vmatpush1.bf16.msra.mxu0 %v7850_v57  ;;  %6009 = vmatprep.subr.bf16.mxu1 %v7855_v58  ;;  %v7913_v57 = vld [vmem:[#allocation16 + $0x4a8] ss:$28 sps:$4 sm:$0xff]  }
 0x4dd   :  { %6050 = vmatprep.subr.bf16.mxu0 %v7858_v59  ;;  %v7916_v58 = vld [vmem:[#allocation16 + $0x828] ss:$28 sps:$4 sm:$0xff]   ;;  %v7921_v59 = vld [vmem:[#allocation16 + $0x474] ss:$28 sps:$4 sm:$0xff]  }
 0x4df   :  { %6010 = vmatpush2.bf16.msra.mxu1 %v7853_v60  ;;  %v7924_v60 = vld [vmem:[#allocation16 + $0x7f4] ss:$28 sps:$4 sm:$0xff]  }
 0x4e0   :  { %6051 = vmatpush2.bf16.msra.mxu0 %v7856_v61  ;;  %6011 = vmatprep.subr.bf16.mxu1 %v7861_v63  ;;  %v7919_v61 = vld [vmem:[#allocation16 + $0x470] ss:$28 sps:$4 sm:$0xff]  }
 0x4e1   :  { %6052 = vmatprep.subr.bf16.mxu0 %v7864_v0  ;;  %v7922_v63 = vld [vmem:[#allocation16 + $0x7f0] ss:$28 sps:$4 sm:$0xff]   ;;  %v7927_v0 = vld [vmem:[#allocation16 + $0x43c] ss:$28 sps:$4 sm:$0xff]  }
 0x4e3   :  { %6012 = vmatpush2.bf16.msra.mxu1 %v7859_v2  ;;  %v7930_v2 = vld [vmem:[#allocation16 + $0x7bc] ss:$28 sps:$4 sm:$0xff]  }
 0x4e4   :  { %6053 = vmatpush2.bf16.msra.mxu0 %v7862_v5  ;;  %6013 = vmatprep.subr.bf16.mxu1 %v7867_v6  ;;  %v7925_v5 = vld [vmem:[#allocation16 + $0x438] ss:$28 sps:$4 sm:$0xff]  }
 0x4e5   :  { %6054 = vmatprep.subr.bf16.mxu0 %v7870_v9  ;;  %v7928_v6 = vld [vmem:[#allocation16 + $0x7b8] ss:$28 sps:$4 sm:$0xff]   ;;  %v7933_v9 = vld [vmem:[#allocation16 + $0x404] ss:$28 sps:$4 sm:$0xff]  }
 0x4e7   :  { %6014 = vmatpush2.bf16.msra.mxu1 %v7865_v10  ;;  %v7936_v10 = vld [vmem:[#allocation16 + $0x784] ss:$28 sps:$4 sm:$0xff]  }
 0x4e8   :  { %6055 = vmatpush2.bf16.msra.mxu0 %v7868_v12  ;;  %6015 = vmatprep.subr.bf16.mxu1 %v7873_v13  ;;  %v7931_v12 = vld [vmem:[#allocation16 + $0x400] ss:$28 sps:$4 sm:$0xff]  }
 0x4e9   :  { %6056 = vmatprep.subr.bf16.mxu0 %v7876_v15  ;;  %v7934_v13 = vld [vmem:[#allocation16 + $0x780] ss:$28 sps:$4 sm:$0xff]   ;;  %v7939_v15 = vld [vmem:[#allocation16 + $0x3cc] ss:$28 sps:$4 sm:$0xff]  }
 0x4eb   :  { %6016 = vmatpush2.bf16.msra.mxu1 %v7871_v16  ;;  %v7942_v16 = vld [vmem:[#allocation16 + $0x74c] ss:$28 sps:$4 sm:$0xff]  }
 0x4ec   :  { %6057 = vmatpush2.bf16.msra.mxu0 %v7874_v17  ;;  %6017 = vmatprep.subr.bf16.mxu1 %v7879_v19  ;;  %v7937_v17 = vld [vmem:[#allocation16 + $0x3c8] ss:$28 sps:$4 sm:$0xff]  }
 0x4ed   :  { %6058 = vmatprep.subr.bf16.mxu0 %v7882_v20  ;;  %v7940_v19 = vld [vmem:[#allocation16 + $0x748] ss:$28 sps:$4 sm:$0xff]   ;;  %v7945_v20 = vld [vmem:[#allocation16 + $0x394] ss:$28 sps:$4 sm:$0xff]  }
 0x4ef   :  { %6018 = vmatpush2.bf16.msra.mxu1 %v7877_v42  ;;  %v7948_v42 = vld [vmem:[#allocation16 + $0x714] ss:$28 sps:$4 sm:$0xff]  }
 0x4f0   :  { %6059 = vmatpush2.bf16.msra.mxu0 %v7880_v44  ;;  %6019 = vmatprep.subr.bf16.mxu1 %v7885_v22  ;;  %v7943_v44 = vld [vmem:[#allocation16 + $0x390] ss:$28 sps:$4 sm:$0xff]  }
 0x4f1   :  { %6060 = vmatprep.subr.bf16.mxu0 %v7888_v25  ;;  %v7946_v22 = vld [vmem:[#allocation16 + $0x710] ss:$28 sps:$4 sm:$0xff]   ;;  %v7951_v25 = vld [vmem:[#allocation16 + $0x6dc] ss:$28 sps:$4 sm:$0xff]  }
 0x4f3   :  { %6020 = vmatpush2.bf16.msra.mxu1 %v7883_v27  ;;  %v7954_v27 = vld [vmem:[#allocation16 + $0xa5c] ss:$28 sps:$4 sm:$0xff]  }
 0x4f4   :  { %6061 = vmatpush2.bf16.msra.mxu0 %v7886_v28  ;;  %6021 = vmatprep.subr.bf16.mxu1 %v7891_v30  ;;  %v7949_v28 = vld [vmem:[#allocation16 + $0x6d8] ss:$28 sps:$4 sm:$0xff]  }
 0x4f5   :  { %6062 = vmatprep.subr.bf16.mxu0 %v7894_v29  ;;  %v7952_v30 = vld [vmem:[#allocation16 + $0xa58] ss:$28 sps:$4 sm:$0xff]   ;;  %v7957_v29 = vld [vmem:[#allocation16 + $0x6a4] ss:$28 sps:$4 sm:$0xff]  }
 0x4f7   :  { %6022 = vmatpush2.bf16.msra.mxu1 %v7889_v31  ;;  %v7960_v31 = vld [vmem:[#allocation16 + $0xa24] ss:$28 sps:$4 sm:$0xff]  }
 0x4f8   :  { %6063 = vmatpush2.bf16.msra.mxu0 %v7892_v32  ;;  %6023 = vmatprep.subr.bf16.mxu1 %v7897_v36  ;;  %v7955_v32 = vld [vmem:[#allocation16 + $0x6a0] ss:$28 sps:$4 sm:$0xff]  }
 0x4f9   :  { %6064 = vmatprep.subr.bf16.mxu0 %v7900_v33  ;;  %v7958_v36 = vld [vmem:[#allocation16 + $0xa20] ss:$28 sps:$4 sm:$0xff]   ;;  %v7963_v33 = vld [vmem:[#allocation16 + $0x66c] ss:$28 sps:$4 sm:$0xff]  }
 0x4fb   :  { %6024 = vmatpush2.bf16.msra.mxu1 %v7895_v18  ;;  %v7966_v18 = vld [vmem:[#allocation16 + $0x9ec] ss:$28 sps:$4 sm:$0xff]  }
 0x4fc   :  { %6065 = vmatpush2.bf16.msra.mxu0 %v7898_v37  ;;  %6075 = vmatprep.subr.bf16.mxu1 %v7903_v34  ;;  %v7961_v37 = vld [vmem:[#allocation16 + $0x668] ss:$28 sps:$4 sm:$0xff]  }
 0x4fd   :  { %6116 = vmatprep.subr.bf16.mxu0 %v7906_v35  ;;  %v7964_v34 = vld [vmem:[#allocation16 + $0x9e8] ss:$28 sps:$4 sm:$0xff]   ;;  %v7969_v35 = vld [vmem:[#allocation16 + $0x634] ss:$28 sps:$4 sm:$0xff]  }
 0x4fe   :  { %6026 = vmatmul.mubr.bf16.vlgmr.msra.gmra.mxu1 %v8570_v46  ;;  %v5822_v24 = vpop.f32.mrf.mxu0 }
 0x4ff   :  { %6067 = vmatmul.mubr.bf16.vlgmr.msra.gmra.mxu0 %v8536_v49  ;;  %v8594_v50 = vadd.f32 %v5822_v24, %v8585_v21  ;;  %6076 = vmatpush1.bf16.msra.mxu1 %v7901_v38  ;;  %v7972_v38 = vld [vmem:[#allocation16 + $0x9b4] ss:$28 sps:$4 sm:$0xff]   ;;  %v7975_v24 = vld [vmem:[#allocation16 + $0x5fc] ss:$28 sps:$4 sm:$0xff]  }
 0x500   :  { %6107 = vmatprep.mubr.bf16.mxu1 %v8541_v11  ;;  %6117 = vmatpush1.bf16.msra.mxu0 %v7904_v39  ;;  %v8597_v52 = vpop.f32.mrf.mxu0  ;;  %v7967_v39 = vld [vmem:[#allocation16 + $0x630] ss:$28 sps:$4 sm:$0xff]  }
 0x501   :  { %6148 = vmatprep.mubr.bf16.mxu0 %v8555_v23  ;;  %6077 = vmatprep.subr.bf16.mxu1 %v7909_v45  ;;  %v7970_v45 = vld [vmem:[#allocation16 + $0x9b0] ss:$28 sps:$4 sm:$0xff]  }
 0x502   :  { %6118 = vmatprep.subr.bf16.mxu0 %v7912_v48  ;;  %v5826_v56 = vpop.f32.mrf.mxu0  ;;  %v7978_v48 = vld [vmem:[#allocation16 + $0x97c] ss:$28 sps:$4 sm:$0xff]  }
 0x503   :  { %6078 = vmatpush1.bf16.msra.mxu1 %v7907_v51  ;;  %v7973_v51 = vld [vmem:[#allocation16 + $0x5f8] ss:$28 sps:$4 sm:$0xff]   ;;  %v7979_v56 = vld [vmem:[#allocation16 + $0x5c0] ss:$28 sps:$4 sm:$0xff]  }
 0x504   :  { %6119 = vmatpush1.bf16.msra.mxu0 %v7910_v53  ;;  %v5827_v21 = vpop.f32.mrf.mxu0  ;;  %6079 = vmatprep.subr.bf16.mxu1 %v7915_v54  ;;  %v7976_v53 = vld [vmem:[#allocation16 + $0x978] ss:$28 sps:$4 sm:$0xff]   ;;  %v7981_v54 = vld [vmem:[#allocation16 + $0x5c4] ss:$28 sps:$4 sm:$0xff]  }
 0x505   :  { %6120 = vmatprep.subr.bf16.mxu0 %v7918_v55  ;;  %v7984_v55 = vld [vmem:[#allocation16 + $0x944] ss:$28 sps:$4 sm:$0xff]   ;;  %v7987_v21 = vld [vmem:[#allocation16 + $0x58c] ss:$28 sps:$4 sm:$0xff]  }
 0x507   :  { %6080 = vmatpush1.bf16.msra.mxu1 %v7913_v57  ;;  %v7982_v57 = vld [vmem:[#allocation16 + $0x940] ss:$28 sps:$4 sm:$0xff]  }
 0x508   :  { %6121 = vmatpush1.bf16.msra.mxu0 %v7916_v58  ;;  %6081 = vmatprep.subr.bf16.mxu1 %v7921_v59  ;;  %v7990_v58 = vld [vmem:[#allocation16 + $0x90c] ss:$28 sps:$4 sm:$0xff]  }
 0x509   :  { %6122 = vmatprep.subr.bf16.mxu0 %v7924_v60  ;;  %v7985_v59 = vld [vmem:[#allocation16 + $0x588] ss:$28 sps:$4 sm:$0xff]  }
 0x50a   :  { %v7988_v60 = vld [vmem:[#allocation16 + $0x908] ss:$28 sps:$4 sm:$0xff]  }
 0x50b   :  { %6082 = vmatpush1.bf16.msra.mxu1 %v7919_v61  ;;  %v7993_v61 = vld [vmem:[#allocation16 + $0x554] ss:$28 sps:$4 sm:$0xff]  }
 0x50c   :  { %6123 = vmatpush1.bf16.msra.mxu0 %v7922_v63  ;;  %6083 = vmatprep.subr.bf16.mxu1 %v7927_v0  ;;  %v7996_v63 = vld [vmem:[#allocation16 + $0x8d4] ss:$28 sps:$4 sm:$0xff]  }
 0x50d   :  { %6124 = vmatprep.subr.bf16.mxu0 %v7930_v2  ;;  %v7991_v0 = vld [vmem:[#allocation16 + $0x550] ss:$28 sps:$4 sm:$0xff]  }
 0x50e   :  { %v7994_v2 = vld [vmem:[#allocation16 + $0x8d0] ss:$28 sps:$4 sm:$0xff]  }
 0x50f   :  { %6084 = vmatpush1.bf16.msra.mxu1 %v7925_v5  ;;  %v7999_v5 = vld [vmem:[#allocation16 + $0xc1c] ss:$28 sps:$4 sm:$0xff]  }
 0x510   :  { %6125 = vmatpush1.bf16.msra.mxu0 %v7928_v6  ;;  %6085 = vmatprep.subr.bf16.mxu1 %v7933_v9  ;;  %v8000_v6 = vld [vmem:[#allocation16 + $0x360] ss:$28 sps:$4 sm:$0xff]   ;;  %v7997_v9 = vld [vmem:[#allocation16 + $0xc18] ss:$28 sps:$4 sm:$0xff]  }
 0x511   :  { %6126 = vmatprep.subr.bf16.mxu0 %v7936_v10  ;;  %v8001_v10 = vld [vmem:[#allocation16 + $0x1a0] ss:$28 sps:$4 sm:$0xff]  }
 0x513   :  { %6086 = vmatpush1.bf16.msra.mxu1 %v7931_v12  ;;  %v8004_v12 = vld [vmem:[#allocation16 + $0xbe4] ss:$28 sps:$4 sm:$0xff]  }
 0x514   :  { %6127 = vmatpush1.bf16.msra.mxu0 %v7934_v13  ;;  %6087 = vmatprep.subr.bf16.mxu1 %v7939_v15 }
 0x515   :  { %6128 = vmatprep.subr.bf16.mxu0 %v7942_v16  ;;  %v8005_v16 = vld [vmem:[#allocation16 + $0x328] ss:$28 sps:$4 sm:$0xff]  }
 0x517   :  { %6088 = vmatpush1.bf16.msra.mxu1 %v7937_v17  ;;  %v5825_v17 = vadd.f32 %v8597_v52, %v8589_v26 }
 0x518   :  { %6129 = vmatpush1.bf16.msra.mxu0 %v7940_v19  ;;  %6089 = vmatprep.subr.bf16.mxu1 %v7945_v20  ;;  %v8002_v20 = vld [vmem:[#allocation16 + $0xbe0] ss:$28 sps:$4 sm:$0xff]  }
 0x519   :  { %6130 = vmatprep.subr.bf16.mxu0 %v7948_v42 }
 0x51b   :  { %6090 = vmatpush1.bf16.msra.mxu1 %v7943_v44 }
 0x51c   :  { %6131 = vmatpush1.bf16.msra.mxu0 %v7946_v22  ;;  %6091 = vmatprep.subr.bf16.mxu1 %v7951_v25  ;;  %v8006_v22 = vld [vmem:[#allocation16 + $0x168] ss:$28 sps:$4 sm:$0xff]  }
 0x51d   :  { %6132 = vmatprep.subr.bf16.mxu0 %v7954_v27  ;;  %v8009_v25 = vld [vmem:[#allocation16 + $0xbac] ss:$28 sps:$4 sm:$0xff]  }
 0x51f   :  { %6092 = vmatpush2.bf16.msra.mxu1 %v7949_v28  ;;  %v8010_v28 = vld [vmem:[#allocation16 + $0x2f0] ss:$28 sps:$4 sm:$0xff]  }
 0x520   :  { %6133 = vmatpush2.bf16.msra.mxu0 %v7952_v30  ;;  %6093 = vmatprep.subr.bf16.mxu1 %v7957_v29 }
 0x521   :  { %6134 = vmatprep.subr.bf16.mxu0 %v7960_v31  ;;  %v8011_v31 = vld [vmem:[#allocation16 + $0x130] ss:$28 sps:$4 sm:$0xff]  }
 0x523   :  { %6094 = vmatpush2.bf16.msra.mxu1 %v7955_v32  ;;  %v8014_v32 = vld [vmem:[#allocation16 + $0xb74] ss:$28 sps:$4 sm:$0xff]  }
 0x524   :  { %6135 = vmatpush2.bf16.msra.mxu0 %v7958_v36  ;;  %6095 = vmatprep.subr.bf16.mxu1 %v7963_v33  ;;  %v8015_v36 = vld [vmem:[#allocation16 + $0x2b8] ss:$28 sps:$4 sm:$0xff]  }
 0x525   :  { %6136 = vmatprep.subr.bf16.mxu0 %v7966_v18  ;;  %v8016_v33 = vld [vmem:[#allocation16 + $0xf8] ss:$28 sps:$4 sm:$0xff]  }
 0x526   :  { %v8019_v18 = vld [vmem:[#allocation16 + $0xb3c] ss:$28 sps:$4 sm:$0xff]  }
 0x527   :  { %6096 = vmatpush2.bf16.msra.mxu1 %v7961_v37  ;;  %v8020_v37 = vld [vmem:[#allocation16 + $0x280] ss:$28 sps:$4 sm:$0xff]  }
 0x528   :  { %6137 = vmatpush2.bf16.msra.mxu0 %v7964_v34  ;;  %6097 = vmatprep.subr.bf16.mxu1 %v7969_v35  ;;  %v8017_v34 = vld [vmem:[#allocation16 + $0xb38] ss:$28 sps:$4 sm:$0xff]   ;;  %v8021_v35 = vld [vmem:[#allocation16 + $0xc0] ss:$28 sps:$4 sm:$0xff]  }
 0x529   :  { %6138 = vmatprep.subr.bf16.mxu0 %v7972_v38  ;;  %v8024_v38 = vld [vmem:[#allocation16 + $0xb04] ss:$28 sps:$4 sm:$0xff]  }
 0x52b   :  { %6098 = vmatpush2.bf16.msra.mxu1 %v7967_v39  ;;  %v8025_v39 = vld [vmem:[#allocation16 + $0x248] ss:$28 sps:$4 sm:$0xff]  }
 0x52c   :  { %6139 = vmatpush2.bf16.msra.mxu0 %v7970_v45  ;;  %6099 = vmatprep.subr.bf16.mxu1 %v7975_v24  ;;  %v8022_v24 = vld [vmem:[#allocation16 + $0xb00] ss:$28 sps:$4 sm:$0xff]  }
 0x52d   :  { %6140 = vmatprep.subr.bf16.mxu0 %v7978_v48 }
 0x52f   :  { %6100 = vmatpush2.bf16.msra.mxu1 %v7973_v51  ;;  %v8026_v51 = vld [vmem:[#allocation16 + $0x88] ss:$28 sps:$4 sm:$0xff]  }
 0x530   :  { %6141 = vmatpush2.bf16.msra.mxu0 %v7976_v53  ;;  %6101 = vmatprep.subr.bf16.mxu1 %v7981_v54  ;;  %v8029_v53 = vld [vmem:[#allocation16 + $0xacc] ss:$28 sps:$4 sm:$0xff]  }
 0x531   :  { %6142 = vmatprep.subr.bf16.mxu0 %v7984_v55  ;;  %v8030_v54 = vld [vmem:[#allocation16 + $0x210] ss:$28 sps:$4 sm:$0xff]  }
 0x533   :  { %6102 = vmatpush2.bf16.msra.mxu1 %v7979_v56  ;;  %v8027_v56 = vld [vmem:[#allocation16 + $0xac8] ss:$28 sps:$4 sm:$0xff]  }
 0x534   :  { %6143 = vmatpush2.bf16.msra.mxu0 %v7982_v57  ;;  %6103 = vmatprep.subr.bf16.mxu1 %v7987_v21  ;;  %v8031_v57 = vld [vmem:[#allocation16 + $0x50] ss:$28 sps:$4 sm:$0xff]  }
 0x535   :  { %6144 = vmatprep.subr.bf16.mxu0 %v7990_v58  ;;  %v8034_v21 = vld [vmem:[#allocation16 + $0xa94] ss:$28 sps:$4 sm:$0xff]  }
 0x536   :  { %v8035_v58 = vld [vmem:[#allocation16 + $0x1d8] ss:$28 sps:$4 sm:$0xff]  }
 0x537   :  { %6104 = vmatpush2.bf16.msra.mxu1 %v7985_v59  ;;  %v8032_v59 = vld [vmem:[#allocation16 + $0xa90] ss:$28 sps:$4 sm:$0xff]  }
 0x538   :  { %6145 = vmatpush2.bf16.msra.mxu0 %v7988_v60  ;;  %6105 = vmatprep.subr.bf16.mxu1 %v7993_v61  ;;  %v8036_v60 = vld [vmem:[#allocation16 + $0x18] ss:$28 sps:$4 sm:$0xff]  }
 0x539   :  { %6146 = vmatprep.subr.bf16.mxu0 %v7996_v63  ;;  %v8039_v61 = vld [vmem:[#allocation16 + $0xddc] ss:$28 sps:$4 sm:$0xff]  }
 0x53a   :  { %v8040_v63 = vld [vmem:[#allocation16 + $0xa60] ss:$28 sps:$4 sm:$0xff]  }
 0x53b   :  { %6106 = vmatpush2.bf16.msra.mxu1 %v7991_v0  ;;  %v8037_v0 = vld [vmem:[#allocation16 + $0xdd8] ss:$28 sps:$4 sm:$0xff]  }
 0x53c   :  { %6147 = vmatpush2.bf16.msra.mxu0 %v7994_v2  ;;  %6157 = vmatprep.subr.bf16.mxu1 %v7999_v5  ;;  %v8041_v2 = vld [vmem:[#allocation16 + $0x8a0] ss:$28 sps:$4 sm:$0xff]  }
 0x53d   :  { %7221 = vmatprep.subr.bf16.mxu0 %v8000_v6  ;;  %v8044_v5 = vld [vmem:[#allocation16 + $0xda4] ss:$28 sps:$4 sm:$0xff]  }
 0x53e   :  { %v8600_v13 = vpop.f32.mrf.mxu0  ;;  %6108 = vmatmul.mubr.bf16.vlgmr.msra.gmra.mxu1 %v8543_v14  ;;  %v5863_v15 = vpop.f32.mrf.mxu1  ;;  %v8045_v6 = vld [vmem:[#allocation16 + $0xa28] ss:$28 sps:$4 sm:$0xff]  }
 0x53f   :  { %6149 = vmatmul.mubr.bf16.vlgmr.msra.gmra.mxu0 %v8557_v40  ;;  %v5864_v19 = vadd.f32 %v5863_v15, %v8594_v50  ;;  %6158 = vmatpush1.bf16.msra.mxu1 %v7997_v9  ;;  %v8007_v50 = vld [vmem:[#allocation16 + $0xba8] ss:$28 sps:$4 sm:$0xff]   ;;  %v8042_v9 = vld [vmem:[#allocation16 + $0xda0] ss:$28 sps:$4 sm:$0xff]   ;;  %v8050_v15 = vld [vmem:[#allocation16 + $0x9f0] ss:$28 sps:$4 sm:$0xff]  }
 0x540   :  { %6189 = vmatprep.mubr.bf16.mxu1 %v8568_v43  ;;  %7222 = vmatpush3.bf16.msra.mxu0 %v8001_v10  ;;  %v8608_v42 = vpop.f32.mrf.mxu0  ;;  %v5865_v44 = vpop.f32.mrf.mxu1  ;;  %v8046_v10 = vld [vmem:[#allocation16 + $0x868] ss:$28 sps:$4 sm:$0xff]  }
 0x541   :  { %6230 = vmatprep.mubr.bf16.mxu0 %v8527_v47  ;;  %v5866_v27 = vadd.f32 %v5865_v44, %v5825_v17  ;;  %6159 = vmatprep.subr.bf16.mxu1 %v8004_v12  ;;  %8109 = vtanh.f32 %v5864_v19  ;;  %v8012_v47 = vld [vmem:[#allocation16 + $0xb70] ss:$28 sps:$4 sm:$0xff]   ;;  %v8056_v44 = vld [vmem:[#allocation16 + $0x7f8] ss:$28 sps:$4 sm:$0xff]  }
 0x542   :  { %v5908_v26 = vpop.f32.mrf.mxu0  ;;  %7223 = vmatprep.subr.bf16.mxu0 %v8005_v16  ;;  %v5867_v52 = vpop.f32.mrf.mxu1  ;;  %v8049_v12 = vld [vmem:[#allocation16 + $0xd6c] ss:$28 sps:$4 sm:$0xff]   ;;  %v8054_v19 = vld [vmem:[#allocation16 + $0xd34] ss:$28 sps:$4 sm:$0xff]  }
 0x543   :  { %8111 = vtanh.f32 %v5866_v27  ;;  %6160 = vmatpush1.bf16.msra.mxu1 %v8002_v20  ;;  %v8047_v16 = vld [vmem:[#allocation16 + $0xd68] ss:$28 sps:$4 sm:$0xff]   ;;  %v8051_v17 = vld [vmem:[#allocation16 + $0x830] ss:$28 sps:$4 sm:$0xff]   ;;  %v8055_v20 = vld [vmem:[#allocation16 + $0x9b8] ss:$28 sps:$4 sm:$0xff]  }
 0x544   :  { %7224 = vmatpush3.bf16.msra.mxu0 %v8006_v22  ;;  %v5909_v30 = vpop.f32.mrf.mxu0  ;;  %v5868_v29 = vpop.f32.mrf.mxu1  ;;  %6161 = vmatprep.subr.bf16.mxu1 %v8009_v25  ;;  %v8059_v22 = vld [vmem:[#allocation16 + $0xcfc] ss:$28 sps:$4 sm:$0xff]   ;;  %v8065_v26 = vld [vmem:[#allocation16 + $0x948] ss:$28 sps:$4 sm:$0xff]  }
 0x545   :  { %7225 = vmatprep.subr.bf16.mxu0 %v8010_v28  ;;  %v8057_v25 = vld [vmem:[#allocation16 + $0xcf8] ss:$28 sps:$4 sm:$0xff]   ;;  %v8061_v27 = vld [vmem:[#allocation16 + $0x7c0] ss:$28 sps:$4 sm:$0xff]   ;;  %v8069_v30 = vld [vmem:[#allocation16 + $0xc8c] ss:$28 sps:$4 sm:$0xff]  }
 0x546   :  { %v8064_v28 = vld [vmem:[#allocation16 + $0xcc4] ss:$28 sps:$4 sm:$0xff]   ;;  %v8070_v29 = vld [vmem:[#allocation16 + $0x910] ss:$28 sps:$4 sm:$0xff]  }
 0x547   :  { %6162 = vmatpush1.bf16.msra.mxu1 %v8007_v50  ;;  %v8062_v52 = vld [vmem:[#allocation16 + $0xcc0] ss:$28 sps:$4 sm:$0xff]   ;;  %v8066_v50 = vld [vmem:[#allocation16 + $0x788] ss:$28 sps:$4 sm:$0xff]  }
 0x548   :  { %7226 = vmatpush3.bf16.msra.mxu0 %v8011_v31  ;;  %6163 = vmatprep.subr.bf16.mxu1 %v8014_v32  ;;  %v8067_v31 = vld [vmem:[#allocation16 + $0xc88] ss:$28 sps:$4 sm:$0xff]   ;;  %v8071_v32 = vld [vmem:[#allocation16 + $0x750] ss:$28 sps:$4 sm:$0xff]  }
 0x549   :  { %7227 = vmatprep.subr.bf16.mxu0 %v8015_v36  ;;  %v8074_v36 = vld [vmem:[#allocation16 + $0xc54] ss:$28 sps:$4 sm:$0xff]  }
 0x54b   :  { %6164 = vmatpush1.bf16.msra.mxu1 %v8012_v47  ;;  %v8075_v47 = vld [vmem:[#allocation16 + $0x8d8] ss:$28 sps:$4 sm:$0xff]  }
 0x54c   :  { %7228 = vmatpush3.bf16.msra.mxu0 %v8016_v33  ;;  %6165 = vmatprep.subr.bf16.mxu1 %v8019_v18  ;;  %v8072_v33 = vld [vmem:[#allocation16 + $0xc50] ss:$28 sps:$4 sm:$0xff]   ;;  %v8076_v18 = vld [vmem:[#allocation16 + $0x718] ss:$28 sps:$4 sm:$0xff]  }
 0x54d   :  { %7229 = vmatprep.subr.bf16.mxu0 %v8020_v37  ;;  %v8077_v37 = vld [vmem:[#allocation16 + $0x6e0] ss:$28 sps:$4 sm:$0xff]  }
 0x54e   :  { %v8110_v45 = vpop.eup %8109 }
 0x54f   :  { %6166 = vmatpush1.bf16.msra.mxu1 %v8017_v34  ;;  %v3378_v34 = vrot.slane %v8577_v62, %v8486_v1 }
 0x550   :  { %v8112_v48 = vpop.eup %8111  ;;  %7230 = vmatpush3.bf16.msra.mxu0 %v8021_v35  ;;  %6167 = vmatprep.subr.bf16.mxu1 %v8024_v38  ;;  %v8078_v35 = vld [vmem:[#allocation16 + $0x520] ss:$28 sps:$4 sm:$0xff]   ;;  %v8079_v38 = vld [vmem:[#allocation16 + $0x6a8] ss:$28 sps:$4 sm:$0xff]  }
 0x551   :  { %7231 = vmatprep.subr.bf16.mxu0 %v8025_v39  ;;  %v7212_v55 = vpack.c.bf16 %v8112_v48, %v8110_v45  ;;  %v5905_v39 = vadd.f32 %v8600_v13, %v3378_v34 }
 0x553   :  { %6168 = vmatpush1.bf16.msra.mxu1 %v8022_v24  ;;  %6394 = vst [vmem:[#allocation19] sm:$0xff] %v7212_v55 }
 0x554   :  { %7232 = vmatpush3.bf16.msra.mxu0 %v8026_v51  ;;  %6169 = vmatprep.subr.bf16.mxu1 %v8029_v53  ;;  %v8080_v51 = vld [vmem:[#allocation16 + $0x4e8] ss:$28 sps:$4 sm:$0xff]   ;;  %v8081_v53 = vld [vmem:[#allocation16 + $0x670] ss:$28 sps:$4 sm:$0xff]  }
 0x555   :  { %7233 = vmatprep.subr.bf16.mxu0 %v8030_v54 }
 0x557   :  { %6170 = vmatpush1.bf16.msra.mxu1 %v8027_v56  ;;  %v8082_v56 = vld [vmem:[#allocation16 + $0x4b0] ss:$28 sps:$4 sm:$0xff]  }
 0x558   :  { %7234 = vmatpush3.bf16.msra.mxu0 %v8031_v57  ;;  %6171 = vmatprep.subr.bf16.mxu1 %v8034_v21 }
 0x559   :  { %7235 = vmatprep.subr.bf16.mxu0 %v8035_v58  ;;  %v8084_v58 = vld [vmem:[#allocation16 + $0x478] ss:$28 sps:$4 sm:$0xff]  }
 0x55b   :  { %6172 = vmatpush1.bf16.msra.mxu1 %v8032_v59  ;;  %v8086_v59 = vld [vmem:[#allocation16 + $0x440] ss:$28 sps:$4 sm:$0xff]  }
 0x55c   :  { %7236 = vmatpush3.bf16.msra.mxu0 %v8036_v60  ;;  %6173 = vmatprep.subr.bf16.mxu1 %v8039_v61  ;;  %v8087_v60 = vld [vmem:[#allocation16 + $0x5c8] ss:$28 sps:$4 sm:$0xff]  }
 0x55d   :  { %7265 = vmatprep.subr.bf16.mxu0 %v8040_v63  ;;  %v8088_v61 = vld [vmem:[#allocation16 + $0x408] ss:$28 sps:$4 sm:$0xff]   ;;  %v8089_v63 = vld [vmem:[#allocation16 + $0x590] ss:$28 sps:$4 sm:$0xff]  }
 0x55f   :  { %6231 = vmatmul.mubr.bf16.vlgmr.msra.gmra.mxu0 %v8536_v49  ;;  %6174 = vmatpush2.bf16.msra.mxu1 %v8037_v0  ;;  %v8052_v49 = vld [vmem:[#allocation16 + $0xd30] ss:$28 sps:$4 sm:$0xff]  }
 0x560   :  { %7266 = vmatpush3.bf16.msra.mxu0 %v8041_v2  ;;  %6310 = vmatprep.mubr.bf16.mxu0 %v8555_v23  ;;  %v8060_v23 = vld [vmem:[#allocation16 + $0x980] ss:$28 sps:$4 sm:$0xff]   ;;  %v8090_v0 = vld [vmem:[#allocation16 + $0x3d0] ss:$28 sps:$4 sm:$0xff]   ;;  %v8091_v2 = vld [vmem:[#allocation16 + $0x558] ss:$28 sps:$4 sm:$0xff]  }
 0x561   :  { %6175 = vmatprep.subr.bf16.mxu1 %v8044_v5  ;;  %7267 = vmatprep.subr.bf16.mxu0 %v8045_v6  ;;  %v8092_v5 = vld [vmem:[#allocation16 + $0x398] ss:$28 sps:$4 sm:$0xff]   ;;  %v8093_v6 = vld [vmem:[#allocation16 + $0xde0] ss:$28 sps:$4 sm:$0xff]  }
 0x563   :  { %6176 = vmatpush2.bf16.msra.mxu1 %v8042_v9  ;;  %v8094_v9 = vld [vmem:[#allocation16 + $0xc20] ss:$28 sps:$4 sm:$0xff]  }
 0x564   :  { %7268 = vmatpush3.bf16.msra.mxu0 %v8046_v10  ;;  %6177 = vmatprep.subr.bf16.mxu1 %v8049_v12  ;;  %v8095_v10 = vld [vmem:[#allocation16 + $0xda8] ss:$28 sps:$4 sm:$0xff]  }
 0x565   :  { %7269 = vmatprep.subr.bf16.mxu0 %v8050_v15  ;;  %v8096_v12 = vld [vmem:[#allocation16 + $0xbe8] ss:$28 sps:$4 sm:$0xff]   ;;  %v8097_v15 = vld [vmem:[#allocation16 + $0xd70] ss:$28 sps:$4 sm:$0xff]  }
 0x567   :  { %6178 = vmatpush2.bf16.msra.mxu1 %v8047_v16  ;;  %v8098_v16 = vld [vmem:[#allocation16 + $0xbb0] ss:$28 sps:$4 sm:$0xff]  }
 0x568   :  { %7270 = vmatpush3.bf16.msra.mxu0 %v8051_v17  ;;  %6179 = vmatprep.subr.bf16.mxu1 %v8054_v19  ;;  %v8099_v17 = vld [vmem:[#allocation16 + $0xd38] ss:$28 sps:$4 sm:$0xff]  }
 0x569   :  { %7271 = vmatprep.subr.bf16.mxu0 %v8055_v20  ;;  %v8100_v19 = vld [vmem:[#allocation16 + $0xb78] ss:$28 sps:$4 sm:$0xff]   ;;  %v8101_v20 = vld [vmem:[#allocation16 + $0xd00] ss:$28 sps:$4 sm:$0xff]  }
 0x56b   :  { %6180 = vmatpush2.bf16.msra.mxu1 %v8052_v49  ;;  %v8102_v49 = vld [vmem:[#allocation16 + $0xb40] ss:$28 sps:$4 sm:$0xff]  }
 0x56c   :  { %7272 = vmatpush3.bf16.msra.mxu0 %v8056_v44  ;;  %6181 = vmatprep.subr.bf16.mxu1 %v8059_v22  ;;  %v8103_v44 = vld [vmem:[#allocation16 + $0xcc8] ss:$28 sps:$4 sm:$0xff]   ;;  %v8105_v22 = vld [vmem:[#allocation16 + $0xc90] ss:$28 sps:$4 sm:$0xff]  }
 0x56d   :  { %7273 = vmatprep.subr.bf16.mxu0 %v8060_v23  ;;  %v8107_v23 = vld [vmem:[#allocation16 + $0xc58] ss:$28 sps:$4 sm:$0xff]  }
 0x56f   :  { %6182 = vmatpush2.bf16.msra.mxu1 %v8057_v25  ;;  %v8627_v25 = vld [vmem:[#allocation17] sm:$0xff] }
 0x570   :  { %7274 = vmatpush3.bf16.msra.mxu0 %v8061_v27  ;;  %6183 = vmatprep.subr.bf16.mxu1 %v8064_v28  ;;  %v3382_v27 = vrot.slane %v8627_v25, %v8489_v3  ;;  %v8108_v28 = vld [vmem:[#allocation16 + $0xa98] ss:$28 sps:$4 sm:$0xff]  }
 0x571   :  { %7275 = vmatprep.subr.bf16.mxu0 %v8065_v26 }
 0x572   :  { %v5907_v26 = vadd.f32 %v8608_v42, %v3382_v27 }
 0x573   :  { %6184 = vmatpush2.bf16.msra.mxu1 %v8062_v52 }
 0x574   :  { %7276 = vmatpush3.bf16.msra.mxu0 %v8066_v50  ;;  %6185 = vmatprep.subr.bf16.mxu1 %v8069_v30 }
 0x575   :  { %7277 = vmatprep.subr.bf16.mxu0 %v8070_v29 }
 0x577   :  { %6186 = vmatpush2.bf16.msra.mxu1 %v8067_v31 }
 0x578   :  { %7278 = vmatpush3.bf16.msra.mxu0 %v8071_v32  ;;  %6187 = vmatprep.subr.bf16.mxu1 %v8074_v36 }
 0x579   :  { %7279 = vmatprep.subr.bf16.mxu0 %v8075_v47 }
 0x57b   :  { %6188 = vmatpush2.bf16.msra.mxu1 %v8072_v33 }
 0x57c   :  { %7280 = vmatpush3.bf16.msra.mxu0 %v8076_v18  ;;  %7243 = vmatprep.subr.bf16.mxu1 %v8077_v37 }
 0x57e   :  { %v5945_v45 = vpop.f32.mrf.mxu1  ;;  %v5986_v24 = vpop.f32.mrf.mxu0  ;;  %6190 = vmatmul.mubr.bf16.vlgmr.msra.gmra.mxu1 %v8570_v46 }
 0x57f   :  { %v5946_v48 = vadd.f32 %v5945_v45, %v5905_v39  ;;  %6311 = vmatmul.mubr.bf16.vlgmr.msra.gmra.mxu0 %v8557_v40  ;;  %7244 = vmatpush3.bf16.msra.mxu1 %v8078_v35  ;;  %v8083_v40 = vld [vmem:[#allocation16 + $0x638] ss:$28 sps:$4 sm:$0xff]  }
 0x580   :  { %6270 = vmatprep.mubr.bf16.mxu1 %v8541_v11  ;;  %v8619_v1 = vpop.f32.mrf.mxu1  ;;  %v8621_v62 = vpop.f32.mrf.mxu0  ;;  %7245 = vmatprep.subr.bf16.mxu1 %v8079_v38  ;;  %v8085_v11 = vld [vmem:[#allocation16 + $0x600] ss:$28 sps:$4 sm:$0xff]  }
 0x581   :  { %v8623_v54 = vadd.f32 %v5986_v24, %v5946_v48  ;;  %v5948_v52 = vadd.f32 %v8619_v1, %v5907_v26 }
 0x582   :  { %v5949_v13 = vpop.f32.mrf.mxu1  ;;  %v5990_v55 = vpop.f32.mrf.mxu0 }
 0x583   :  { %7246 = vmatpush3.bf16.msra.mxu1 %v8080_v51  ;;  %v5989_v30 = vadd.f32 %v8621_v62, %v5948_v52 }
 0x584   :  { %v5950_v57 = vpop.f32.mrf.mxu1  ;;  %v5991_v21 = vpop.f32.mrf.mxu0  ;;  %7247 = vmatprep.subr.bf16.mxu1 %v8081_v53 }
 0x585   :  { %v3390_v57 = vrot.slane %v8627_v25, %v1195_v8 }
 0x587   :  { %7248 = vmatpush3.bf16.msra.mxu1 %v8082_v56  ;;  %v3386_v56 = vrot.slane %v8627_v25, %v1191_v4 }
 0x588   :  { %7249 = vmatprep.subr.bf16.mxu1 %v8083_v40 }
 0x58b   :  { %7250 = vmatpush3.bf16.msra.mxu1 %v8084_v58 }
 0x58c   :  { %7251 = vmatprep.subr.bf16.mxu1 %v8085_v11 }
 0x58f   :  { %7252 = vmatpush3.bf16.msra.mxu1 %v8086_v59 }
 0x590   :  { %7253 = vmatprep.subr.bf16.mxu1 %v8087_v60 }
 0x593   :  { %7254 = vmatpush3.bf16.msra.mxu1 %v8088_v61 }
 0x594   :  { %7255 = vmatprep.subr.bf16.mxu1 %v8089_v63 }
 0x597   :  { %7256 = vmatpush3.bf16.msra.mxu1 %v8090_v0 }
 0x598   :  { %7257 = vmatprep.subr.bf16.mxu1 %v8091_v2 }
 0x59b   :  { %7258 = vmatpush3.bf16.msra.mxu1 %v8092_v5 }
 0x59c   :  { %7287 = vmatprep.subr.bf16.mxu1 %v8093_v6 }
 0x59e   :  { %6271 = vmatmul.mubr.bf16.vlgmr.msra.gmra.mxu1 %v8543_v14  ;;  %v8104_v14 = vld [vmem:[#allocation16 + $0xb08] ss:$28 sps:$4 sm:$0xff]  }
 0x59f   :  { %7288 = vmatpush3.bf16.msra.mxu1 %v8094_v9  ;;  %6350 = vmatprep.mubr.bf16.mxu1 %v8568_v43  ;;  %v8106_v43 = vld [vmem:[#allocation16 + $0xad0] ss:$28 sps:$4 sm:$0xff]  }
 0x5a0   :  { %7289 = vmatprep.subr.bf16.mxu1 %v8095_v10 }
 0x5a3   :  { %7290 = vmatpush3.bf16.msra.mxu1 %v8096_v12 }
 0x5a4   :  { %7291 = vmatprep.subr.bf16.mxu1 %v8097_v15 }
 0x5a7   :  { %7292 = vmatpush3.bf16.msra.mxu1 %v8098_v16 }
 0x5a8   :  { %7293 = vmatprep.subr.bf16.mxu1 %v8099_v17 }
 0x5ab   :  { %7294 = vmatpush3.bf16.msra.mxu1 %v8100_v19 }
 0x5ac   :  { %7295 = vmatprep.subr.bf16.mxu1 %v8101_v20 }
 0x5af   :  { %7296 = vmatpush3.bf16.msra.mxu1 %v8102_v49 }
 0x5b0   :  { %7297 = vmatprep.subr.bf16.mxu1 %v8103_v44  ;;  %v3394_v44 = vrot.slane %v8627_v25, %v1199_v7 }
 0x5b3   :  { %7298 = vmatpush3.bf16.msra.mxu1 %v8104_v14 }
 0x5b4   :  { %7299 = vmatprep.subr.bf16.mxu1 %v8105_v22 }
 0x5b7   :  { %7300 = vmatpush3.bf16.msra.mxu1 %v8106_v43 }
 0x5b8   :  { %7301 = vmatprep.subr.bf16.mxu1 %v8107_v23 }
 0x5bb   :  { %7302 = vmatpush3.bf16.msra.mxu1 %v8108_v28 }
 0x5be   :  { %v6027_v50 = vpop.f32.mrf.mxu1  ;;  %6351 = vmatmul.mubr.bf16.vlgmr.msra.gmra.mxu1 %v8570_v46 }
 0x5bf   :  { %v6028_v29 = vadd.f32 %v6027_v50, %v8623_v54  ;;  %v6068_v31 = vpop.f32.mrf.mxu0 }
 0x5c0   :  { %v6029_v32 = vpop.f32.mrf.mxu1  ;;  %v6069_v21 = vadd.f32 %v6068_v31, %v3386_v56 }
 0x5c1   :  { %v6030_v36 = vadd.f32 %v6029_v32, %v5989_v30  ;;  %v6070_v47 = vpop.f32.mrf.mxu0  ;;  %8113 = vtanh.f32 %v6028_v29 }
 0x5c2   :  { %v6031_v3 = vpop.f32.mrf.mxu1  ;;  %v6071_v40 = vadd.f32 %v6070_v47, %v3390_v57 }
 0x5c3   :  { %8115 = vtanh.f32 %v6030_v36  ;;  %v6072_v33 = vpop.f32.mrf.mxu0 }
 0x5c4   :  { %v6032_v18 = vpop.f32.mrf.mxu1 }
 0x5c5   :  { %v6073_v42 = vpop.f32.mrf.mxu0 }
 0x5ce   :  { %v8114_v37 = vpop.eup %8113 }
 0x5d0   :  { %v8116_v34 = vpop.eup %8115 }
 0x5d1   :  { %v7213_v35 = vpack.c.bf16 %v8116_v34, %v8114_v37 }
 0x5d3   :  { %6395 = vst [vmem:[#allocation19 + $0x8] sm:$0xff] %v7213_v35 }
 0x5fe   :  { %v6109_v38 = vpop.f32.mrf.mxu1 }
 0x5ff   :  { %v6150_v46 = vpop.f32.mrf.mxu0  ;;  %v6110_v58 = vadd.f32 %v6109_v38, %v6069_v21 }
 0x600   :  { %v6111_v39 = vpop.f32.mrf.mxu1 }
 0x601   :  { %v6152_v45 = vpop.f32.mrf.mxu0  ;;  %v6112_v11 = vadd.f32 %v6111_v39, %v6071_v40  ;;  %v6151_v59 = vadd.f32 %v6150_v46, %v6110_v58 }
 0x602   :  { %v6113_v24 = vpop.f32.mrf.mxu1 }
 0x603   :  { %v6154_v48 = vpop.f32.mrf.mxu0  ;;  %v6153_v61 = vadd.f32 %v6152_v45, %v6112_v11 }
 0x604   :  { %v6114_v51 = vpop.f32.mrf.mxu1 }
 0x605   :  { %v6155_v1 = vpop.f32.mrf.mxu0 }
 0x61f   :  { %v7237_v62 = vpop.f32.mrf.mxu0 }
 0x621   :  { %v7238_v53 = vpop.f32.mrf.mxu0 }
 0x622   :  { %v7239_v54 = vadd.f32 %v7238_v53, %v7237_v62 }
 0x623   :  { %v7240_v13 = vpop.f32.mrf.mxu0 }
 0x624   :  { %v6233_v22 = vadd.f32 %v7239_v54, %v3394_v44 }
 0x625   :  { %v7241_v55 = vpop.f32.mrf.mxu0 }
 0x63e   :  { %v6191_v60 = vpop.f32.mrf.mxu1 }
 0x63f   :  { %v6192_v63 = vadd.f32 %v6191_v60, %v6151_v59  ;;  %v7281_v0 = vpop.f32.mrf.mxu0 }
 0x640   :  { %v6193_v2 = vpop.f32.mrf.mxu1 }
 0x641   :  { %v6194_v5 = vadd.f32 %v6193_v2, %v6153_v61  ;;  %v7282_v6 = vpop.f32.mrf.mxu0  ;;  %8117 = vtanh.f32 %v6192_v63 }
 0x642   :  { %v6195_v9 = vpop.f32.mrf.mxu1  ;;  %v7283_v27 = vadd.f32 %v7282_v6, %v7281_v0 }
 0x643   :  { %8119 = vtanh.f32 %v6194_v5  ;;  %v7284_v4 = vpop.f32.mrf.mxu0 }
 0x644   :  { %v6196_v10 = vpop.f32.mrf.mxu1 }
 0x645   :  { %v7285_v12 = vpop.f32.mrf.mxu0 }
 0x64e   :  { %v8118_v15 = vpop.eup %8117 }
 0x650   :  { %v8120_v8 = vpop.eup %8119 }
 0x651   :  { %v7214_v16 = vpack.c.bf16 %v8120_v8, %v8118_v15 }
 0x653   :  { %6396 = vst [vmem:[#allocation19 + $0x10] sm:$0xff] %v7214_v16 }
 0x65e   :  { %v7259_v17 = vpop.f32.mrf.mxu1 }
 0x660   :  { %v7260_v19 = vpop.f32.mrf.mxu1 }
 0x661   :  { %v7261_v14 = vadd.f32 %v7260_v19, %v7259_v17 }
 0x662   :  { %v7262_v20 = vpop.f32.mrf.mxu1 }
 0x663   :  { %v6273_v43 = vadd.f32 %v7261_v14, %v6233_v22 }
 0x664   :  { %v7263_v49 = vpop.f32.mrf.mxu1 }
 0x665   :  { %v6313_v26 = vadd.f32 %v7283_v27, %v6273_v43 }
 0x67e   :  { %v7303_v23 = vpop.f32.mrf.mxu1 }
 0x680   :  { %v7304_v28 = vpop.f32.mrf.mxu1 }
 0x681   :  { %v7305_v52 = vadd.f32 %v7304_v28, %v7303_v23 }
 0x682   :  { %v7306_v50 = vpop.f32.mrf.mxu1 }
 0x683   :  { %v6353_v30 = vadd.f32 %v7305_v52, %v6313_v26 }
 0x684   :  { %v7307_v29 = vpop.f32.mrf.mxu1 }
 0x685   :  { %8121 = vtanh.f32 %v6353_v30 }
 0x692   :  { %v8122_v31 = vpop.eup %8121 }
 0x693   :  { %v7215_v32 = vpack.c.bf16 %v8122_v31, %v8122_v31 }
 0x695   :  { %6397 = vst [vmem:[#allocation19 + $0x18] sm:$0xf] %v7215_v32 }
 0x696   :  { %8335 = shalt.err (!%p8332_p12)
}
 0x697   :  { %6407 = dma.vmem_to_hbm [thread:$0]  %s6405_s29, 448, %s8659_s11, [#allocation4]  }
 0x698   :  { %8356 = dma.done.wait [#allocation4], 448  }
 0x699   :  { %8357 = vsyncadd [#allocation4], 4294966848 }
 0x69a   :  { %6411 = vsyncpa [#allocation3], 1 }
 0x69b   :  { %6412 = vsyncpa [#allocation6], 1 }
 0x69c   :  { %6413 = vsyncpa [#allocation9], 1 }
 0x69d   :  { %6414 = vsyncpa [#allocation12], 1 }
 0x69e   :  { %6415 = vsyncpa [#allocation15], 1 }
 0x69f   :  { %6416 = vsyncpa [#allocation18], 1 }
 0x6a0   :  { %6417 = vsyncpa [#allocation4], 1 }

</bundles_post_ra>
